<compile_context>
chip_gen: v7x
topology: tpu7x:2x2x1
jax: 0.10.0
libtpu: 0.0.40
codegen_flags: <defaults>
</compile_context>

<pallas_src>
import functools

import jax
import jax.numpy as jnp
from jax.experimental import pallas as pl
from jax.experimental.pallas import tpu as pltpu


def _round_up(x, m):
    return (x + m - 1) // m * m


# ----------------------------------------------------------------------------
# fused Pallas kernel: one batch element per grid step
# ----------------------------------------------------------------------------
def _attention_module_kernel(x_ref, sa_w_ref, sa_b_ref, conv_w_ref, conv_b_ref,
                             gamma_ref, beta_ref, oh_ref, oht_ref, o_ref,
                             xg_ref, *, h, w, c_in, c_out_p, inv_count, eps):
    """x_ref: (1, h+2, w+2, c_in) spatially zero-padded NHWC image (f32)."""
    x = x_ref[0]                                               # (h+2, w+2, c_in)

    # --- spatial attention gate: x * sigmoid(1x1 conv(x)) --------------------
    att = jax.nn.sigmoid(
        jnp.sum(x * sa_w_ref[...], axis=-1, keepdims=True) + sa_b_ref[...])
    # Border rows/cols of x are zero, so the gated map stays correctly
    # zero-padded for the 3x3 conv below.
    xg_ref[...] = x * att                                      # VMEM-resident, f32

    # --- 3x3 conv (stride 1, pad 1) as 9 shifted matmuls ---------------------
    acc = jnp.zeros((h * w, c_out_p), jnp.float32)
    for kh in range(3):
        for kw in range(3):
            patch = xg_ref[kh:kh + h, kw:kw + w, :]            # (h, w, c_in)
            patch = patch.reshape(h * w, c_in).astype(jnp.bfloat16)
            acc = acc + jnp.dot(patch, conv_w_ref[kh * 3 + kw],
                                preferred_element_type=jnp.float32)
    y = acc + conv_b_ref[...]                                  # (h*w, c_out_p)

    # --- GroupNorm(20) + ReLU (two-pass stats, all in VMEM) ------------------
    s = jnp.sum(y, axis=0, keepdims=True)                      # (1, c_out_p)
    mean_g = jnp.dot(s, oh_ref[...], preferred_element_type=jnp.float32) * inv_count
    mean_c = jnp.dot(mean_g, oht_ref[...], preferred_element_type=jnp.float32)
    yc = y - mean_c
    ss = jnp.sum(yc * yc, axis=0, keepdims=True)
    var_g = jnp.dot(ss, oh_ref[...], preferred_element_type=jnp.float32) * inv_count
    inv_g = jax.lax.rsqrt(var_g + eps)
    inv_c = jnp.dot(inv_g, oht_ref[...], preferred_element_type=jnp.float32)
    out = yc * inv_c * gamma_ref[...] + beta_ref[...]
    o_ref[0] = jnp.maximum(out, 0.0)


# ----------------------------------------------------------------------------
# wrapper (PyTorch-layout params, NCHW in/out)
# ----------------------------------------------------------------------------
def attention_module_forward(x_nchw, params, *, groups=20, eps=1e-5):
    n, c_in, h, w = x_nchw.shape
    c_out = params["conv_b"].shape[0]
    assert c_out % groups == 0
    gs = c_out // groups
    c_out_p = max(_round_up(c_out, 128), 128)
    pad_c = c_out_p - c_out
    hp, wp = h + 2, w + 2

    # NCHW -> NHWC, spatial zero-pad for the 3x3 conv (plain-JAX glue).
    x = jnp.transpose(x_nchw, (0, 2, 3, 1))
    xp = jnp.pad(x, ((0, 0), (1, 1), (1, 1), (0, 0)))

    # spatial-attention 1x1 conv params
    sa_w = params["sa_w"].reshape(1, 1, c_in).astype(jnp.float32)
    sa_b = params["sa_b"].reshape(1, 1, 1).astype(jnp.float32)

    # conv1 weights: torch (Cout, Cin, kh, kw) -> (kh*3+kw, Cin, Cout_padded) bf16
    conv_w = jnp.transpose(params["conv_w"], (2, 3, 1, 0)).reshape(9, c_in, c_out)
    conv_w = jnp.pad(conv_w, ((0, 0), (0, 0), (0, pad_c))).astype(jnp.bfloat16)
    conv_b = jnp.pad(params["conv_b"], (0, pad_c)).reshape(1, c_out_p).astype(jnp.float32)
    gamma = jnp.pad(params["gn_w"], (0, pad_c)).reshape(1, c_out_p).astype(jnp.float32)
    beta = jnp.pad(params["gn_b"], (0, pad_c)).reshape(1, c_out_p).astype(jnp.float32)

    # channel -> group one-hot map (padded channels map to no group -> output 0)
    ch = jnp.arange(c_out_p)
    onehot = ((ch[:, None] // gs == jnp.arange(groups)[None, :]) &
              (ch[:, None] < c_out)).astype(jnp.float32)        # (c_out_p, groups)
    onehot_t = onehot.T                                          # (groups, c_out_p)

    kernel = functools.partial(
        _attention_module_kernel, h=h, w=w, c_in=c_in, c_out_p=c_out_p,
        inv_count=1.0 / (h * w * gs), eps=eps)

    out = pl.pallas_call(
        kernel,
        grid=(n,),
        in_specs=[
            pl.BlockSpec((1, hp, wp, c_in), lambda i: (i, 0, 0, 0)),
            pl.BlockSpec((1, 1, c_in), lambda i: (0, 0, 0)),
            pl.BlockSpec((1, 1, 1), lambda i: (0, 0, 0)),
            pl.BlockSpec((9, c_in, c_out_p), lambda i: (0, 0, 0)),
            pl.BlockSpec((1, c_out_p), lambda i: (0, 0)),
            pl.BlockSpec((1, c_out_p), lambda i: (0, 0)),
            pl.BlockSpec((1, c_out_p), lambda i: (0, 0)),
            pl.BlockSpec((c_out_p, groups), lambda i: (0, 0)),
            pl.BlockSpec((groups, c_out_p), lambda i: (0, 0)),
        ],
        out_specs=pl.BlockSpec((1, h * w, c_out_p), lambda i: (i, 0, 0)),
        out_shape=jax.ShapeDtypeStruct((n, h * w, c_out_p), jnp.float32),
        scratch_shapes=[pltpu.VMEM((hp, wp, c_in), jnp.float32)],
        compiler_params=pltpu.CompilerParams(dimension_semantics=("parallel",)),
    )(xp, sa_w, sa_b, conv_w, conv_b, gamma, beta, onehot, onehot_t)

    out = out.reshape(n, h, w, c_out_p)[:, :, :, :c_out]
    return jnp.transpose(out, (0, 3, 1, 2))                     # back to NCHW


# ----------------------------------------------------------------------------
# pure-JAX f32 reference (for correctness check)
# ----------------------------------------------------------------------------
def attention_module_ref(x_nchw, params, *, groups=20, eps=1e-5):
    x = jnp.transpose(x_nchw, (0, 2, 3, 1))                     # NHWC
    sa_w = params["sa_w"][0, :, 0, 0]
    att = jax.nn.sigmoid(jnp.einsum("nhwc,c->nhw", x, sa_w) + params["sa_b"][0])
    xg = x * att[..., None]
    w_hwio = jnp.transpose(params["conv_w"], (2, 3, 1, 0))      # (3,3,Cin,Cout)
    y = jax.lax.conv_general_dilated(
        xg, w_hwio, window_strides=(1, 1), padding=((1, 1), (1, 1)),
        dimension_numbers=("NHWC", "HWIO", "NHWC"))
    y = y + params["conv_b"]
    n, h, w, c = y.shape
    gs = c // groups
    yr = y.reshape(n, h * w, groups, gs)
    mean = jnp.mean(yr, axis=(1, 3), keepdims=True)
    var = jnp.mean((yr - mean) ** 2, axis=(1, 3), keepdims=True)
    yn = ((yr - mean) * jax.lax.rsqrt(var + eps)).reshape(n, h, w, c)
    yn = jnp.maximum(yn * params["gn_w"] + params["gn_b"], 0.0)
    return jnp.transpose(yn, (0, 3, 1, 2))


# ----------------------------------------------------------------------------
if __name__ == "__main__":
    # out_channels must be divisible by 20 (GroupNorm(20, out_channels))
    N, C_IN, C_OUT, H, W = 2, 40, 40, 16, 16
    key = jax.random.PRNGKey(0)
    kx, kw1, kb1, kg, kb, ksw, ksb = jax.random.split(key, 7)

    x = jax.random.normal(kx, (N, C_IN, H, W), jnp.float32)      # NCHW, like torch
    params = dict(
        conv_w=jax.random.normal(kw1, (C_OUT, C_IN, 3, 3), jnp.float32) / (C_IN * 9) ** 0.5,
        conv_b=0.01 * jax.random.normal(kb1, (C_OUT,), jnp.float32),
        gn_w=1.0 + 0.1 * jax.random.normal(kg, (C_OUT,), jnp.float32),
        gn_b=0.1 * jax.random.normal(kb, (C_OUT,), jnp.float32),
        sa_w=jax.random.normal(ksw, (1, C_IN, 1, 1), jnp.float32) / C_IN ** 0.5,
        sa_b=0.01 * jax.random.normal(ksb, (1,), jnp.float32),
    )

    fwd = jax.jit(attention_module_forward)
    out = jax.block_until_ready(fwd(x, params))
    assert out.shape == (N, C_OUT, H, W), out.shape
    assert bool(jnp.all(jnp.isfinite(out)))

    ref = jax.block_until_ready(jax.jit(attention_module_ref)(x, params))
    max_err = float(jnp.max(jnp.abs(out - ref)))
    # bf16 matmul operands with f32 accumulation -> small absolute error on O(1) outputs
    assert max_err < 1e-1, f"max abs err vs f32 reference: {max_err}"

    print("KERNEL_OK")
</pallas_src>

<mosaic_0001>
module attributes {stable_mosaic.version = 11 : i64} {
  func.func @_attention_module_kernel(%arg0: i32, %arg1: memref<1x18x18x40xf32, #tpu.memory_space<vmem>>, %arg2: memref<1x1x40xf32, #tpu.memory_space<vmem>>, %arg3: memref<1x1x1xf32, #tpu.memory_space<vmem>>, %arg4: memref<9x40x128xbf16, #tpu.memory_space<vmem>>, %arg5: memref<1x128xf32, #tpu.memory_space<vmem>>, %arg6: memref<1x128xf32, #tpu.memory_space<vmem>>, %arg7: memref<1x128xf32, #tpu.memory_space<vmem>>, %arg8: memref<128x20xf32, #tpu.memory_space<vmem>>, %arg9: memref<20x128xf32, #tpu.memory_space<vmem>>, %arg10: memref<1x256x128xf32, #tpu.memory_space<vmem>>, %arg11: memref<18x18x40xf32, #tpu.memory_space<vmem>>) attributes {dimension_semantics = [#tpu.dimension_semantics<parallel>], iteration_bounds = array<i64: 2>, scalar_prefetch = 0 : i64, scratch_operands = 1 : i64, tpu.core_type = #tpu.core_type<tc>, window_params = [{transform_indices = @transform_0, window_bounds = array<i64: 1, 18, 18, 40>}, {pipeline_mode = #tpu.pipeline_mode<synchronous>, transform_indices = @transform_1, window_bounds = array<i64: 1, 1, 40>}, {pipeline_mode = #tpu.pipeline_mode<synchronous>, transform_indices = @transform_2, window_bounds = array<i64: 1, 1, 1>}, {pipeline_mode = #tpu.pipeline_mode<synchronous>, transform_indices = @transform_3, window_bounds = array<i64: 9, 40, 128>}, {pipeline_mode = #tpu.pipeline_mode<synchronous>, transform_indices = @transform_4, window_bounds = array<i64: 1, 128>}, {pipeline_mode = #tpu.pipeline_mode<synchronous>, transform_indices = @transform_5, window_bounds = array<i64: 1, 128>}, {pipeline_mode = #tpu.pipeline_mode<synchronous>, transform_indices = @transform_6, window_bounds = array<i64: 1, 128>}, {pipeline_mode = #tpu.pipeline_mode<synchronous>, transform_indices = @transform_7, window_bounds = array<i64: 128, 20>}, {pipeline_mode = #tpu.pipeline_mode<synchronous>, transform_indices = @transform_8, window_bounds = array<i64: 20, 128>}, {transform_indices = @transform_9, window_bounds = array<i64: 1, 256, 128>}]} {
    %c0 = arith.constant 0 : index
    %c0_0 = arith.constant 0 : index
    %c0_1 = arith.constant 0 : index
    %c0_2 = arith.constant 0 : index
    %0 = vector.load %arg1[%c0, %c0_0, %c0_1, %c0_2] : memref<1x18x18x40xf32, #tpu.memory_space<vmem>>, vector<1x18x18x40xf32>
    %1 = vector.shape_cast %0 : vector<1x18x18x40xf32> to vector<18x18x40xf32>
    %c0_3 = arith.constant 0 : index
    %c0_4 = arith.constant 0 : index
    %c0_5 = arith.constant 0 : index
    %2 = vector.load %arg2[%c0_3, %c0_4, %c0_5] : memref<1x1x40xf32, #tpu.memory_space<vmem>>, vector<1x1x40xf32>
    %3 = vector.broadcast %2 : vector<1x1x40xf32> to vector<18x18x40xf32>
    %4 = arith.mulf %1, %3 : vector<18x18x40xf32>
    %cst = arith.constant dense<0.000000e+00> : vector<18x18xf32>
    %5 = vector.multi_reduction <add>, %4, %cst [2] : vector<18x18x40xf32> to vector<18x18xf32>
    %6 = vector.shape_cast %5 : vector<18x18xf32> to vector<18x18x1xf32>
    %c0_6 = arith.constant 0 : index
    %c0_7 = arith.constant 0 : index
    %c0_8 = arith.constant 0 : index
    %7 = vector.load %arg3[%c0_6, %c0_7, %c0_8] : memref<1x1x1xf32, #tpu.memory_space<vmem>>, vector<1x1x1xf32>
    %8 = vector.broadcast %7 : vector<1x1x1xf32> to vector<18x18x1xf32>
    %9 = arith.addf %6, %8 : vector<18x18x1xf32>
    %10 = arith.negf %9 : vector<18x18x1xf32>
    %11 = math.exp %10 : vector<18x18x1xf32>
    %cst_9 = arith.constant 1.000000e+00 : f32
    %12 = vector.broadcast %cst_9 : f32 to vector<18x18x1xf32>
    %13 = arith.addf %12, %11 : vector<18x18x1xf32>
    %14 = arith.divf %12, %13 : vector<18x18x1xf32>
    %15 = vector.broadcast %14 : vector<18x18x1xf32> to vector<18x18x40xf32>
    %16 = arith.mulf %1, %15 : vector<18x18x40xf32>
    %c0_10 = arith.constant 0 : index
    %c0_11 = arith.constant 0 : index
    %c0_12 = arith.constant 0 : index
    %17 = vector.load %arg11[%c0_10, %c0_11, %c0_12] : memref<18x18x40xf32, #tpu.memory_space<vmem>>, vector<18x18x40xf32>
    tpu.vector_store %arg11[%c0_10, %c0_11, %c0_12], %16 {strides = array<i32>} : memref<18x18x40xf32, #tpu.memory_space<vmem>>, vector<18x18x40xf32>,
    %cst_13 = arith.constant 0.000000e+00 : f32
    %18 = vector.broadcast %cst_13 : f32 to vector<256x128xf32>
    %c0_14 = arith.constant 0 : index
    %c0_15 = arith.constant 0 : index
    %c0_16 = arith.constant 0 : index
    %19 = vector.load %arg11[%c0_14, %c0_15, %c0_16] : memref<18x18x40xf32, #tpu.memory_space<vmem>>, vector<16x16x40xf32>
    %20 = vector.shape_cast %19 : vector<16x16x40xf32> to vector<256x40xf32>
    %21 = arith.truncf %20 : vector<256x40xf32> to vector<256x40xbf16>
    %c0_17 = arith.constant 0 : index
    %c0_18 = arith.constant 0 : index
    %c0_19 = arith.constant 0 : index
    %22 = vector.load %arg4[%c0_17, %c0_18, %c0_19] : memref<9x40x128xbf16, #tpu.memory_space<vmem>>, vector<1x40x128xbf16>
    %23 = vector.shape_cast %22 : vector<1x40x128xbf16> to vector<40x128xbf16>
    %cst_20 = arith.constant dense<0.000000e+00> : vector<256x128xf32>
    %24 = tpu.matmul %21, %23, %cst_20 {dimension_numbers = #tpu.dot_dimension_numbers<[1], [0], [0], [1], [0, 0, 1, 1], [], []>} : vector<256x40xbf16>, vector<40x128xbf16>, vector<256x128xf32> -> vector<256x128xf32>
    %25 = arith.addf %18, %24 : vector<256x128xf32>
    %c0_21 = arith.constant 0 : index
    %c1 = arith.constant 1 : index
    %c0_22 = arith.constant 0 : index
    %26 = vector.load %arg11[%c0_21, %c1, %c0_22] : memref<18x18x40xf32, #tpu.memory_space<vmem>>, vector<16x16x40xf32>
    %27 = vector.shape_cast %26 : vector<16x16x40xf32> to vector<256x40xf32>
    %28 = arith.truncf %27 : vector<256x40xf32> to vector<256x40xbf16>
    %c1_23 = arith.constant 1 : index
    %c0_24 = arith.constant 0 : index
    %c0_25 = arith.constant 0 : index
    %29 = vector.load %arg4[%c1_23, %c0_24, %c0_25] : memref<9x40x128xbf16, #tpu.memory_space<vmem>>, vector<1x40x128xbf16>
    %30 = vector.shape_cast %29 : vector<1x40x128xbf16> to vector<40x128xbf16>
    %cst_26 = arith.constant dense<0.000000e+00> : vector<256x128xf32>
    %31 = tpu.matmul %28, %30, %cst_26 {dimension_numbers = #tpu.dot_dimension_numbers<[1], [0], [0], [1], [0, 0, 1, 1], [], []>} : vector<256x40xbf16>, vector<40x128xbf16>, vector<256x128xf32> -> vector<256x128xf32>
    %32 = arith.addf %25, %31 : vector<256x128xf32>
    %c0_27 = arith.constant 0 : index
    %c2 = arith.constant 2 : index
    %c0_28 = arith.constant 0 : index
    %33 = vector.load %arg11[%c0_27, %c2, %c0_28] : memref<18x18x40xf32, #tpu.memory_space<vmem>>, vector<16x16x40xf32>
    %34 = vector.shape_cast %33 : vector<16x16x40xf32> to vector<256x40xf32>
    %35 = arith.truncf %34 : vector<256x40xf32> to vector<256x40xbf16>
    %c2_29 = arith.constant 2 : index
    %c0_30 = arith.constant 0 : index
    %c0_31 = arith.constant 0 : index
    %36 = vector.load %arg4[%c2_29, %c0_30, %c0_31] : memref<9x40x128xbf16, #tpu.memory_space<vmem>>, vector<1x40x128xbf16>
    %37 = vector.shape_cast %36 : vector<1x40x128xbf16> to vector<40x128xbf16>
    %cst_32 = arith.constant dense<0.000000e+00> : vector<256x128xf32>
    %38 = tpu.matmul %35, %37, %cst_32 {dimension_numbers = #tpu.dot_dimension_numbers<[1], [0], [0], [1], [0, 0, 1, 1], [], []>} : vector<256x40xbf16>, vector<40x128xbf16>, vector<256x128xf32> -> vector<256x128xf32>
    %39 = arith.addf %32, %38 : vector<256x128xf32>
    %c1_33 = arith.constant 1 : index
    %c0_34 = arith.constant 0 : index
    %c0_35 = arith.constant 0 : index
    %40 = vector.load %arg11[%c1_33, %c0_34, %c0_35] : memref<18x18x40xf32, #tpu.memory_space<vmem>>, vector<16x16x40xf32>
    %41 = vector.shape_cast %40 : vector<16x16x40xf32> to vector<256x40xf32>
    %42 = arith.truncf %41 : vector<256x40xf32> to vector<256x40xbf16>
    %c3 = arith.constant 3 : index
    %c0_36 = arith.constant 0 : index
    %c0_37 = arith.constant 0 : index
    %43 = vector.load %arg4[%c3, %c0_36, %c0_37] : memref<9x40x128xbf16, #tpu.memory_space<vmem>>, vector<1x40x128xbf16>
    %44 = vector.shape_cast %43 : vector<1x40x128xbf16> to vector<40x128xbf16>
    %cst_38 = arith.constant dense<0.000000e+00> : vector<256x128xf32>
    %45 = tpu.matmul %42, %44, %cst_38 {dimension_numbers = #tpu.dot_dimension_numbers<[1], [0], [0], [1], [0, 0, 1, 1], [], []>} : vector<256x40xbf16>, vector<40x128xbf16>, vector<256x128xf32> -> vector<256x128xf32>
    %46 = arith.addf %39, %45 : vector<256x128xf32>
    %c1_39 = arith.constant 1 : index
    %c1_40 = arith.constant 1 : index
    %c0_41 = arith.constant 0 : index
    %47 = vector.load %arg11[%c1_39, %c1_40, %c0_41] : memref<18x18x40xf32, #tpu.memory_space<vmem>>, vector<16x16x40xf32>
    %48 = vector.shape_cast %47 : vector<16x16x40xf32> to vector<256x40xf32>
    %49 = arith.truncf %48 : vector<256x40xf32> to vector<256x40xbf16>
    %c4 = arith.constant 4 : index
    %c0_42 = arith.constant 0 : index
    %c0_43 = arith.constant 0 : index
    %50 = vector.load %arg4[%c4, %c0_42, %c0_43] : memref<9x40x128xbf16, #tpu.memory_space<vmem>>, vector<1x40x128xbf16>
    %51 = vector.shape_cast %50 : vector<1x40x128xbf16> to vector<40x128xbf16>
    %cst_44 = arith.constant dense<0.000000e+00> : vector<256x128xf32>
    %52 = tpu.matmul %49, %51, %cst_44 {dimension_numbers = #tpu.dot_dimension_numbers<[1], [0], [0], [1], [0, 0, 1, 1], [], []>} : vector<256x40xbf16>, vector<40x128xbf16>, vector<256x128xf32> -> vector<256x128xf32>
    %53 = arith.addf %46, %52 : vector<256x128xf32>
    %c1_45 = arith.constant 1 : index
    %c2_46 = arith.constant 2 : index
    %c0_47 = arith.constant 0 : index
    %54 = vector.load %arg11[%c1_45, %c2_46, %c0_47] : memref<18x18x40xf32, #tpu.memory_space<vmem>>, vector<16x16x40xf32>
    %55 = vector.shape_cast %54 : vector<16x16x40xf32> to vector<256x40xf32>
    %56 = arith.truncf %55 : vector<256x40xf32> to vector<256x40xbf16>
    %c5 = arith.constant 5 : index
    %c0_48 = arith.constant 0 : index
    %c0_49 = arith.constant 0 : index
    %57 = vector.load %arg4[%c5, %c0_48, %c0_49] : memref<9x40x128xbf16, #tpu.memory_space<vmem>>, vector<1x40x128xbf16>
    %58 = vector.shape_cast %57 : vector<1x40x128xbf16> to vector<40x128xbf16>
    %cst_50 = arith.constant dense<0.000000e+00> : vector<256x128xf32>
    %59 = tpu.matmul %56, %58, %cst_50 {dimension_numbers = #tpu.dot_dimension_numbers<[1], [0], [0], [1], [0, 0, 1, 1], [], []>} : vector<256x40xbf16>, vector<40x128xbf16>, vector<256x128xf32> -> vector<256x128xf32>
    %60 = arith.addf %53, %59 : vector<256x128xf32>
    %c2_51 = arith.constant 2 : index
    %c0_52 = arith.constant 0 : index
    %c0_53 = arith.constant 0 : index
    %61 = vector.load %arg11[%c2_51, %c0_52, %c0_53] : memref<18x18x40xf32, #tpu.memory_space<vmem>>, vector<16x16x40xf32>
    %62 = vector.shape_cast %61 : vector<16x16x40xf32> to vector<256x40xf32>
    %63 = arith.truncf %62 : vector<256x40xf32> to vector<256x40xbf16>
    %c6 = arith.constant 6 : index
    %c0_54 = arith.constant 0 : index
    %c0_55 = arith.constant 0 : index
    %64 = vector.load %arg4[%c6, %c0_54, %c0_55] : memref<9x40x128xbf16, #tpu.memory_space<vmem>>, vector<1x40x128xbf16>
    %65 = vector.shape_cast %64 : vector<1x40x128xbf16> to vector<40x128xbf16>
    %cst_56 = arith.constant dense<0.000000e+00> : vector<256x128xf32>
    %66 = tpu.matmul %63, %65, %cst_56 {dimension_numbers = #tpu.dot_dimension_numbers<[1], [0], [0], [1], [0, 0, 1, 1], [], []>} : vector<256x40xbf16>, vector<40x128xbf16>, vector<256x128xf32> -> vector<256x128xf32>
    %67 = arith.addf %60, %66 : vector<256x128xf32>
    %c2_57 = arith.constant 2 : index
    %c1_58 = arith.constant 1 : index
    %c0_59 = arith.constant 0 : index
    %68 = vector.load %arg11[%c2_57, %c1_58, %c0_59] : memref<18x18x40xf32, #tpu.memory_space<vmem>>, vector<16x16x40xf32>
    %69 = vector.shape_cast %68 : vector<16x16x40xf32> to vector<256x40xf32>
    %70 = arith.truncf %69 : vector<256x40xf32> to vector<256x40xbf16>
    %c7 = arith.constant 7 : index
    %c0_60 = arith.constant 0 : index
    %c0_61 = arith.constant 0 : index
    %71 = vector.load %arg4[%c7, %c0_60, %c0_61] : memref<9x40x128xbf16, #tpu.memory_space<vmem>>, vector<1x40x128xbf16>
    %72 = vector.shape_cast %71 : vector<1x40x128xbf16> to vector<40x128xbf16>
    %cst_62 = arith.constant dense<0.000000e+00> : vector<256x128xf32>
    %73 = tpu.matmul %70, %72, %cst_62 {dimension_numbers = #tpu.dot_dimension_numbers<[1], [0], [0], [1], [0, 0, 1, 1], [], []>} : vector<256x40xbf16>, vector<40x128xbf16>, vector<256x128xf32> -> vector<256x128xf32>
    %74 = arith.addf %67, %73 : vector<256x128xf32>
    %c2_63 = arith.constant 2 : index
    %c2_64 = arith.constant 2 : index
    %c0_65 = arith.constant 0 : index
    %75 = vector.load %arg11[%c2_63, %c2_64, %c0_65] : memref<18x18x40xf32, #tpu.memory_space<vmem>>, vector<16x16x40xf32>
    %76 = vector.shape_cast %75 : vector<16x16x40xf32> to vector<256x40xf32>
    %77 = arith.truncf %76 : vector<256x40xf32> to vector<256x40xbf16>
    %c8 = arith.constant 8 : index
    %c0_66 = arith.constant 0 : index
    %c0_67 = arith.constant 0 : index
    %78 = vector.load %arg4[%c8, %c0_66, %c0_67] : memref<9x40x128xbf16, #tpu.memory_space<vmem>>, vector<1x40x128xbf16>
    %79 = vector.shape_cast %78 : vector<1x40x128xbf16> to vector<40x128xbf16>
    %cst_68 = arith.constant dense<0.000000e+00> : vector<256x128xf32>
    %80 = tpu.matmul %77, %79, %cst_68 {dimension_numbers = #tpu.dot_dimension_numbers<[1], [0], [0], [1], [0, 0, 1, 1], [], []>} : vector<256x40xbf16>, vector<40x128xbf16>, vector<256x128xf32> -> vector<256x128xf32>
    %81 = arith.addf %74, %80 : vector<256x128xf32>
    %c0_69 = arith.constant 0 : index
    %c0_70 = arith.constant 0 : index
    %82 = vector.load %arg5[%c0_69, %c0_70] : memref<1x128xf32, #tpu.memory_space<vmem>>, vector<1x128xf32>
    %83 = vector.broadcast %82 : vector<1x128xf32> to vector<256x128xf32>
    %84 = arith.addf %81, %83 : vector<256x128xf32>
    %cst_71 = arith.constant dense<0.000000e+00> : vector<128xf32>
    %85 = vector.multi_reduction <add>, %84, %cst_71 [0] : vector<256x128xf32> to vector<128xf32>
    %86 = vector.shape_cast %85 : vector<128xf32> to vector<1x128xf32>
    %c0_72 = arith.constant 0 : index
    %c0_73 = arith.constant 0 : index
    %87 = vector.load %arg8[%c0_72, %c0_73] : memref<128x20xf32, #tpu.memory_space<vmem>>, vector<128x20xf32>
    %cst_74 = arith.constant dense<0.000000e+00> : vector<1x20xf32>
    %88 = tpu.matmul %86, %87, %cst_74 {dimension_numbers = #tpu.dot_dimension_numbers<[1], [0], [0], [1], [0, 0, 1, 1], [], []>} : vector<1x128xf32>, vector<128x20xf32>, vector<1x20xf32> -> vector<1x20xf32>
    %cst_75 = arith.constant 0.001953125 : f32
    %89 = vector.broadcast %cst_75 : f32 to vector<1x20xf32>
    %90 = arith.mulf %88, %89 : vector<1x20xf32>
    %c0_76 = arith.constant 0 : index
    %c0_77 = arith.constant 0 : index
    %91 = vector.load %arg9[%c0_76, %c0_77] : memref<20x128xf32, #tpu.memory_space<vmem>>, vector<20x128xf32>
    %cst_78 = arith.constant dense<0.000000e+00> : vector<1x128xf32>
    %92 = tpu.matmul %90, %91, %cst_78 {dimension_numbers = #tpu.dot_dimension_numbers<[1], [0], [0], [1], [0, 0, 1, 1], [], []>} : vector<1x20xf32>, vector<20x128xf32>, vector<1x128xf32> -> vector<1x128xf32>
    %93 = vector.broadcast %92 : vector<1x128xf32> to vector<256x128xf32>
    %94 = arith.subf %84, %93 : vector<256x128xf32>
    %95 = arith.mulf %94, %94 : vector<256x128xf32>
    %cst_79 = arith.constant dense<0.000000e+00> : vector<128xf32>
    %96 = vector.multi_reduction <add>, %95, %cst_79 [0] : vector<256x128xf32> to vector<128xf32>
    %97 = vector.shape_cast %96 : vector<128xf32> to vector<1x128xf32>
    %c0_80 = arith.constant 0 : index
    %c0_81 = arith.constant 0 : index
    %98 = vector.load %arg8[%c0_80, %c0_81] : memref<128x20xf32, #tpu.memory_space<vmem>>, vector<128x20xf32>
    %cst_82 = arith.constant dense<0.000000e+00> : vector<1x20xf32>
    %99 = tpu.matmul %97, %98, %cst_82 {dimension_numbers = #tpu.dot_dimension_numbers<[1], [0], [0], [1], [0, 0, 1, 1], [], []>} : vector<1x128xf32>, vector<128x20xf32>, vector<1x20xf32> -> vector<1x20xf32>
    %cst_83 = arith.constant 0.001953125 : f32
    %100 = vector.broadcast %cst_83 : f32 to vector<1x20xf32>
    %101 = arith.mulf %99, %100 : vector<1x20xf32>
    %cst_84 = arith.constant 9.99999974E-6 : f32
    %102 = vector.broadcast %cst_84 : f32 to vector<1x20xf32>
    %103 = arith.addf %101, %102 : vector<1x20xf32>
    %104 = math.rsqrt %103 : vector<1x20xf32>
    %c0_85 = arith.constant 0 : index
    %c0_86 = arith.constant 0 : index
    %105 = vector.load %arg9[%c0_85, %c0_86] : memref<20x128xf32, #tpu.memory_space<vmem>>, vector<20x128xf32>
    %cst_87 = arith.constant dense<0.000000e+00> : vector<1x128xf32>
    %106 = tpu.matmul %104, %105, %cst_87 {dimension_numbers = #tpu.dot_dimension_numbers<[1], [0], [0], [1], [0, 0, 1, 1], [], []>} : vector<1x20xf32>, vector<20x128xf32>, vector<1x128xf32> -> vector<1x128xf32>
    %107 = vector.broadcast %106 : vector<1x128xf32> to vector<256x128xf32>
    %108 = arith.mulf %94, %107 : vector<256x128xf32>
    %c0_88 = arith.constant 0 : index
    %c0_89 = arith.constant 0 : index
    %109 = vector.load %arg6[%c0_88, %c0_89] : memref<1x128xf32, #tpu.memory_space<vmem>>, vector<1x128xf32>
    %110 = vector.broadcast %109 : vector<1x128xf32> to vector<256x128xf32>
    %111 = arith.mulf %108, %110 : vector<256x128xf32>
    %c0_90 = arith.constant 0 : index
    %c0_91 = arith.constant 0 : index
    %112 = vector.load %arg7[%c0_90, %c0_91] : memref<1x128xf32, #tpu.memory_space<vmem>>, vector<1x128xf32>
    %113 = vector.broadcast %112 : vector<1x128xf32> to vector<256x128xf32>
    %114 = arith.addf %111, %113 : vector<256x128xf32>
    %cst_92 = arith.constant 0.000000e+00 : f32
    %115 = vector.broadcast %cst_92 : f32 to vector<256x128xf32>
    %116 = arith.maximumf %114, %115 : vector<256x128xf32>
    %c0_93 = arith.constant 0 : index
    %c0_94 = arith.constant 0 : index
    %c0_95 = arith.constant 0 : index
    %117 = vector.load %arg10[%c0_93, %c0_94, %c0_95] : memref<1x256x128xf32, #tpu.memory_space<vmem>>, vector<1x256x128xf32>
    %118 = vector.shape_cast %117 : vector<1x256x128xf32> to vector<256x128xf32>
    %119 = vector.shape_cast %116 : vector<256x128xf32> to vector<1x256x128xf32>
    tpu.vector_store %arg10[%c0_93, %c0_94, %c0_95], %119 {strides = array<i32>} : memref<1x256x128xf32, #tpu.memory_space<vmem>>, vector<1x256x128xf32>,
    return
  }
  func.func @transform_0(%arg0: i32) -> (i32, i32, i32, i32) {
    %c0_i32 = arith.constant 0 : i32
    %c0_i32_0 = arith.constant 0 : i32
    %c0_i32_1 = arith.constant 0 : i32
    %c0_i32_2 = arith.constant 0 : i32
    return %arg0, %c0_i32, %c0_i32_0, %c0_i32_1 : i32, i32, i32, i32
  }
  func.func @transform_1(%arg0: i32) -> (i32, i32, i32) {
    %c0_i32 = arith.constant 0 : i32
    %c0_i32_0 = arith.constant 0 : i32
    %c0_i32_1 = arith.constant 0 : i32
    %c0_i32_2 = arith.constant 0 : i32
    return %c0_i32, %c0_i32_0, %c0_i32_1 : i32, i32, i32
  }
  func.func @transform_2(%arg0: i32) -> (i32, i32, i32) {
    %c0_i32 = arith.constant 0 : i32
    %c0_i32_0 = arith.constant 0 : i32
    %c0_i32_1 = arith.constant 0 : i32
    %c0_i32_2 = arith.constant 0 : i32
    return %c0_i32, %c0_i32_0, %c0_i32_1 : i32, i32, i32
  }
  func.func @transform_3(%arg0: i32) -> (i32, i32, i32) {
    %c0_i32 = arith.constant 0 : i32
    %c0_i32_0 = arith.constant 0 : i32
    %c0_i32_1 = arith.constant 0 : i32
    %c0_i32_2 = arith.constant 0 : i32
    return %c0_i32, %c0_i32_0, %c0_i32_1 : i32, i32, i32
  }
  func.func @transform_4(%arg0: i32) -> (i32, i32) {
    %c0_i32 = arith.constant 0 : i32
    %c0_i32_0 = arith.constant 0 : i32
    %c0_i32_1 = arith.constant 0 : i32
    return %c0_i32, %c0_i32_0 : i32, i32
  }
  func.func @transform_5(%arg0: i32) -> (i32, i32) {
    %c0_i32 = arith.constant 0 : i32
    %c0_i32_0 = arith.constant 0 : i32
    %c0_i32_1 = arith.constant 0 : i32
    return %c0_i32, %c0_i32_0 : i32, i32
  }
  func.func @transform_6(%arg0: i32) -> (i32, i32) {
    %c0_i32 = arith.constant 0 : i32
    %c0_i32_0 = arith.constant 0 : i32
    %c0_i32_1 = arith.constant 0 : i32
    return %c0_i32, %c0_i32_0 : i32, i32
  }
  func.func @transform_7(%arg0: i32) -> (i32, i32) {
    %c0_i32 = arith.constant 0 : i32
    %c0_i32_0 = arith.constant 0 : i32
    %c0_i32_1 = arith.constant 0 : i32
    return %c0_i32, %c0_i32_0 : i32, i32
  }
  func.func @transform_8(%arg0: i32) -> (i32, i32) {
    %c0_i32 = arith.constant 0 : i32
    %c0_i32_0 = arith.constant 0 : i32
    %c0_i32_1 = arith.constant 0 : i32
    return %c0_i32, %c0_i32_0 : i32, i32
  }
  func.func @transform_9(%arg0: i32) -> (i32, i32, i32) {
    %c0_i32 = arith.constant 0 : i32
    %c0_i32_0 = arith.constant 0 : i32
    %c0_i32_1 = arith.constant 0 : i32
    return %arg0, %c0_i32, %c0_i32_0 : i32, i32, i32
  }
}

</mosaic_0001>

<bundles_post_ra>
// kernel: attention_module_forward.1
= control target key start
LH: loop header
LB: loop body
LE: loop exit
PB: predicated region body
PF: predicated region fallthrough
CT: control target
= control target key end

     0   :  { %s6485_s11 = smov 0   ;;  %s7979_s0 = inlined_call_operand.vmem [shape: f32[2,18,18,40], index: 0, kind: input, shape index: {}]   ;;  %s7980_s1 = inlined_call_operand.vmem [shape: f32[1,1,40], index: 1, kind: input, shape index: {}]   ;;  %s7981_s2 = inlined_call_operand.<no memory space> [shape: f32[1,1,1], index: 2, kind: input, shape index: {}]   ;;  %s7982_s3 = inlined_call_operand.vmem [shape: bf16[9,40,128], index: 3, kind: input, shape index: {}]   ;;  %s7983_s4 = inlined_call_operand.vmem [shape: f32[1,128], index: 4, kind: input, shape index: {}]   ;;  %s7984_s5 = inlined_call_operand.vmem [shape: f32[1,128], index: 5, kind: input, shape index: {}]   ;;  %s7985_s6 = inlined_call_operand.vmem [shape: f32[1,128], index: 6, kind: input, shape index: {}]   ;;  %s7986_s7 = inlined_call_operand.vmem [shape: f32[128,20], index: 7, kind: input, shape index: {}]   ;;  %s7987_s8 = inlined_call_operand.vmem [shape: f32[20,128], index: 8, kind: input, shape index: {}]   ;;  %s7988_s9 = inlined_call_operand.vmem [shape: f32[2,256,128], index: 9, kind: output, shape index: {}]  }
   0x1   :  { %v14_v0 = vstv %s7981_s2 }
   0x2   :  { %15 = vst [vmem:[#allocation3] sm:$0x1] %v14_v0 }
   0x3 LB: > { %s4860_s12 = sadd.s32 4294967295, %s6426_s11   ;;  %p4864_p0 = scmp.ge.s32.totalorder %s6426_s11, 1  ;;  %s6426_s11 = sphi %s6485_s11, %s21_s11  }
   0x4   : > { %p289_p1 = scmp.lt.s32.totalorder %s6426_s11, 3 }
   0x6   : > { %p290_p2 = pnand %p4864_p0, %p289_p1 }
   0x7   : > { %p325_p3 = scmp.lt.s32.totalorder (!%p290_p2), %s4860_s12, 1  ;;  %v6498_v1 = vld [vmem:[%s7980_s1] ss:$0 sm:$0xff] (!%p290_p2)  ;;  %vm451_vm0 = vcmask (!%p290_p2), 326656   ;;  %vm458_vm1 = vcmask (!%p290_p2), 320512   ;;  %vm1548_vm2 = vcmask (!%p290_p2), 1043456  }
   0x8   : > { %293 = sbr.rel (%p290_p2) target bundleno = 2005 (0x7d5), region = 56  ;;  %vm6430_vm3 = vmmov (!%p290_p2), 0   ;;  %vm4299_vm4 = vcmask (!%p290_p2), 162816  }
   0xf   : > { %s7990_s12 = smov (!%p325_p3, %s4860_s12), 1 }
  0x10   : > { %s6107_s14 = smul.u32 432, %s7990_s12  ;;  %s5144_s19 = sshll.u32 %s7990_s12, 8 }
  0x11   : > { %s7922_s21 = scalar_lea.vmem %s7988_s9, %s5144_s19 }
  0x12   : > { %s6504_s17 = scalar_lea.vmem %s7979_s0, %s6107_s14 }
  0x13   : > { %v339_v2 = vld [vmem:[%s6504_s17 + $0x18] sm:$0xff]  ;;  %v341_v3 = vld [vmem:[%s6504_s17 + $0x28] sm:$0x3]  ;;  %v340_v4 = vld [vmem:[%s6504_s17 + $0x20] sm:$0xff] }
  0x14   : > { %v400_v5 = vmul.f32 %v6498_v1, %v339_v2  ;;  %v402_v6 = vmul.f32 %v6498_v1, %v341_v3  ;;  %v401_v7 = vmul.f32 %v6498_v1, %v340_v4  ;;  %v342_v8 = vld [vmem:[%s6504_s17 + $0x30] sm:$0xff]  ;;  %v343_v10 = vld [vmem:[%s6504_s17 + $0x38] sm:$0xff]  ;;  %v344_v11 = vld [vmem:[%s6504_s17 + $0x40] sm:$0x3] }
  0x15   : > { %v403_v9 = vmul.f32 %v6498_v1, %v342_v8  ;;  %v404_v16 = vmul.f32 %v6498_v1, %v343_v10  ;;  %v405_v17 = vmul.f32 %v6498_v1, %v344_v11  ;;  %v345_v18 = vld [vmem:[%s6504_s17 + $0x48] sm:$0xff]  ;;  %v346_v19 = vld [vmem:[%s6504_s17 + $0x50] sm:$0xff]  ;;  %v347_v24 = vld [vmem:[%s6504_s17 + $0x58] sm:$0x3] }
  0x16   : > { %v462_v12 = vsel %vm451_vm0, %v400_v5, 0.0  ;;  %v468_v13 = vsel %vm458_vm1, %v402_v6, 0.0  ;;  %v465_v14 = vsel %vm451_vm0, %v401_v7, 0.0  ;;  %v406_v21 = vmul.f32 %v6498_v1, %v345_v18  ;;  %v348_v25 = vld [vmem:[%s6504_s17 + $0x60] sm:$0xff]  ;;  %v349_v30 = vld [vmem:[%s6504_s17 + $0x68] sm:$0xff]  ;;  %v351_v36 = vld [vmem:[%s6504_s17 + $0x78] sm:$0xff] }
  0x17   : > { %463 = vadd.xlane.f32.xlu0 %v462_v12  ;;  %469 = vadd.xlane.f32.xlu1 %v468_v13  ;;  %v471_v15 = vsel %vm451_vm0, %v403_v9, 0.0  ;;  %v474_v20 = vsel %vm451_vm0, %v404_v16, 0.0  ;;  %v477_v22 = vsel %vm458_vm1, %v405_v17, 0.0  ;;  %v407_v23 = vmul.f32 %v6498_v1, %v346_v19  ;;  %v350_v31 = vld [vmem:[%s6504_s17 + $0x70] sm:$0x3]  ;;  %v352_v37 = vld [vmem:[%s6504_s17 + $0x80] sm:$0xff] }
  0x18   : > { %v480_v26 = vsel %vm451_vm0, %v406_v21, 0.0  ;;  %v408_v27 = vmul.f32 %v6498_v1, %v347_v24  ;;  %v409_v29 = vmul.f32 %v6498_v1, %v348_v25  ;;  %v410_v33 = vmul.f32 %v6498_v1, %v349_v30  ;;  %v353_v38 = vld [vmem:[%s6504_s17 + $0x88] sm:$0x3]  ;;  %v354_v39 = vld [vmem:[%s6504_s17 + $0x90] sm:$0xff]  ;;  %v355_v46 = vld [vmem:[%s6504_s17 + $0x98] sm:$0xff] }
  0x19   : > { %v483_v28 = vsel %vm451_vm0, %v407_v23, 0.0  ;;  %v411_v35 = vmul.f32 %v6498_v1, %v350_v31  ;;  %v412_v41 = vmul.f32 %v6498_v1, %v351_v36  ;;  %v413_v43 = vmul.f32 %v6498_v1, %v352_v37  ;;  %v356_v49 = vld [vmem:[%s6504_s17 + $0xa0] sm:$0x3]  ;;  %v357_v52 = vld [vmem:[%s6504_s17 + $0xa8] sm:$0xff]  ;;  %v358_v53 = vld [vmem:[%s6504_s17 + $0xb0] sm:$0xff] }
  0x1a   : > { %v486_v32 = vsel %vm458_vm1, %v408_v27, 0.0  ;;  %v489_v34 = vsel %vm451_vm0, %v409_v29, 0.0  ;;  %v492_v40 = vsel %vm451_vm0, %v410_v33, 0.0  ;;  %v414_v44 = vmul.f32 %v6498_v1, %v353_v38  ;;  %v359_v60 = vld [vmem:[%s6504_s17 + $0xb8] sm:$0x3]  ;;  %v360_v61 = vld [vmem:[%s6504_s17 + $0xc0] sm:$0xff] }
  0x1b   : > { %466 = vadd.xlane.f32.xlu0 %v465_v14  ;;  %472 = vadd.xlane.f32.xlu1 %v471_v15  ;;  %v495_v42 = vsel %vm458_vm1, %v411_v35, 0.0  ;;  %v415_v45 = vmul.f32 %v6498_v1, %v354_v39  ;;  %v498_v47 = vsel %vm451_vm0, %v412_v41, 0.0  ;;  %v501_v48 = vsel %vm451_vm0, %v413_v43, 0.0  ;;  %v361_v3 = vld [vmem:[%s6504_s17 + $0xc8] sm:$0xff]  ;;  %v362_v4 = vld [vmem:[%s6504_s17 + $0xd0] sm:$0x3] }
  0x1c   : > { %v504_v50 = vsel %vm458_vm1, %v414_v44, 0.0  ;;  %v416_v54 = vmul.f32 %v6498_v1, %v355_v46  ;;  %v417_v55 = vmul.f32 %v6498_v1, %v356_v49  ;;  %v418_v57 = vmul.f32 %v6498_v1, %v357_v52  ;;  %v363_v9 = vld [vmem:[%s6504_s17 + $0xd8] sm:$0xff]  ;;  %v364_v10 = vld [vmem:[%s6504_s17 + $0xe0] sm:$0xff]  ;;  %v365_v16 = vld [vmem:[%s6504_s17 + $0xe8] sm:$0x3] }
  0x1d   : > { %v507_v51 = vsel %vm451_vm0, %v415_v45, 0.0  ;;  %v419_v59 = vmul.f32 %v6498_v1, %v358_v53  ;;  %v420_v63 = vmul.f32 %v6498_v1, %v359_v60  ;;  %v421_v2 = vmul.f32 %v6498_v1, %v360_v61  ;;  %v366_v17 = vld [vmem:[%s6504_s17 + $0xf0] sm:$0xff]  ;;  %v368_v23 = vld [vmem:[%s6504_s17 + $0x100] sm:$0x3]  ;;  %v375_v46 = vld [vmem:[%s6504_s17 + $0x138] sm:$0xff] }
  0x1e   : > { %v510_v56 = vsel %vm451_vm0, %v416_v54, 0.0  ;;  %v513_v58 = vsel %vm458_vm1, %v417_v55, 0.0  ;;  %v516_v62 = vsel %vm451_vm0, %v418_v57, 0.0  ;;  %v422_v6 = vmul.f32 %v6498_v1, %v361_v3  ;;  %v370_v29 = vld [vmem:[%s6504_s17 + $0x110] sm:$0xff]  ;;  %v372_v35 = vld [vmem:[%s6504_s17 + $0x120] sm:$0xff] }
  0x1f   : > { %475 = vadd.xlane.f32.xlu0 %v474_v20  ;;  %478 = vadd.xlane.f32.xlu1 %v477_v22  ;;  %v519_v0 = vsel %vm451_vm0, %v419_v59, 0.0  ;;  %v522_v5 = vsel %vm458_vm1, %v420_v63, 0.0  ;;  %v525_v7 = vsel %vm451_vm0, %v421_v2, 0.0  ;;  %v423_v8 = vmul.f32 %v6498_v1, %v362_v4  ;;  %v367_v22 = vld [vmem:[%s6504_s17 + $0xf8] sm:$0xff]  ;;  %v374_v41 = vld [vmem:[%s6504_s17 + $0x130] sm:$0x3] }
  0x20   : > { %v528_v11 = vsel %vm451_vm0, %v422_v6, 0.0  ;;  %v424_v12 = vmul.f32 %v6498_v1, %v363_v9  ;;  %v425_v14 = vmul.f32 %v6498_v1, %v364_v10  ;;  %v6428_v15 = vmov 0   ;;  %v377_v52 = vld [vmem:[%s6504_s17 + $0x148] sm:$0x3]  ;;  %v378_v53 = vld [vmem:[%s6504_s17 + $0x150] sm:$0xff] }
  0x21   : > { %v531_v13 = vsel %vm458_vm1, %v423_v8, 0.0  ;;  %6120 = vset.pattern.permute.xlu1 %v6428_v15  ;;  %6121 = vset.pattern.permute.xlu0 %v6428_v15  ;;  %v426_v19 = vmul.f32 %v6498_v1, %v365_v16  ;;  %v427_v21 = vmul.f32 %v6498_v1, %v366_v17  ;;  %v428_v25 = vmul.f32 %v6498_v1, %v367_v22  ;;  %v380_v59 = vld [vmem:[%s6504_s17 + $0x160] sm:$0x3]  ;;  %v382_v2 = vld [vmem:[%s6504_s17 + $0x170] sm:$0xff] }
  0x22   : > { %v534_v18 = vsel %vm451_vm0, %v424_v12, 0.0  ;;  %v537_v20 = vsel %vm451_vm0, %v425_v14, 0.0  ;;  %v429_v27 = vmul.f32 %v6498_v1, %v368_v23  ;;  %v431_v33 = vmul.f32 %v6498_v1, %v370_v29  ;;  %v384_v8 = vld [vmem:[%s6504_s17 + $0x180] sm:$0xff]  ;;  %v386_v14 = vld [vmem:[%s6504_s17 + $0x190] sm:$0x3] }
  0x23   : > { %481 = vadd.xlane.f32.xlu0 %v480_v26  ;;  %484 = vadd.xlane.f32.xlu1 %v483_v28  ;;  %v540_v24 = vsel %vm458_vm1, %v426_v19, 0.0  ;;  %v543_v26 = vsel %vm451_vm0, %v427_v21, 0.0  ;;  %v369_v28 = vld [vmem:[%s6504_s17 + $0x108] sm:$0xff]  ;;  %v546_v30 = vsel %vm451_vm0, %v428_v25, 0.0  ;;  %v433_v39 = vmul.f32 %v6498_v1, %v372_v35  ;;  %v336_v19 = vld [vmem:[%s6504_s17] sm:$0xff] }
  0x24   : > { %v430_v31 = vmul.f32 %v6498_v1, %v369_v28  ;;  %v555_v38 = vsel %vm451_vm0, %v431_v33, 0.0  ;;  %v435_v45 = vmul.f32 %v6498_v1, %v374_v41  ;;  %v436_v49 = vmul.f32 %v6498_v1, %v375_v46  ;;  %v338_v25 = vld [vmem:[%s6504_s17 + $0x10] sm:$0x3] }
  0x25   : > { %v561_v44 = vsel %vm451_vm0, %v433_v39, 0.0  ;;  %v438_v55 = vmul.f32 %v6498_v1, %v377_v52  ;;  %v439_v57 = vmul.f32 %v6498_v1, %v378_v53  ;;  %v441_v63 = vmul.f32 %v6498_v1, %v380_v59 }
  0x26   : > { %v552_v36 = vsel %vm451_vm0, %v430_v31, 0.0  ;;  %v570_v54 = vsel %vm451_vm0, %v436_v49, 0.0  ;;  %v443_v6 = vmul.f32 %v6498_v1, %v382_v2  ;;  %v445_v12 = vmul.f32 %v6498_v1, %v384_v8 }
  0x27   : > { %487 = vadd.xlane.f32.xlu0 %v486_v32  ;;  %490 = vadd.xlane.f32.xlu1 %v489_v34  ;;  %v549_v32 = vsel %vm458_vm1, %v429_v27, 0.0  ;;  %v371_v34 = vld [vmem:[%s6504_s17 + $0x118] sm:$0x3]  ;;  %v576_v60 = vsel %vm458_vm1, %v438_v55, 0.0  ;;  %v397_v22 = vmul.f32 %v6498_v1, %v336_v19  ;;  %v399_v27 = vmul.f32 %v6498_v1, %v338_v25 }
  0x28   : > { %v432_v37 = vmul.f32 %v6498_v1, %v371_v34  ;;  %v597_v17 = vsel %vm451_vm0, %v445_v12, 0.0 }
  0x29   : > { %v459_v29 = vsel %vm458_vm1, %v399_v27, 0.0 }
  0x2b   : > { %493 = vadd.xlane.f32.xlu0 %v492_v40  ;;  %496 = vadd.xlane.f32.xlu1 %v495_v42  ;;  %v373_v40 = vld [vmem:[%s6504_s17 + $0x128] sm:$0xff]  ;;  %v558_v42 = vsel %vm458_vm1, %v432_v37, 0.0 }
  0x2c   : > { %v434_v43 = vmul.f32 %v6498_v1, %v373_v40 }
  0x2f   : > { %499 = vadd.xlane.f32.xlu0 %v498_v47  ;;  %502 = vadd.xlane.f32.xlu1 %v501_v48  ;;  %v376_v47 = vld [vmem:[%s6504_s17 + $0x140] sm:$0xff]  ;;  %v564_v48 = vsel %vm451_vm0, %v434_v43, 0.0 }
  0x33   : > { %505 = vadd.xlane.f32.xlu0 %v504_v50  ;;  %508 = vadd.xlane.f32.xlu1 %v507_v51  ;;  %v567_v50 = vsel %vm458_vm1, %v435_v45, 0.0  ;;  %v437_v51 = vmul.f32 %v6498_v1, %v376_v47 }
  0x37   : > { %511 = vadd.xlane.f32.xlu0 %v510_v56  ;;  %514 = vadd.xlane.f32.xlu1 %v513_v58  ;;  %v573_v56 = vsel %vm451_vm0, %v437_v51, 0.0  ;;  %v379_v58 = vld [vmem:[%s6504_s17 + $0x158] sm:$0xff] }
  0x38   : > { %v440_v61 = vmul.f32 %v6498_v1, %v379_v58 }
  0x3a   : > { %v582_v3 = vsel %vm451_vm0, %v440_v61, 0.0 }
  0x3b   : > { %517 = vadd.xlane.f32.xlu0 %v516_v62  ;;  %520 = vadd.xlane.f32.xlu1 %v519_v0  ;;  %v579_v62 = vsel %vm451_vm0, %v439_v57, 0.0  ;;  %v381_v0 = vld [vmem:[%s6504_s17 + $0x168] sm:$0xff] }
  0x3c   : > { %v442_v4 = vmul.f32 %v6498_v1, %v381_v0 }
  0x3e   : > { %v588_v9 = vsel %vm451_vm0, %v442_v4, 0.0 }
  0x3f   : > { %523 = vadd.xlane.f32.xlu0 %v522_v5  ;;  %526 = vadd.xlane.f32.xlu1 %v525_v7  ;;  %v585_v5 = vsel %vm458_vm1, %v441_v63, 0.0  ;;  %v383_v7 = vld [vmem:[%s6504_s17 + $0x178] sm:$0x3] }
  0x40   : > { %v444_v10 = vmul.f32 %v6498_v1, %v383_v7 }
  0x42   : > { %v594_v15 = vsel %vm458_vm1, %v444_v10, 0.0 }
  0x43   : > { %529 = vadd.xlane.f32.xlu0 %v528_v11  ;;  %532 = vadd.xlane.f32.xlu1 %v531_v13  ;;  %v591_v11 = vsel %vm451_vm0, %v443_v6, 0.0  ;;  %v385_v13 = vld [vmem:[%s6504_s17 + $0x188] sm:$0xff] }
  0x44   : > { %v446_v16 = vmul.f32 %v6498_v1, %v385_v13 }
  0x46   : > { %v600_v21 = vsel %vm451_vm0, %v446_v16, 0.0 }
  0x47   : > { %535 = vadd.xlane.f32.xlu0 %v534_v18  ;;  %538 = vadd.xlane.f32.xlu1 %v537_v20  ;;  %v447_v18 = vmul.f32 %v6498_v1, %v386_v14  ;;  %v337_v20 = vld [vmem:[%s6504_s17 + $0x8] sm:$0xff] }
  0x49   : > { %v603_v23 = vsel %vm458_vm1, %v447_v18, 0.0 }
  0x4b   : > { %541 = vadd.xlane.f32.xlu0 %v540_v24  ;;  %544 = vadd.xlane.f32.xlu1 %v543_v26  ;;  %v398_v24 = vmul.f32 %v6498_v1, %v337_v20  ;;  %v452_v26 = vsel %vm451_vm0, %v397_v22, 0.0 }
  0x4d   : > { %v455_v28 = vsel %vm451_vm0, %v398_v24, 0.0 }
  0x4f   : > { %547 = vadd.xlane.f32.xlu0 %v546_v30  ;;  %550 = vadd.xlane.f32.xlu1 %v549_v32  ;;  %v6659_v30 = vld [vmem:[#allocation3] ss:$0 sm:$0xff] }
  0x53   : > { %553 = vadd.xlane.f32.xlu0 %v552_v36  ;;  %556 = vadd.xlane.f32.xlu1 %v555_v38 }
  0x57   : > { %559 = vadd.xlane.f32.xlu0 %v558_v42  ;;  %562 = vadd.xlane.f32.xlu1 %v561_v44 }
  0x5b   : > { %565 = vadd.xlane.f32.xlu0 %v564_v48  ;;  %568 = vadd.xlane.f32.xlu1 %v567_v50 }
  0x5f   : > { %571 = vadd.xlane.f32.xlu0 %v570_v54  ;;  %574 = vadd.xlane.f32.xlu1 %v573_v56 }
  0x63   : > { %577 = vadd.xlane.f32.xlu0 %v576_v60  ;;  %580 = vadd.xlane.f32.xlu1 %v579_v62 }
  0x67   : > { %583 = vadd.xlane.f32.xlu0 %v582_v3  ;;  %586 = vadd.xlane.f32.xlu1 %v585_v5 }
  0x6b   : > { %589 = vadd.xlane.f32.xlu0 %v588_v9  ;;  %592 = vadd.xlane.f32.xlu1 %v591_v11 }
  0x6f   : > { %595 = vadd.xlane.f32.xlu0 %v594_v15  ;;  %598 = vadd.xlane.f32.xlu1 %v597_v17 }
  0x73   : > { %601 = vadd.xlane.f32.xlu0 %v600_v21  ;;  %604 = vadd.xlane.f32.xlu1 %v603_v23 }
  0x77   : > { %453 = vadd.xlane.f32.xlu0 %v452_v26  ;;  %456 = vadd.xlane.f32.xlu1 %v455_v28 }
  0x7b   : > { %460 = vadd.xlane.f32.xlu0 %v459_v29 }
  0xa4   : > { %v464_v31 = vpop.xlane.xlu0 %463  ;;  %v470_v32 = vpop.xlane.xlu1 %469 }
  0xa5   : > { %v625_v33 = vadd.f32 %v6659_v30, %v464_v31  ;;  %v627_v34 = vadd.f32 %v6659_v30, %v470_v32 }
  0xa7   : > { %v4873_v35 = vmul.f32 -1.442695, %v625_v33  ;;  %v4875_v36 = vmul.f32 -1.442695, %v627_v34 }
  0xa8   : > { %v467_v37 = vpop.xlane.xlu0 %466  ;;  %v473_v38 = vpop.xlane.xlu1 %472 }
  0xa9   : > { %6149 = vpow2.f32 %v4873_v35  ;;  %v626_v1 = vadd.f32 %v6659_v30, %v467_v37  ;;  %v628_v39 = vadd.f32 %v6659_v30, %v473_v38 }
  0xaa   : > { %6151 = vpow2.f32 %v4875_v36 }
  0xab   : > { %v4874_v40 = vmul.f32 -1.442695, %v626_v1  ;;  %v4876_v41 = vmul.f32 -1.442695, %v628_v39 }
  0xac   : > { %v476_v42 = vpop.xlane.xlu0 %475  ;;  %v479_v43 = vpop.xlane.xlu1 %478 }
  0xad   : > { %6153 = vpow2.f32 %v4874_v40  ;;  %v629_v44 = vadd.f32 %v6659_v30, %v476_v42  ;;  %v630_v45 = vadd.f32 %v6659_v30, %v479_v43 }
  0xae   : > { %6155 = vpow2.f32 %v4876_v41 }
  0xaf   : > { %v4877_v46 = vmul.f32 -1.442695, %v629_v44  ;;  %v4878_v47 = vmul.f32 -1.442695, %v630_v45 }
  0xb0   : > { %v482_v48 = vpop.xlane.xlu0 %481  ;;  %v485_v49 = vpop.xlane.xlu1 %484 }
  0xb1   : > { %6157 = vpow2.f32 %v4877_v46  ;;  %v631_v50 = vadd.f32 %v6659_v30, %v482_v48  ;;  %v632_v51 = vadd.f32 %v6659_v30, %v485_v49 }
  0xb2   : > { %6159 = vpow2.f32 %v4878_v47 }
  0xb3   : > { %v6150_v52 = vpop.eup %6149  ;;  %v4879_v53 = vmul.f32 -1.442695, %v631_v50  ;;  %v4880_v57 = vmul.f32 -1.442695, %v632_v51 }
  0xb4   : > { %v6152_v54 = vpop.eup %6151  ;;  %v841_v55 = vadd.f32 1.0, %v6150_v52  ;;  %v488_v56 = vpop.xlane.xlu0 %487 }
  0xb5   : > { %v491_v58 = vpop.xlane.xlu1 %490  ;;  %v843_v59 = vadd.f32 1.0, %v6152_v54  ;;  %6161 = vpow2.f32 %v4879_v53  ;;  %v633_v60 = vadd.f32 %v6659_v30, %v488_v56 }
  0xb6   : > { %6163 = vrcp.f32 %v841_v55  ;;  %v634_v63 = vadd.f32 %v6659_v30, %v491_v58 }
  0xb7   : > { %v6154_v61 = vpop.eup %6153  ;;  %6165 = vrcp.f32 %v843_v59  ;;  %v4881_v62 = vmul.f32 -1.442695, %v633_v60 }
  0xb8   : > { %v6156_v0 = vpop.eup %6155  ;;  %v842_v2 = vadd.f32 1.0, %v6154_v61  ;;  %v494_v3 = vpop.xlane.xlu0 %493  ;;  %6167 = vpow2.f32 %v4880_v57  ;;  %v4882_v9 = vmul.f32 -1.442695, %v634_v63 }
  0xb9   : > { %v497_v4 = vpop.xlane.xlu1 %496  ;;  %v844_v5 = vadd.f32 1.0, %v6156_v0  ;;  %v635_v6 = vadd.f32 %v6659_v30, %v494_v3 }
  0xba   : > { %6169 = vrcp.f32 %v842_v2  ;;  %v636_v13 = vadd.f32 %v6659_v30, %v497_v4 }
  0xbb   : > { %v6158_v7 = vpop.eup %6157  ;;  %6171 = vpow2.f32 %v4881_v62  ;;  %v4883_v8 = vmul.f32 -1.442695, %v635_v6  ;;  %v6122_v6 = vld [vmem:[%s7982_s3 + $0x50] sm:$0xff]  }
  0xbc   : > { %v6160_v10 = vpop.eup %6159  ;;  %6173 = vrcp.f32 %v844_v5  ;;  %v845_v11 = vadd.f32 1.0, %v6158_v7  ;;  %v500_v12 = vpop.xlane.xlu0 %499  ;;  %v4884_v22 = vmul.f32 -1.442695, %v636_v13  ;;  %5510 = vmatprep.subr.bf16.mxu0 %v6122_v6 }
  0xbd   : > { %v503_v14 = vpop.xlane.xlu1 %502  ;;  %6175 = vpow2.f32 %v4883_v8  ;;  %v637_v15 = vadd.f32 %v6659_v30, %v500_v12  ;;  %v846_v18 = vadd.f32 1.0, %v6160_v10  ;;  %5511 = vmatpush3.bf16.msra.mxu0 %v6122_v6 }
  0xbe   : > { %v638_v16 = vadd.f32 %v6659_v30, %v503_v14  ;;  %6177 = vpow2.f32 %v4882_v9 }
  0xbf   : > { %v6162_v17 = vpop.eup %6161  ;;  %v4885_v19 = vmul.f32 -1.442695, %v637_v15  ;;  %6179 = vrcp.f32 %v845_v11 }
  0xc0   : > { %v6164_v20 = vpop.eup %6163  ;;  %v506_v21 = vpop.xlane.xlu0 %505  ;;  %v4886_v27 = vmul.f32 -1.442695, %v638_v16  ;;  %v847_v31 = vadd.f32 1.0, %v6162_v17 }
  0xc1   : > { %v509_v23 = vpop.xlane.xlu1 %508  ;;  %v6166_v24 = vpop.eup %6165  ;;  %6181 = vpow2.f32 %v4885_v19  ;;  %v639_v25 = vadd.f32 %v6659_v30, %v506_v21  ;;  %1017 = vperm.xlu1 %6120, %v6164_v20   ;;  %v6123_v19 = vld [vmem:[%s7982_s3 + $0x58] sm:$0xff]  }
  0xc2   : > { %v6168_v26 = vpop.eup %6167  ;;  %6183 = vrcp.f32 %v846_v18  ;;  %v640_v37 = vadd.f32 %v6659_v30, %v509_v23  ;;  %5512 = vmatprep.subr.bf16.mxu0 %v6123_v19 }
  0xc3   : > { %v4887_v28 = vmul.f32 -1.442695, %v639_v25  ;;  %6185 = vpow2.f32 %v4884_v22  ;;  %v848_v35 = vadd.f32 1.0, %v6168_v26  ;;  %5513 = vmatpush3.bf16.msra.mxu0 %v6123_v19 }
  0xc4   : > { %v6170_v29 = vpop.eup %6169  ;;  %v512_v32 = vpop.xlane.xlu0 %511  ;;  %6187 = vpow2.f32 %v4886_v27  ;;  %v4888_v47 = vmul.f32 -1.442695, %v640_v37 }
  0xc5   : > { %v515_v33 = vpop.xlane.xlu1 %514  ;;  %v6172_v34 = vpop.eup %6171  ;;  %v641_v36 = vadd.f32 %v6659_v30, %v512_v32  ;;  %1027 = vperm.xlu1 %6120, %v6166_v24   ;;  %1022 = vperm.xlu0 %6121, %v6170_v29   ;;  %6189 = vpow2.f32 %v4887_v28  ;;  %v6124_v32 = vld [vmem:[%s7982_s3 + $0x60] ss:$0 sps:$4 sm:$0xff]  }
  0xc6   : > { %v6174_v38 = vpop.eup %6173  ;;  %6191 = vrcp.f32 %v847_v31  ;;  %v849_v40 = vadd.f32 1.0, %v6172_v34  ;;  %v642_v43 = vadd.f32 %v6659_v30, %v515_v33  ;;  %6102 = vmatprep.subr.msk.bf16.mxu0 %vm1548_vm2, %v6124_v32 }
  0xc7   : > { %v6176_v1 = vpop.eup %6175  ;;  %v4889_v39 = vmul.f32 -1.442695, %v641_v36  ;;  %6193 = vrcp.f32 %v848_v35 }
  0xc8   : > { %v851_v41 = vadd.f32 1.0, %v6176_v1  ;;  %v518_v42 = vpop.xlane.xlu0 %517  ;;  %v6178_v45 = vpop.eup %6177  ;;  %v4890_v54 = vmul.f32 -1.442695, %v642_v43 }
  0xc9   : > { %v521_v44 = vpop.xlane.xlu1 %520  ;;  %v643_v46 = vadd.f32 %v6659_v30, %v518_v42  ;;  %1032 = vperm.xlu1 %6120, %v6174_v38   ;;  %v6180_v48 = vpop.eup %6179  ;;  %v850_v59 = vadd.f32 1.0, %v6178_v45  ;;  %v2685_v42 = vsel %vm1548_vm2, %v6124_v32, 0 }
  0xca   : > { %6195 = vrcp.f32 %v851_v41  ;;  %v644_v51 = vadd.f32 %v6659_v30, %v521_v44  ;;  %5515 = vmatpush3.bf16.msra.mxu0 %v2685_v42 }
  0xcb   : > { %v6182_v49 = vpop.eup %6181  ;;  %6197 = vpow2.f32 %v4889_v39  ;;  %v4891_v50 = vmul.f32 -1.442695, %v643_v46 }
  0xcc   : > { %6199 = vrcp.f32 %v849_v40  ;;  %v853_v52 = vadd.f32 1.0, %v6182_v49  ;;  %v524_v53 = vpop.xlane.xlu0 %523  ;;  %v6184_v56 = vpop.eup %6183  ;;  %v4892_v61 = vmul.f32 -1.442695, %v644_v51 }
  0xcd   : > { %v527_v55 = vpop.xlane.xlu1 %526  ;;  %v645_v57 = vadd.f32 %v6659_v30, %v524_v53  ;;  %1037 = vperm.xlu1 %6120, %v6180_v48   ;;  %6201 = vpow2.f32 %v4888_v47  ;;  %v6186_v58 = vpop.eup %6185 }
  0xce   : > { %6203 = vrcp.f32 %v853_v52  ;;  %v6188_v62 = vpop.eup %6187  ;;  %v852_v3 = vadd.f32 1.0, %v6186_v58  ;;  %v646_v5 = vadd.f32 %v6659_v30, %v527_v55 }
  0xcf   : > { %6205 = vpow2.f32 %v4891_v50  ;;  %v4893_v60 = vmul.f32 -1.442695, %v645_v57  ;;  %v6190_v2 = vpop.eup %6189  ;;  %v854_v10 = vadd.f32 1.0, %v6188_v62 }
  0xd0   : > { %v530_v63 = vpop.xlane.xlu0 %529  ;;  %6207 = vpow2.f32 %v4890_v54  ;;  %v6192_v7 = vpop.eup %6191  ;;  %v855_v8 = vadd.f32 1.0, %v6190_v2  ;;  %v4894_v18 = vmul.f32 -1.442695, %v646_v5 }
  0xd1   : > { %v533_v0 = vpop.xlane.xlu1 %532  ;;  %6209 = vpow2.f32 %v4893_v60  ;;  %v647_v4 = vadd.f32 %v6659_v30, %v530_v63  ;;  %1042 = vperm.xlu1 %6120, %v6184_v56   ;;  %v6194_v9 = vpop.eup %6193 }
  0xd2   : > { %6211 = vrcp.f32 %v850_v59  ;;  %v648_v12 = vadd.f32 %v6659_v30, %v533_v0 }
  0xd3   : > { %v4895_v11 = vmul.f32 -1.442695, %v647_v4  ;;  %6213 = vpow2.f32 %v4892_v61 }
  0xd4   : > { %v6196_v13 = vpop.eup %6195  ;;  %6215 = vrcp.f32 %v855_v8  ;;  %v536_v14 = vpop.xlane.xlu0 %535  ;;  %v4896_v24 = vmul.f32 -1.442695, %v648_v12 }
  0xd5   : > { %v539_v15 = vpop.xlane.xlu1 %538  ;;  %v6198_v16 = vpop.eup %6197  ;;  %6217 = vrcp.f32 %v852_v3  ;;  %v649_v17 = vadd.f32 %v6659_v30, %v536_v14  ;;  %1047 = vperm.xlu1 %6120, %v6192_v7   ;;  %1067 = vperm.xlu0 %6121, %v6196_v13  }
  0xd6   : > { %v6200_v20 = vpop.eup %6199  ;;  %v857_v21 = vadd.f32 1.0, %v6198_v16  ;;  %6219 = vpow2.f32 %v4895_v11  ;;  %v650_v25 = vadd.f32 %v6659_v30, %v539_v15 }
  0xd7   : > { %v6202_v22 = vpop.eup %6201  ;;  %6221 = vrcp.f32 %v854_v10  ;;  %v4897_v23 = vmul.f32 -1.442695, %v649_v17 }
  0xd8   : > { %v6204_v26 = vpop.eup %6203  ;;  %6223 = vrcp.f32 %v857_v21  ;;  %v542_v27 = vpop.xlane.xlu0 %541  ;;  %v4898_v37 = vmul.f32 -1.442695, %v650_v25  ;;  %v856_v39 = vadd.f32 1.0, %v6202_v22 }
  0xd9   : > { %v545_v28 = vpop.xlane.xlu1 %544  ;;  %v6206_v29 = vpop.eup %6205  ;;  %v651_v31 = vadd.f32 %v6659_v30, %v542_v27  ;;  %1052 = vperm.xlu1 %6120, %v6194_v9   ;;  %1077 = vperm.xlu0 %6121, %v6204_v26   ;;  %6225 = vpow2.f32 %v4894_v18 }
  0xda   : > { %v6208_v33 = vpop.eup %6207  ;;  %v859_v34 = vadd.f32 1.0, %v6206_v29  ;;  %6227 = vpow2.f32 %v4897_v23  ;;  %v652_v47 = vadd.f32 %v6659_v30, %v545_v28 }
  0xdb   : > { %v6210_v35 = vpop.eup %6209  ;;  %v4899_v36 = vmul.f32 -1.442695, %v651_v31  ;;  %6229 = vpow2.f32 %v4896_v24  ;;  %v858_v46 = vadd.f32 1.0, %v6208_v33 }
  0xdc   : > { %v6212_v38 = vpop.eup %6211  ;;  %6231 = vrcp.f32 %v859_v34  ;;  %v861_v1 = vadd.f32 1.0, %v6210_v35  ;;  %v548_v40 = vpop.xlane.xlu0 %547  ;;  %v4900_v59 = vmul.f32 -1.442695, %v652_v47 }
  0xdd   : > { %v551_v41 = vpop.xlane.xlu1 %550  ;;  %v6214_v43 = vpop.eup %6213  ;;  %6233 = vpow2.f32 %v4899_v36  ;;  %v653_v44 = vadd.f32 %v6659_v30, %v548_v40  ;;  %1057 = vperm.xlu1 %6120, %v6200_v20  }
  0xde   : > { %v6216_v45 = vpop.eup %6215  ;;  %6235 = vrcp.f32 %v861_v1  ;;  %v860_v51 = vadd.f32 1.0, %v6214_v43  ;;  %v654_v53 = vadd.f32 %v6659_v30, %v551_v41 }
  0xdf   : > { %v6218_v48 = vpop.eup %6217  ;;  %v4901_v49 = vmul.f32 -1.442695, %v653_v44  ;;  %1087 = vperm.xlu0 %6121, %v6216_v45   ;;  %6237 = vpow2.f32 %v4898_v37 }
  0xe0   : > { %v6220_v50 = vpop.eup %6219  ;;  %6239 = vrcp.f32 %v856_v39  ;;  %v554_v52 = vpop.xlane.xlu0 %553  ;;  %v4902_v0 = vmul.f32 -1.442695, %v654_v53 }
  0xe1   : > { %v557_v54 = vpop.xlane.xlu1 %556  ;;  %v6222_v55 = vpop.eup %6221  ;;  %v863_v56 = vadd.f32 1.0, %v6220_v50  ;;  %6241 = vpow2.f32 %v4901_v49  ;;  %v655_v57 = vadd.f32 %v6659_v30, %v554_v52  ;;  %1062 = vperm.xlu1 %6120, %v6212_v38  }
  0xe2   : > { %v6224_v58 = vpop.eup %6223  ;;  %6243 = vrcp.f32 %v858_v46  ;;  %v656_v10 = vadd.f32 %v6659_v30, %v557_v54 }
  0xe3   : > { %v6226_v60 = vpop.eup %6225  ;;  %6245 = vrcp.f32 %v863_v56  ;;  %v4903_v61 = vmul.f32 -1.442695, %v655_v57  ;;  %1097 = vperm.xlu0 %6121, %v6224_v58  }
  0xe4   : > { %v6228_v62 = vpop.eup %6227  ;;  %6247 = vrcp.f32 %v860_v51  ;;  %v560_v63 = vpop.xlane.xlu0 %559  ;;  %v862_v8 = vadd.f32 1.0, %v6226_v60  ;;  %v4904_v21 = vmul.f32 -1.442695, %v656_v10 }
  0xe5   : > { %v563_v2 = vpop.xlane.xlu1 %562  ;;  %v6230_v3 = vpop.eup %6229  ;;  %v865_v4 = vadd.f32 1.0, %v6228_v62  ;;  %6249 = vpow2.f32 %v4903_v61  ;;  %v657_v5 = vadd.f32 %v6659_v30, %v560_v63  ;;  %1072 = vperm.xlu1 %6120, %v6218_v48  }
  0xe6   : > { %v6232_v6 = vpop.eup %6231  ;;  %6251 = vpow2.f32 %v4900_v59  ;;  %v864_v13 = vadd.f32 1.0, %v6230_v3  ;;  %v658_v22 = vadd.f32 %v6659_v30, %v563_v2 }
  0xe7   : > { %v6234_v7 = vpop.eup %6233  ;;  %6253 = vrcp.f32 %v865_v4  ;;  %v4905_v9 = vmul.f32 -1.442695, %v657_v5  ;;  %1107 = vperm.xlu0 %6121, %v6232_v6  }
  0xe8   : > { %v6236_v11 = vpop.eup %6235  ;;  %v867_v12 = vadd.f32 1.0, %v6234_v7  ;;  %v566_v14 = vpop.xlane.xlu0 %565  ;;  %6255 = vpow2.f32 %v4902_v0  ;;  %v4906_v35 = vmul.f32 -1.442695, %v658_v22 }
  0xe9   : > { %v569_v15 = vpop.xlane.xlu1 %568  ;;  %v6238_v16 = vpop.eup %6237  ;;  %6257 = vpow2.f32 %v4905_v9  ;;  %v659_v17 = vadd.f32 %v6659_v30, %v566_v14  ;;  %1082 = vperm.xlu1 %6120, %v6222_v55  }
  0xea   : > { %v6240_v18 = vpop.eup %6239  ;;  %6259 = vrcp.f32 %v867_v12  ;;  %v866_v25 = vadd.f32 1.0, %v6238_v16  ;;  %v660_v27 = vadd.f32 %v6659_v30, %v569_v15 }
  0xeb   : > { %v6242_v19 = vpop.eup %6241  ;;  %6261 = vrcp.f32 %v862_v8  ;;  %v4907_v20 = vmul.f32 -1.442695, %v659_v17  ;;  %1117 = vperm.xlu0 %6121, %v6236_v11  }
  0xec   : > { %v6244_v23 = vpop.eup %6243  ;;  %v869_v24 = vadd.f32 1.0, %v6242_v19  ;;  %6263 = vrcp.f32 %v864_v13  ;;  %v572_v26 = vpop.xlane.xlu0 %571  ;;  %v4908_v1 = vmul.f32 -1.442695, %v660_v27 }
  0xed   : > { %v575_v28 = vpop.xlane.xlu1 %574  ;;  %v6246_v29 = vpop.eup %6245  ;;  %6265 = vpow2.f32 %v4907_v20  ;;  %v661_v31 = vadd.f32 %v6659_v30, %v572_v26  ;;  %1092 = vperm.xlu1 %6120, %v6240_v18  }
  0xee   : > { %v6248_v32 = vpop.eup %6247  ;;  %6267 = vrcp.f32 %v869_v24  ;;  %v662_v39 = vadd.f32 %v6659_v30, %v575_v28 }
  0xef   : > { %v6250_v33 = vpop.eup %6249  ;;  %v4909_v34 = vmul.f32 -1.442695, %v661_v31  ;;  %1127 = vperm.xlu0 %6121, %v6246_v29   ;;  %6269 = vpow2.f32 %v4904_v21 }
  0xf0   : > { %v6252_v36 = vpop.eup %6251  ;;  %v871_v37 = vadd.f32 1.0, %v6250_v33  ;;  %6271 = vrcp.f32 %v866_v25  ;;  %v578_v38 = vpop.xlane.xlu0 %577  ;;  %v4910_v50 = vmul.f32 -1.442695, %v662_v39 }
  0xf1   : > { %v581_v40 = vpop.xlane.xlu1 %580  ;;  %v6254_v41 = vpop.eup %6253  ;;  %6273 = vpow2.f32 %v4909_v34  ;;  %v663_v42 = vadd.f32 %v6659_v30, %v578_v38  ;;  %1102 = vperm.xlu1 %6120, %v6244_v23   ;;  %v868_v45 = vadd.f32 1.0, %v6252_v36 }
  0xf2   : > { %v6256_v43 = vpop.eup %6255  ;;  %6275 = vrcp.f32 %v871_v37  ;;  %v664_v51 = vadd.f32 %v6659_v30, %v581_v40 }
  0xf3   : > { %v6258_v44 = vpop.eup %6257  ;;  %v4911_v46 = vmul.f32 -1.442695, %v663_v42  ;;  %1137 = vperm.xlu0 %6121, %v6254_v41   ;;  %6277 = vpow2.f32 %v4906_v35  ;;  %v870_v54 = vadd.f32 1.0, %v6256_v43 }
  0xf4   : > { %v6260_v47 = vpop.eup %6259  ;;  %v873_v48 = vadd.f32 1.0, %v6258_v44  ;;  %v584_v49 = vpop.xlane.xlu0 %583  ;;  %6279 = vpow2.f32 %v4908_v1  ;;  %v4912_v62 = vmul.f32 -1.442695, %v664_v51 }
  0xf5   : > { %v587_v52 = vpop.xlane.xlu1 %586  ;;  %v6262_v53 = vpop.eup %6261  ;;  %6281 = vpow2.f32 %v4911_v46  ;;  %v665_v55 = vadd.f32 %v6659_v30, %v584_v49  ;;  %1112 = vperm.xlu1 %6120, %v6248_v32  }
  0xf6   : > { %v6264_v56 = vpop.eup %6263  ;;  %6283 = vrcp.f32 %v873_v48  ;;  %v666_v3 = vadd.f32 %v6659_v30, %v587_v52 }
  0xf7   : > { %v6266_v57 = vpop.eup %6265  ;;  %6285 = vrcp.f32 %v868_v45  ;;  %v4913_v58 = vmul.f32 -1.442695, %v665_v55  ;;  %1147 = vperm.xlu0 %6121, %v6260_v47  }
  0xf8   : > { %v6268_v59 = vpop.eup %6267  ;;  %v875_v60 = vadd.f32 1.0, %v6266_v57  ;;  %v590_v61 = vpop.xlane.xlu0 %589  ;;  %6287 = vpow2.f32 %v4910_v50  ;;  %v4914_v14 = vmul.f32 -1.442695, %v666_v3 }
  0xf9   : > { %v593_v63 = vpop.xlane.xlu1 %592  ;;  %v6270_v0 = vpop.eup %6269  ;;  %6289 = vrcp.f32 %v870_v54  ;;  %v667_v2 = vadd.f32 %v6659_v30, %v590_v61  ;;  %1122 = vperm.xlu1 %6120, %v6262_v53  }
  0xfa   : > { %v6272_v4 = vpop.eup %6271  ;;  %6291 = vrcp.f32 %v875_v60  ;;  %v872_v9 = vadd.f32 1.0, %v6270_v0  ;;  %v668_v18 = vadd.f32 %v6659_v30, %v593_v63 }
  0xfb   : > { %v6274_v5 = vpop.eup %6273  ;;  %6293 = vpow2.f32 %v4913_v58  ;;  %v4915_v6 = vmul.f32 -1.442695, %v667_v2  ;;  %1157 = vperm.xlu0 %6121, %v6268_v59  }
  0xfc   : > { %v6276_v7 = vpop.eup %6275  ;;  %v877_v8 = vadd.f32 1.0, %v6274_v5  ;;  %v596_v10 = vpop.xlane.xlu0 %595  ;;  %6295 = vpow2.f32 %v4912_v62  ;;  %v4916_v31 = vmul.f32 -1.442695, %v668_v18 }
  0xfd   : > { %v599_v11 = vpop.xlane.xlu1 %598  ;;  %v6278_v12 = vpop.eup %6277  ;;  %v669_v13 = vadd.f32 %v6659_v30, %v596_v10  ;;  %1132 = vperm.xlu1 %6120, %v6264_v56  }
  0xfe   : > { %v6280_v15 = vpop.eup %6279  ;;  %6297 = vrcp.f32 %v877_v8  ;;  %v874_v21 = vadd.f32 1.0, %v6278_v12  ;;  %v670_v32 = vadd.f32 %v6659_v30, %v599_v11 }
  0xff   : > { %v6282_v16 = vpop.eup %6281  ;;  %6299 = vpow2.f32 %v4915_v6  ;;  %v4917_v17 = vmul.f32 -1.442695, %v669_v13  ;;  %1167 = vperm.xlu0 %6121, %v6276_v7   ;;  %v876_v26 = vadd.f32 1.0, %v6280_v15 }
 0x100   : > { %v6284_v19 = vpop.eup %6283  ;;  %6301 = vrcp.f32 %v872_v9  ;;  %v879_v20 = vadd.f32 1.0, %v6282_v16  ;;  %v602_v22 = vpop.xlane.xlu0 %601  ;;  %v4918_v40 = vmul.f32 -1.442695, %v670_v32 }
 0x101   : > { %v6286_v23 = vpop.eup %6285  ;;  %v671_v24 = vadd.f32 %v6659_v30, %v602_v22  ;;  %1142 = vperm.xlu1 %6120, %v6272_v4   ;;  %6303 = vpow2.f32 %v4914_v14  ;;  %v605_v27 = vpop.xlane.xlu1 %604 }
 0x102   : > { %v6288_v25 = vpop.eup %6287  ;;  %6305 = vrcp.f32 %v879_v20  ;;  %v672_v41 = vadd.f32 %v6659_v30, %v605_v27  ;;  %v6129_v27 = vld [vmem:[%s7982_s3 + $0x24] ss:$0 sps:$4 sm:$0xff]  }
 0x103   : > { %v6290_v28 = vpop.eup %6289  ;;  %6307 = vpow2.f32 %v4917_v17  ;;  %v4919_v29 = vmul.f32 -1.442695, %v671_v24  ;;  %1177 = vperm.xlu0 %6121, %v6284_v19   ;;  %v878_v36 = vadd.f32 1.0, %v6288_v25  ;;  %v6125_v24 = vld [vmem:[%s7982_s3 + $0x14] sm:$0xff]   ;;  %v6729_v25 = vld [vmem:[%s7982_s3 + $0x64] sm:$0xff]  }
 0x104   : > { %v6292_v33 = vpop.eup %6291  ;;  %6309 = vrcp.f32 %v874_v21  ;;  %v454_v34 = vpop.xlane.xlu0 %453  ;;  %v4920_v52 = vmul.f32 -1.442695, %v672_v41  ;;  %5358 = vmatprep.subr.bf16.mxu1 %v6125_v24  ;;  %5548 = vmatprep.subr.bf16.mxu0 %v6729_v25 }
 0x105   : > { %v6294_v35 = vpop.eup %6293  ;;  %6311 = vpow2.f32 %v4919_v29  ;;  %v622_v37 = vadd.f32 %v6659_v30, %v454_v34  ;;  %1152 = vperm.xlu1 %6120, %v6286_v23   ;;  %v457_v44 = vpop.xlane.xlu1 %456  ;;  %5359 = vmatpush3.bf16.msra.mxu1 %v6125_v24  ;;  %v6741_v29 = vld [vmem:[%s6504_s17 + $0x1a0] sm:$0xff]  ;;  %v6748_v34 = vld [vmem:[%s6504_s17 + $0x1a8] sm:$0x3] }
 0x106   : > { %v6296_v38 = vpop.eup %6295  ;;  %v881_v1 = vadd.f32 1.0, %v6294_v35  ;;  %6313 = vrcp.f32 %v876_v26  ;;  %v623_v53 = vadd.f32 %v6659_v30, %v457_v44  ;;  %v6127_v26 = vld [vmem:[%s7982_s3 + $0x1c] sm:$0xff]  }
 0x107   : > { %v4870_v39 = vmul.f32 -1.442695, %v622_v37  ;;  %1187 = vperm.xlu0 %6121, %v6292_v33   ;;  %6315 = vpow2.f32 %v4916_v31  ;;  %v880_v46 = vadd.f32 1.0, %v6296_v38  ;;  %5360 = vmatprep.subr.bf16.mxu1 %v6127_v26  ;;  %v6367_v31 = vld [vmem:[%s7980_s1] ss:$0 sm:$0xff]  ;;  %v6368_v35 = vld [vmem:[%s6504_s17 + $0x18] sm:$0xff] }
 0x108   : > { %v6298_v42 = vpop.eup %6297  ;;  %6317 = vrcp.f32 %v881_v1  ;;  %v461_v43 = vpop.xlane.xlu0 %460  ;;  %v4871_v59 = vmul.f32 -1.442695, %v623_v53  ;;  %v449_v32 = vmul.f32 %v6367_v31, %v6741_v29  ;;  %v450_v38 = vmul.f32 %v6367_v31, %v6748_v34 }
 0x109   : > { %v6300_v45 = vpop.eup %6299  ;;  %6319 = vrcp.f32 %v878_v36  ;;  %v624_v47 = vadd.f32 %v6659_v30, %v461_v43  ;;  %1162 = vperm.xlu1 %6120, %v6290_v28   ;;  %5361 = vmatpush3.bf16.msra.mxu1 %v6127_v26  ;;  %v1550_v28 = vsel %vm1548_vm2, %v6129_v27, 0 }
 0x10a   : > { %v6302_v48 = vpop.eup %6301  ;;  %v883_v49 = vadd.f32 1.0, %v6300_v45  ;;  %6321 = vpow2.f32 %v4870_v39  ;;  %6098 = vmatprep.subr.msk.bf16.mxu1 %vm1548_vm2, %v6129_v27  ;;  %v609_v37 = vsel %vm451_vm0, %v449_v32, 0.0  ;;  %v612_v44 = vsel %vm458_vm1, %v450_v38, 0.0  ;;  %v6382_v27 = vld [vmem:[%s6504_s17 + $0x70] sm:$0x3] }
 0x10b   : > { %v6304_v50 = vpop.eup %6303  ;;  %v4872_v51 = vmul.f32 -1.442695, %v624_v47  ;;  %1197 = vperm.xlu0 %6121, %v6298_v42   ;;  %6323 = vpow2.f32 %v4918_v40  ;;  %v6369_v40 = vld [vmem:[%s6504_s17 + $0x28] sm:$0x3]  ;;  %v6370_v42 = vld [vmem:[%s6504_s17 + $0x20] sm:$0xff] }
 0x10c   : > { %v6306_v54 = vpop.eup %6305  ;;  %6325 = vrcp.f32 %v883_v49  ;;  %v882_v62 = vadd.f32 1.0, %v6304_v50  ;;  %v6372_v50 = vld [vmem:[%s6504_s17 + $0x38] sm:$0xff] }
 0x10d   : > { %v6308_v55 = vpop.eup %6307  ;;  %6327 = vrcp.f32 %v880_v46  ;;  %1172 = vperm.xlu1 %6120, %v6302_v48   ;;  %5363 = vmatpush3.bf16.msra.mxu1 %v1550_v28  ;;  %v6371_v46 = vld [vmem:[%s6504_s17 + $0x30] sm:$0xff]  ;;  %v6762_v48 = vld [vmem:[%s6504_s17 + $0x198] sm:$0xff] }
 0x10e   : > { %v6310_v56 = vpop.eup %6309  ;;  %v885_v57 = vadd.f32 1.0, %v6308_v55  ;;  %6329 = vpow2.f32 %v4872_v51 }
 0x10f   : > { %v6312_v58 = vpop.eup %6311  ;;  %1207 = vperm.xlu0 %6121, %v6306_v54   ;;  %6331 = vpow2.f32 %v4920_v52  ;;  %v448_v54 = vmul.f32 %v6367_v31, %v6762_v48 }
 0x110   : > { %v6314_v60 = vpop.eup %6313  ;;  %6333 = vrcp.f32 %v885_v57  ;;  %v887_v61 = vadd.f32 1.0, %v6312_v58  ;;  %v6373_v57 = vld [vmem:[%s6504_s17 + $0x40] sm:$0x3] }
 0x111   : > { %v6316_v63 = vpop.eup %6315  ;;  %1182 = vperm.xlu1 %6120, %v6310_v56  }
 0x112   : > { %v6318_v0 = vpop.eup %6317  ;;  %6335 = vrcp.f32 %v887_v61  ;;  %v884_v3 = vadd.f32 1.0, %v6316_v63 }
 0x113   : > { %v6320_v30 = vpop.eup %6319  ;;  %1217 = vperm.xlu0 %6121, %v6318_v0   ;;  %6337 = vpow2.f32 %v4871_v59  ;;  %v606_v59 = vsel %vm451_vm0, %v448_v54, 0.0  ;;  %v6375_v0 = vld [vmem:[%s6504_s17 + $0x68] sm:$0xff]  ;;  %v6388_v54 = vld [vmem:[%s6504_s17 + $0xa0] sm:$0x3] }
 0x114   : > { %v6322_v2 = vpop.eup %6321  ;;  %6339 = vrcp.f32 %v882_v62  ;;  %v6374_v62 = vld [vmem:[%s6504_s17 + $0x48] sm:$0xff] }
 0x115   : > { %v6324_v4 = vpop.eup %6323  ;;  %v838_v5 = vadd.f32 1.0, %v6322_v2  ;;  %1192 = vperm.xlu1 %6120, %v6314_v60  }
 0x116   : > { %v6326_v6 = vpop.eup %6325  ;;  %v886_v9 = vadd.f32 1.0, %v6324_v4  ;;  %v6376_v4 = vld [vmem:[%s6504_s17 + $0x50] sm:$0xff] }
 0x117   : > { %v6328_v7 = vpop.eup %6327  ;;  %6341 = vrcp.f32 %v838_v5  ;;  %1227 = vperm.xlu0 %6121, %v6326_v6   ;;  %v6377_v6 = vld [vmem:[%s6504_s17 + $0x78] sm:$0xff] }
 0x118   : > { %v6330_v8 = vpop.eup %6329  ;;  %6343 = vrcp.f32 %v884_v3 }
 0x119   : > { %v6332_v10 = vpop.eup %6331  ;;  %v840_v11 = vadd.f32 1.0, %v6330_v8  ;;  %1202 = vperm.xlu1 %6120, %v6320_v30  }
 0x11a   : > { %v6334_v12 = vpop.eup %6333  ;;  %v888_v14 = vadd.f32 1.0, %v6332_v10 }
 0x11b   : > { %6345 = vrcp.f32 %v840_v11  ;;  %1237 = vperm.xlu0 %6121, %v6334_v12   ;;  %v6128_v11 = vld [vmem:[%s7982_s3 + $0x6c] sm:$0xff]  }
 0x11c   : > { %v6336_v13 = vpop.eup %6335  ;;  %6347 = vrcp.f32 %v886_v9 }
 0x11d   : > { %v6338_v15 = vpop.eup %6337  ;;  %1212 = vperm.xlu1 %6120, %v6328_v7   ;;  %6349 = vrcp.f32 %v888_v14 }
 0x11e   : > { %v6340_v16 = vpop.eup %6339  ;;  %v839_v17 = vadd.f32 1.0, %v6338_v15 }
 0x11f   : > { %1247 = vperm.xlu0 %6121, %v6336_v13   ;;  %v6378_v13 = vld [vmem:[%s6504_s17 + $0x58] sm:$0x3] }
 0x120   : > { %6351 = vrcp.f32 %v839_v17 }
 0x121   : > { %v6342_v18 = vpop.eup %6341  ;;  %1222 = vperm.xlu1 %6120, %v6340_v16   ;;  %v6379_v16 = vld [vmem:[%s6504_s17 + $0x88] sm:$0x3] }
 0x122   : > { %v6344_v19 = vpop.eup %6343 }
 0x123   : > { %1002 = vperm.xlu0 %6121, %v6342_v18   ;;  %v6130_v18 = vld [vmem:[%s7982_s3 + $0x74] ss:$0 sps:$4 sm:$0xff]  }
 0x125   : > { %v6346_v20 = vpop.eup %6345  ;;  %1232 = vperm.xlu1 %6120, %v6344_v19  }
 0x126   : > { %v6348_v21 = vpop.eup %6347 }
 0x127   : > { %1012 = vperm.xlu0 %6121, %v6346_v20   ;;  %v6350_v22 = vpop.eup %6349  ;;  %v6380_v20 = vld [vmem:[%s6504_s17 + $0x60] sm:$0xff] }
 0x129   : > { %1242 = vperm.xlu1 %6120, %v6348_v21  }
 0x12a   : > { %v6352_v23 = vpop.eup %6351 }
 0x12d   : > { %1252 = vperm.xlu1 %6120, %v6350_v22  }
 0x131   : > { %1007 = vperm.xlu1 %6120, %v6352_v23   ;;  %v6381_v23 = vld [vmem:[%s6504_s17 + $0x98] sm:$0xff] }
 0x140   : > { %v1018_v33 = vpop.permute.xlu1 %1017 }
 0x141   : > { %v1273_v36 = vmul.f32 %v6368_v35, %v1018_v33  ;;  %v6383_v35 = vld [vmem:[%s6504_s17 + $0xa8] sm:$0xff] }
 0x143   : > { %1327 = vst.msk [vmem:[#allocation2 + $0x18] sm:$0xff] %vm451_vm0, %v1273_v36 }
 0x144   : > { %v1028_v1 = vpop.permute.xlu1 %1027  ;;  %v1023_v39 = vpop.permute.xlu0 %1022 }
 0x145   : > { %v1275_v41 = vmul.f32 %v6369_v40, %v1028_v1  ;;  %v1274_v43 = vmul.f32 %v6370_v42, %v1023_v39  ;;  %v6384_v1 = vld [vmem:[%s6504_s17 + $0x80] sm:$0xff] }
 0x146   : > { %610 = vadd.xlane.f32.xlu0 %v609_v37 }
 0x147   : > { %1329 = vst.msk [vmem:[#allocation2 + $0x28] sm:$0x3] %vm458_vm1, %v1275_v41  ;;  %v6385_v41 = vld [vmem:[%s6504_s17 + $0xb8] sm:$0x3] }
 0x148   : > { %1328 = vst.msk [vmem:[#allocation2 + $0x20] sm:$0xff] %vm451_vm0, %v1274_v43  ;;  %v1033_v45 = vpop.permute.xlu1 %1032 }
 0x149   : > { %v1276_v47 = vmul.f32 %v6371_v46, %v1033_v45 }
 0x14a   : > { %613 = vadd.xlane.f32.xlu0 %v612_v44  ;;  %v6386_v44 = vld [vmem:[%s6504_s17 + $0x90] sm:$0xff] }
 0x14b   : > { %1330 = vst.msk [vmem:[#allocation2 + $0x30] sm:$0xff] %vm451_vm0, %v1276_v47 }
 0x14c   : > { %v1038_v49 = vpop.permute.xlu1 %1037 }
 0x14d   : > { %v1277_v51 = vmul.f32 %v6372_v50, %v1038_v49  ;;  %v6387_v50 = vld [vmem:[%s6504_s17 + $0xc8] sm:$0xff] }
 0x14f   : > { %v2567_v52 = vld [vmem:[#allocation2 + $0x19] sm:$0xff]  ;;  %v2568_v53 = vld [vmem:[#allocation2 + $0x21] sm:$0xff]  ;;  %1331 = vst.msk [vmem:[#allocation2 + $0x38] sm:$0xff] %vm451_vm0, %v1277_v51 }
 0x150   : > { %v6767_v55 = vpack.c.bf16 %v2568_v53, %v2567_v52  ;;  %v1043_v56 = vpop.permute.xlu1 %1042 }
 0x151   : > { %v1278_v58 = vmul.f32 %v6373_v57, %v1043_v56 }
 0x152   : > { %5516 = vmatprep.mubr.msk.bf16.mxu0 %vm451_vm0, %v6767_v55 }
 0x153   : > { %1332 = vst.msk [vmem:[#allocation2 + $0x40] sm:$0x3] %vm458_vm1, %v1278_v58 }
 0x154   : > { %v1048_v60 = vpop.permute.xlu1 %1047  ;;  %v1068_v61 = vpop.permute.xlu0 %1067 }
 0x155   : > { %v1279_v63 = vmul.f32 %v6374_v62, %v1048_v60  ;;  %v1283_v30 = vmul.f32 %v6375_v0, %v1068_v61  ;;  %607 = vadd.xlane.f32.xlu1 %v606_v59  ;;  %v6389_v60 = vld [vmem:[%s6504_s17 + $0xd8] sm:$0xff] }
 0x156   : > { %v2569_v8 = vld [vmem:[#allocation2 + $0x31] sm:$0xff] }
 0x157   : > { %1333 = vst.msk [vmem:[#allocation2 + $0x48] sm:$0xff] %vm451_vm0, %v1279_v63  ;;  %1337 = vst.msk [vmem:[#allocation2 + $0x68] sm:$0xff] %vm451_vm0, %v1283_v30  ;;  %v6831_v63 = vld [vmem:[%s7982_s3] sm:$0xff]   ;;  %v6836_v30 = vld [vmem:[%s7982_s3 + $0x78] sm:$0xff]  }
 0x158   : > { %v1053_v2 = vpop.permute.xlu1 %1052  ;;  %v1078_v3 = vpop.permute.xlu0 %1077  ;;  %5396 = vmatprep.subr.bf16.mxu1 %v6831_v63 }
 0x159   : > { %v1280_v5 = vmul.f32 %v6376_v4, %v1053_v2  ;;  %v1285_v7 = vmul.f32 %v6377_v6, %v1078_v3  ;;  %v6390_v2 = vld [vmem:[%s6504_s17 + $0xb0] sm:$0xff] }
 0x15a   : > { %v2570_v9 = vld [vmem:[#allocation2 + $0x39] sm:$0xff] }
 0x15b   : > { %1334 = vst.msk [vmem:[#allocation2 + $0x50] sm:$0xff] %vm451_vm0, %v1280_v5  ;;  %1339 = vst.msk [vmem:[#allocation2 + $0x78] sm:$0xff] %vm451_vm0, %v1285_v7  ;;  %v6782_v10 = vpack.c.bf16 %v2570_v9, %v2569_v8  ;;  %v6391_v5 = vld [vmem:[%s6504_s17 + $0xe8] sm:$0x3]  ;;  %v6392_v8 = vld [vmem:[%s6504_s17 + $0xc0] sm:$0xff] }
 0x15c   : > { %v1058_v12 = vpop.permute.xlu1 %1057 }
 0x15d   : > { %v1281_v14 = vmul.f32 %v6378_v13, %v1058_v12  ;;  %5517 = vmatmul.mubr.msk.bf16.vlgmr.msra.gmra.mrb[0].mxu0 %vm451_vm0, %v6782_v10 }
 0x15e   : > { %v1088_v15 = vpop.permute.xlu0 %1087  ;;  %5549 = vmatpush3.bf16.msra.mxu0 %v6729_v25  ;;  %v2998_v25 = vsel %vm1548_vm2, %v6130_v18, 0 }
 0x15f   : > { %1335 = vst.msk [vmem:[#allocation2 + $0x58] sm:$0x3] %vm458_vm1, %v1281_v14  ;;  %v1287_v17 = vmul.f32 %v6379_v16, %v1088_v15  ;;  %5550 = vmatprep.subr.bf16.mxu0 %v6128_v11  ;;  %v6393_v14 = vld [vmem:[%s6504_s17 + $0xf8] sm:$0xff] }
 0x160   : > { %v1063_v19 = vpop.permute.xlu1 %1062 }
 0x161   : > { %1341 = vst.msk [vmem:[#allocation2 + $0x88] sm:$0x3] %vm458_vm1, %v1287_v17  ;;  %v1282_v21 = vmul.f32 %v6380_v20, %v1063_v19 }
 0x162   : > { %v1098_v22 = vpop.permute.xlu0 %1097  ;;  %5551 = vmatpush3.bf16.msra.mxu0 %v6128_v11  ;;  %v2571_v32 = vld [vmem:[#allocation2 + $0x49] sm:$0xff] }
 0x163   : > { %1336 = vst.msk [vmem:[#allocation2 + $0x60] sm:$0xff] %vm451_vm0, %v1282_v21  ;;  %v1289_v24 = vmul.f32 %v6381_v23, %v1098_v22  ;;  %6103 = vmatprep.subr.msk.bf16.mxu0 %vm1548_vm2, %v6130_v18  ;;  %v6394_v18 = vld [vmem:[%s6504_s17 + $0xd0] sm:$0x3]  ;;  %v6395_v23 = vld [vmem:[%s6504_s17 + $0x108] sm:$0xff] }
 0x164   : > { %v1073_v26 = vpop.permute.xlu1 %1072 }
 0x165   : > { %1343 = vst.msk [vmem:[#allocation2 + $0x98] sm:$0xff] %vm451_vm0, %v1289_v24  ;;  %v1284_v28 = vmul.f32 %v6382_v27, %v1073_v26  ;;  %v6396_v27 = vld [vmem:[%s6504_s17 + $0xe0] sm:$0xff] }
 0x166   : > { %v1108_v31 = vpop.permute.xlu0 %1107  ;;  %v2572_v33 = vld [vmem:[#allocation2 + $0x51] sm:$0xff]  ;;  %5553 = vmatpush3.bf16.msra.mxu0 %v2998_v25 }
 0x167   : > { %1338 = vst.msk [vmem:[#allocation2 + $0x70] sm:$0x3] %vm458_vm1, %v1284_v28  ;;  %v1291_v36 = vmul.f32 %v6383_v35, %v1108_v31  ;;  %v6806_v37 = vpack.c.bf16 %v2572_v33, %v2571_v32  ;;  %5586 = vmatprep.subr.bf16.mxu0 %v6836_v30  ;;  %v6397_v32 = vld [vmem:[%s6504_s17 + $0x118] sm:$0x3] }
 0x168   : > { %v1083_v38 = vpop.permute.xlu1 %1082 }
 0x169   : > { %1345 = vst.msk [vmem:[#allocation2 + $0xa8] sm:$0xff] %vm451_vm0, %v1291_v36  ;;  %v1286_v39 = vmul.f32 %v6384_v1, %v1083_v38  ;;  %5520 = vmatprep.mubr.msk.bf16.mxu0 %vm451_vm0, %v6806_v37  ;;  %v6398_v36 = vld [vmem:[%s6504_s17 + $0xf0] sm:$0xff] }
 0x16a   : > { %v1118_v40 = vpop.permute.xlu0 %1117  ;;  %v2573_v47 = vld [vmem:[#allocation2 + $0x61] sm:$0xff] }
 0x16b   : > { %1340 = vst.msk [vmem:[#allocation2 + $0x80] sm:$0xff] %vm451_vm0, %v1286_v39  ;;  %v1293_v42 = vmul.f32 %v6385_v41, %v1118_v40  ;;  %v6399_v41 = vld [vmem:[%s6504_s17 + $0x128] sm:$0xff] }
 0x16c   : > { %v1093_v43 = vpop.permute.xlu1 %1092 }
 0x16d   : > { %1347 = vst.msk [vmem:[#allocation2 + $0xb8] sm:$0x3] %vm458_vm1, %v1293_v42  ;;  %v1288_v45 = vmul.f32 %v6386_v44, %v1093_v43 }
 0x16e   : > { %v1128_v46 = vpop.permute.xlu0 %1127  ;;  %v2574_v49 = vld [vmem:[#allocation2 + $0x69] sm:$0xff] }
 0x16f   : > { %1342 = vst.msk [vmem:[#allocation2 + $0x90] sm:$0xff] %vm451_vm0, %v1288_v45  ;;  %v1295_v51 = vmul.f32 %v6387_v50, %v1128_v46  ;;  %v6818_v52 = vpack.c.bf16 %v2574_v49, %v2573_v47  ;;  %v6400_v45 = vld [vmem:[%s6504_s17 + $0x100] sm:$0x3] }
 0x170   : > { %v1103_v53 = vpop.permute.xlu1 %1102 }
 0x171   : > { %1349 = vst.msk [vmem:[#allocation2 + $0xc8] sm:$0xff] %vm451_vm0, %v1295_v51  ;;  %v1290_v56 = vmul.f32 %v6388_v54, %v1103_v53  ;;  %5521 = vmatmul.mubr.msk.bf16.gmra.mrb[4].mxu0 %vm451_vm0, %v6818_v52  ;;  %v6401_v51 = vld [vmem:[%s6504_s17 + $0x138] sm:$0xff] }
 0x172   : > { %v1138_v57 = vpop.permute.xlu0 %1137  ;;  %v2575_v58 = vld [vmem:[#allocation2 + $0x79] sm:$0xff]  ;;  %v2576_v59 = vld [vmem:[#allocation2 + $0x81] sm:$0xff] }
 0x173   : > { %1344 = vst.msk [vmem:[#allocation2 + $0xa0] sm:$0x3] %vm458_vm1, %v1290_v56  ;;  %v1297_v61 = vmul.f32 %v6389_v60, %v1138_v57  ;;  %v6826_v62 = vpack.c.bf16 %v2576_v59, %v2575_v58  ;;  %v6402_v57 = vld [vmem:[%s6504_s17 + $0x110] sm:$0xff]  ;;  %v6403_v60 = vld [vmem:[%s6504_s17 + $0x148] sm:$0x3] }
 0x174   : > { %v1113_v0 = vpop.permute.xlu1 %1112 }
 0x175   : > { %1351 = vst.msk [vmem:[#allocation2 + $0xd8] sm:$0xff] %vm451_vm0, %v1297_v61  ;;  %v1292_v3 = vmul.f32 %v6390_v2, %v1113_v0  ;;  %5524 = vmatprep.mubr.msk.bf16.mxu0 %vm451_vm0, %v6826_v62  ;;  %v6404_v2 = vld [vmem:[%s6504_s17 + $0x120] sm:$0xff] }
 0x176   : > { %v1148_v4 = vpop.permute.xlu0 %1147  ;;  %v2577_v12 = vld [vmem:[#allocation2 + $0x91] sm:$0xff] }
 0x177   : > { %1346 = vst.msk [vmem:[#allocation2 + $0xb0] sm:$0xff] %vm451_vm0, %v1292_v3  ;;  %v1299_v6 = vmul.f32 %v6391_v5, %v1148_v4 }
 0x178   : > { %v1123_v7 = vpop.permute.xlu1 %1122 }
 0x179   : > { %1353 = vst.msk [vmem:[#allocation2 + $0xe8] sm:$0x3] %vm458_vm1, %v1299_v6  ;;  %v1294_v9 = vmul.f32 %v6392_v8, %v1123_v7  ;;  %v6405_v7 = vld [vmem:[%s6504_s17 + $0x158] sm:$0xff] }
 0x17a   : > { %v1158_v11 = vpop.permute.xlu0 %1157  ;;  %v2578_v13 = vld [vmem:[#allocation2 + $0x99] sm:$0xff] }
 0x17b   : > { %1348 = vst.msk [vmem:[#allocation2 + $0xc0] sm:$0xff] %vm451_vm0, %v1294_v9  ;;  %v1301_v15 = vmul.f32 %v6393_v14, %v1158_v11  ;;  %v6850_v16 = vpack.c.bf16 %v2578_v13, %v2577_v12  ;;  %v6406_v12 = vld [vmem:[%s6504_s17 + $0x130] sm:$0x3] }
 0x17c   : > { %v1133_v17 = vpop.permute.xlu1 %1132 }
 0x17d   : > { %1355 = vst.msk [vmem:[#allocation2 + $0xf8] sm:$0xff] %vm451_vm0, %v1301_v15  ;;  %v1296_v19 = vmul.f32 %v6394_v18, %v1133_v17  ;;  %5525 = vmatmul.mubr.msk.bf16.gmra.mrb[8].mxu0 %vm451_vm0, %v6850_v16  ;;  %v6407_v18 = vld [vmem:[%s6504_s17 + $0x168] sm:$0xff] }
 0x17e   : > { %v1168_v20 = vpop.permute.xlu0 %1167  ;;  %v2579_v21 = vld [vmem:[#allocation2 + $0xa9] sm:$0xff]  ;;  %v2580_v22 = vld [vmem:[#allocation2 + $0xb1] sm:$0xff] }
 0x17f   : > { %1350 = vst.msk [vmem:[#allocation2 + $0xd0] sm:$0x3] %vm458_vm1, %v1296_v19  ;;  %v1303_v24 = vmul.f32 %v6395_v23, %v1168_v20  ;;  %v6858_v25 = vpack.c.bf16 %v2580_v22, %v2579_v21  ;;  %v6408_v22 = vld [vmem:[%s6504_s17 + $0x140] sm:$0xff] }
 0x180   : > { %v1143_v26 = vpop.permute.xlu1 %1142 }
 0x181   : > { %1357 = vst.msk [vmem:[#allocation2 + $0x108] sm:$0xff] %vm451_vm0, %v1303_v24  ;;  %v1298_v28 = vmul.f32 %v6396_v27, %v1143_v26  ;;  %5528 = vmatprep.mubr.msk.bf16.mxu0 %vm451_vm0, %v6858_v25  ;;  %v6409_v26 = vld [vmem:[%s6504_s17 + $0x178] sm:$0x3] }
 0x182   : > { %v1178_v31 = vpop.permute.xlu0 %1177  ;;  %v2581_v39 = vld [vmem:[#allocation2 + $0xc1] sm:$0xff] }
 0x183   : > { %1352 = vst.msk [vmem:[#allocation2 + $0xe0] sm:$0xff] %vm451_vm0, %v1298_v28  ;;  %v1305_v33 = vmul.f32 %v6397_v32, %v1178_v31  ;;  %v6410_v31 = vld [vmem:[%s6504_s17 + $0x150] sm:$0xff] }
 0x184   : > { %v1153_v35 = vpop.permute.xlu1 %1152 }
 0x185   : > { %1359 = vst.msk [vmem:[#allocation2 + $0x118] sm:$0x3] %vm458_vm1, %v1305_v33  ;;  %v1300_v38 = vmul.f32 %v6398_v36, %v1153_v35 }
 0x186   : > { %v1188_v1 = vpop.permute.xlu0 %1187  ;;  %v2582_v40 = vld [vmem:[#allocation2 + $0xc9] sm:$0xff] }
 0x187   : > { %1354 = vst.msk [vmem:[#allocation2 + $0xf0] sm:$0xff] %vm451_vm0, %v1300_v38  ;;  %v1307_v42 = vmul.f32 %v6399_v41, %v1188_v1  ;;  %v6870_v43 = vpack.c.bf16 %v2582_v40, %v2581_v39  ;;  %v6411_v38 = vld [vmem:[%s6504_s17 + $0x188] sm:$0xff]  ;;  %v6412_v41 = vld [vmem:[%s6504_s17 + $0x160] sm:$0x3] }
 0x188   : > { %v1163_v44 = vpop.permute.xlu1 %1162 }
 0x189   : > { %1361 = vst.msk [vmem:[#allocation2 + $0x128] sm:$0xff] %vm451_vm0, %v1307_v42  ;;  %v1302_v46 = vmul.f32 %v6400_v45, %v1163_v44  ;;  %5529 = vmatmul.mubr.msk.bf16.gmra.mrb[12].mxu0 %vm451_vm0, %v6870_v43 }
 0x18a   : > { %v1198_v47 = vpop.permute.xlu0 %1197  ;;  %v2583_v49 = vld [vmem:[#allocation2 + $0xd9] sm:$0xff]  ;;  %v2584_v50 = vld [vmem:[#allocation2 + $0xe1] sm:$0xff] }
 0x18b   : > { %1356 = vst.msk [vmem:[#allocation2 + $0x100] sm:$0x3] %vm458_vm1, %v1302_v46  ;;  %v1309_v53 = vmul.f32 %v6401_v51, %v1198_v47  ;;  %v6878_v54 = vpack.c.bf16 %v2584_v50, %v2583_v49  ;;  %v6413_v47 = vld [vmem:[%s6504_s17] sm:$0xff] }
 0x18c   : > { %v1173_v56 = vpop.permute.xlu1 %1172 }
 0x18d   : > { %1363 = vst.msk [vmem:[#allocation2 + $0x138] sm:$0xff] %vm451_vm0, %v1309_v53  ;;  %v1304_v58 = vmul.f32 %v6402_v57, %v1173_v56  ;;  %5532 = vmatprep.mubr.msk.bf16.mxu0 %vm451_vm0, %v6878_v54  ;;  %v6414_v53 = vld [vmem:[%s6504_s17 + $0x170] sm:$0xff] }
 0x18e   : > { %v1208_v59 = vpop.permute.xlu0 %1207  ;;  %v2585_v5 = vld [vmem:[#allocation2 + $0xf1] sm:$0xff] }
 0x18f   : > { %1358 = vst.msk [vmem:[#allocation2 + $0x110] sm:$0xff] %vm451_vm0, %v1304_v58  ;;  %v1311_v61 = vmul.f32 %v6403_v60, %v1208_v59  ;;  %v6415_v58 = vld [vmem:[%s6504_s17 + $0x10] sm:$0x3] }
 0x190   : > { %v1183_v0 = vpop.permute.xlu1 %1182 }
 0x191   : > { %1365 = vst.msk [vmem:[#allocation2 + $0x148] sm:$0x3] %vm458_vm1, %v1311_v61  ;;  %v1306_v3 = vmul.f32 %v6404_v2, %v1183_v0  ;;  %v6416_v61 = vld [vmem:[%s6504_s17 + $0x180] sm:$0xff] }
 0x192   : > { %v1218_v4 = vpop.permute.xlu0 %1217  ;;  %v2586_v6 = vld [vmem:[#allocation2 + $0xf9] sm:$0xff] }
 0x193   : > { %1360 = vst.msk [vmem:[#allocation2 + $0x120] sm:$0xff] %vm451_vm0, %v1306_v3  ;;  %v1313_v8 = vmul.f32 %v6405_v7, %v1218_v4  ;;  %v6890_v9 = vpack.c.bf16 %v2586_v6, %v2585_v5  ;;  %v6417_v6 = vld [vmem:[%s6504_s17 + $0x190] sm:$0x3] }
 0x194   : > { %v1193_v11 = vpop.permute.xlu1 %1192 }
 0x195   : > { %1367 = vst.msk [vmem:[#allocation2 + $0x158] sm:$0xff] %vm451_vm0, %v1313_v8  ;;  %v1308_v13 = vmul.f32 %v6406_v12, %v1193_v11  ;;  %5533 = vmatmul.mubr.msk.bf16.gmra.mrb[16].mxu0 %vm451_vm0, %v6890_v9 }
 0x196   : > { %v1228_v14 = vpop.permute.xlu0 %1227  ;;  %v2587_v15 = vld [vmem:[#allocation2 + $0x109] sm:$0xff]  ;;  %v2588_v17 = vld [vmem:[#allocation2 + $0x111] sm:$0xff] }
 0x197   : > { %1362 = vst.msk [vmem:[#allocation2 + $0x130] sm:$0x3] %vm458_vm1, %v1308_v13  ;;  %v1315_v19 = vmul.f32 %v6407_v18, %v1228_v14  ;;  %v6898_v20 = vpack.c.bf16 %v2588_v17, %v2587_v15  ;;  %v6418_v14 = vld [vmem:[%s6504_s17 + $0x8] sm:$0xff]  ;;  %v2880_v17 = vld [vmem:[#allocation2 + $0x1a] sm:$0xff] }
 0x198   : > { %v1203_v21 = vpop.permute.xlu1 %1202  ;;  %v2881_v18 = vld [vmem:[#allocation2 + $0x22] sm:$0xff] }
 0x199   : > { %1369 = vst.msk [vmem:[#allocation2 + $0x168] sm:$0xff] %vm451_vm0, %v1315_v19  ;;  %v1310_v23 = vmul.f32 %v6408_v22, %v1203_v21  ;;  %5536 = vmatprep.mubr.msk.bf16.mxu0 %vm451_vm0, %v6898_v20 }
 0x19a   : > { %v1238_v24 = vpop.permute.xlu0 %1237  ;;  %v2589_v35 = vld [vmem:[#allocation2 + $0x121] sm:$0xff] }
 0x19b   : > { %1364 = vst.msk [vmem:[#allocation2 + $0x140] sm:$0xff] %vm451_vm0, %v1310_v23  ;;  %v1317_v27 = vmul.f32 %v6409_v26, %v1238_v24  ;;  %v6941_v23 = vpack.c.bf16 %v2881_v18, %v2880_v17 }
 0x19c   : > { %v1213_v28 = vpop.permute.xlu1 %1212 }
 0x19d   : > { %1371 = vst.msk [vmem:[#allocation2 + $0x178] sm:$0x3] %vm458_vm1, %v1317_v27  ;;  %v1312_v32 = vmul.f32 %v6410_v31, %v1213_v28  ;;  %v2883_v28 = vld [vmem:[#allocation2 + $0x3a] sm:$0xff]  ;;  %v6133_v31 = vld [vmem:[%s7982_s3 + $0x8] sm:$0xff]  }
 0x19e   : > { %v1248_v33 = vpop.permute.xlu0 %1247  ;;  %v2590_v36 = vld [vmem:[#allocation2 + $0x129] sm:$0xff] }
 0x19f   : > { %1366 = vst.msk [vmem:[#allocation2 + $0x150] sm:$0xff] %vm451_vm0, %v1312_v32  ;;  %v1319_v1 = vmul.f32 %v6411_v38, %v1248_v33  ;;  %v6910_v39 = vpack.c.bf16 %v2590_v36, %v2589_v35  ;;  %v2885_v32 = vld [vmem:[#allocation2 + $0x52] sm:$0xff]  ;;  %v2884_v36 = vld [vmem:[#allocation2 + $0x4a] sm:$0xff]  ;;  %v6134_v38 = vld [vmem:[%s7982_s3 + $0x80] sm:$0xff]  }
 0x1a0   : > { %v1223_v40 = vpop.permute.xlu1 %1222  ;;  %v2882_v33 = vld [vmem:[#allocation2 + $0x32] sm:$0xff] }
 0x1a1   : > { %1373 = vst.msk [vmem:[#allocation2 + $0x188] sm:$0xff] %vm451_vm0, %v1319_v1  ;;  %v1314_v42 = vmul.f32 %v6412_v41, %v1223_v40  ;;  %5537 = vmatmul.mubr.msk.bf16.gmra.mrb[20].mxu0 %vm451_vm0, %v6910_v39  ;;  %v6954_v35 = vpack.c.bf16 %v2883_v28, %v2882_v33  ;;  %v6960_v1 = vpack.c.bf16 %v2885_v32, %v2884_v36  ;;  %v6978_v41 = vld [vmem:[%s7982_s3 + $0x28] sm:$0xff]  }
 0x1a2   : > { %v1003_v44 = vpop.permute.xlu0 %1002  ;;  %v2591_v45 = vld [vmem:[#allocation2 + $0x139] sm:$0xff]  ;;  %v2592_v46 = vld [vmem:[#allocation2 + $0x141] sm:$0xff] }
 0x1a3   : > { %1368 = vst.msk [vmem:[#allocation2 + $0x160] sm:$0x3] %vm458_vm1, %v1314_v42  ;;  %v1270_v49 = vmul.f32 %v6413_v47, %v1003_v44  ;;  %v6918_v50 = vpack.c.bf16 %v2592_v46, %v2591_v45  ;;  %v2888_v42 = vld [vmem:[#allocation2 + $0x7a] sm:$0xff]  ;;  %v2889_v44 = vld [vmem:[#allocation2 + $0x82] sm:$0xff] }
 0x1a4   : > { %v1233_v51 = vpop.permute.xlu1 %1232  ;;  %v6987_v47 = vpack.c.bf16 %v2889_v44, %v2888_v42 }
 0x1a5   : > { %1324 = vst.msk [vmem:[#allocation2] sm:$0xff] %vm451_vm0, %v1270_v49  ;;  %v1316_v56 = vmul.f32 %v6414_v53, %v1233_v51  ;;  %5540 = vmatprep.mubr.msk.bf16.mxu0 %vm451_vm0, %v6918_v50  ;;  %v2893_v49 = vld [vmem:[#allocation2 + $0xb2] sm:$0xff] }
 0x1a6   : > { %v1013_v57 = vpop.permute.xlu0 %1012  ;;  %v2593_v2 = vld [vmem:[#allocation2 + $0x151] sm:$0xff] }
 0x1a7   : > { %1370 = vst.msk [vmem:[#allocation2 + $0x170] sm:$0xff] %vm451_vm0, %v1316_v56  ;;  %v1272_v59 = vmul.f32 %v6415_v58, %v1013_v57  ;;  %v2890_v51 = vld [vmem:[#allocation2 + $0x92] sm:$0xff]  ;;  %v6419_v58 = vld [vmem:[#allocation3] ss:$0 sm:$0xff] }
 0x1a8   : > { %v1243_v60 = vpop.permute.xlu1 %1242  ;;  %v7004_v56 = vld [vmem:[%s7982_s3 + $0x8c] sm:$0xff]  }
 0x1a9   : > { %1326 = vst.msk [vmem:[#allocation2 + $0x10] sm:$0x3] %vm458_vm1, %v1272_v59  ;;  %v1318_v0 = vmul.f32 %v6416_v61, %v1243_v60  ;;  %v2895_v59 = vld [vmem:[#allocation2 + $0xca] sm:$0xff]  ;;  %v2896_v60 = vld [vmem:[#allocation2 + $0xda] sm:$0xff]  ;;  %v2897_v61 = vld [vmem:[#allocation2 + $0xe2] sm:$0xff] }
 0x1aa   : > { %v2594_v3 = vld [vmem:[#allocation2 + $0x159] sm:$0xff] }
 0x1ab   : > { %1372 = vst.msk [vmem:[#allocation2 + $0x180] sm:$0xff] %vm451_vm0, %v1318_v0  ;;  %v6929_v4 = vpack.c.bf16 %v2594_v3, %v2593_v2  ;;  %v2894_v2 = vld [vmem:[#allocation2 + $0xc2] sm:$0xff] }
 0x1ac   : > { %v1253_v5 = vpop.permute.xlu1 %1252  ;;  %v7017_v3 = vpack.c.bf16 %v2895_v59, %v2894_v2  ;;  %v1378_v42 = vld [vmem:[#allocation2] sm:$0xff]  ;;  %v3199_v59 = vld [vmem:[#allocation2 + $0x68] sm:$0xff] }
 0x1ad   : > { %v1320_v7 = vmul.f32 %v6417_v6, %v1253_v5  ;;  %5541 = vmatmul.mubr.msk.bf16.gmra.mrb[24].mxu0 %vm451_vm0, %v6929_v4  ;;  %v7019_v5 = vpack.c.bf16 %v2897_v61, %v2896_v60  ;;  %v6138_v60 = vld [vmem:[%s7982_s3 + $0x30] sm:$0xff]  }
 0x1ae   : > { %v2595_v8 = vld [vmem:[#allocation2 + $0x169] sm:$0xff]  ;;  %v2596_v11 = vld [vmem:[#allocation2 + $0x171] sm:$0xff] }
 0x1af   : > { %1374 = vst.msk [vmem:[#allocation2 + $0x190] sm:$0x3] %vm458_vm1, %v1320_v7  ;;  %v6935_v12 = vpack.c.bf16 %v2596_v11, %v2595_v8  ;;  %v2899_v7 = vld [vmem:[#allocation2 + $0xfa] sm:$0xff]  ;;  %v2900_v11 = vld [vmem:[#allocation2 + $0x10a] sm:$0xff]  ;;  %v2909_v33 = vld [vmem:[#allocation2 + $0x172] sm:$0xff] }
 0x1b0   : > { %v1008_v13 = vpop.permute.xlu1 %1007  ;;  %v2908_v32 = vld [vmem:[#allocation2 + $0x16a] sm:$0xff] }
 0x1b1   : > { %v1271_v15 = vmul.f32 %v6418_v14, %v1008_v13  ;;  %5544 = vmatprep.mubr.msk.bf16.mxu0 %vm451_vm0, %v6935_v12 }
 0x1b2   : > { %v2597_v19 = vld [vmem:[#allocation2 + $0x181] sm:$0xff] }
 0x1b3   : > { %1325 = vst.msk [vmem:[#allocation2 + $0x8] sm:$0xff] %vm451_vm0, %v1271_v15 }
 0x1b6   : > { %v2598_v21 = vld [vmem:[#allocation2 + $0x189] sm:$0xff] }
 0x1b7   : > { %v2614_v22 = vpack.c.bf16 %v2598_v21, %v2597_v19  ;;  %v2911_v44 = vld [vmem:[#allocation2 + $0x18a] sm:$0xff] }
 0x1b9   : > { %5545 = vmatmul.mubr.msk.bf16.gmra.mrb[28].mxu0 %vm451_vm0, %v2614_v22 }
 0x1ba   : > { %5554 = vmatprep.mubr.msk.bf16.mxu0 %vm451_vm0, %v6941_v23  ;;  %v1431_v24 = vld [vmem:[#allocation2 + $0x1] sm:$0xff]  ;;  %v1432_v26 = vld [vmem:[#allocation2 + $0x9] sm:$0xff] }
 0x1bb   : > { %v1463_v27 = vpack.c.bf16 %v1432_v26, %v1431_v24  ;;  %v2905_v24 = vld [vmem:[#allocation2 + $0x142] sm:$0xff] }
 0x1bc   : > { %v2902_v26 = vld [vmem:[#allocation2 + $0x122] sm:$0xff] }
 0x1bd   : > { %5364 = vmatprep.mubr.msk.bf16.mxu1 %vm451_vm0, %v1463_v27 }
 0x1be   : > { %5365 = vmatmul.mubr.msk.bf16.vlgmr.msra.gmra.mrb[0].mxu1 %vm451_vm0, %v6767_v55  ;;  %v6135_v55 = vld [vmem:[%s7982_s3 + $0x10] ss:$0 sps:$4 sm:$0xff]  }
 0x1bf   : > { %5368 = vmatprep.mubr.msk.bf16.mxu1 %vm451_vm0, %v6782_v10  ;;  %5397 = vmatpush3.bf16.msra.mxu1 %v6831_v63  ;;  %v6136_v10 = vld [vmem:[%s7982_s3 + $0x88] ss:$0 sps:$4 sm:$0xff]   ;;  %v2887_v63 = vld [vmem:[#allocation2 + $0x6a] sm:$0xff]  ;;  %v1777_v40 = vsel %vm1548_vm2, %v6135_v55, 0 }
 0x1c0   : > { %5398 = vmatprep.subr.bf16.mxu1 %v6133_v31  ;;  %v3312_v46 = vsel %vm1548_vm2, %v6136_v10, 0 }
 0x1c1   : > { %5555 = vmatmul.mubr.msk.bf16.vlgmr.msra.gmra.mrb[0].mxu0 %vm451_vm0, %v6954_v35 }
 0x1c2   : > { %5558 = vmatprep.mubr.msk.bf16.mxu0 %vm451_vm0, %v6960_v1  ;;  %5587 = vmatpush3.bf16.msra.mxu0 %v6836_v30  ;;  %v2886_v30 = vld [vmem:[#allocation2 + $0x62] sm:$0xff] }
 0x1c3   : > { %5399 = vmatpush3.bf16.msra.mxu1 %v6133_v31  ;;  %5588 = vmatprep.subr.bf16.mxu0 %v6134_v38  ;;  %v6984_v45 = vpack.c.bf16 %v2887_v63, %v2886_v30  ;;  %v2907_v31 = vld [vmem:[#allocation2 + $0x15a] sm:$0xff] }
 0x1c4   : > { %6099 = vmatprep.subr.msk.bf16.mxu1 %vm1548_vm2, %v6135_v55  ;;  %v7055_v55 = vpack.c.bf16 %v2909_v33, %v2908_v32  ;;  %v7131_v32 = vld [vmem:[%s7982_s3 + $0xa0] sm:$0xff]  }
 0x1c6   : > { %5369 = vmatmul.mubr.msk.bf16.gmra.mrb[4].mxu1 %vm451_vm0, %v6806_v37  ;;  %5589 = vmatpush3.bf16.msra.mxu0 %v6134_v38  ;;  %v2891_v37 = vld [vmem:[#allocation2 + $0x9a] sm:$0xff] }
 0x1c7   : > { %5372 = vmatprep.mubr.msk.bf16.mxu1 %vm451_vm0, %v6818_v52  ;;  %5401 = vmatpush3.bf16.msra.mxu1 %v1777_v40  ;;  %v2892_v52 = vld [vmem:[#allocation2 + $0xaa] sm:$0xff]  ;;  %v6999_v53 = vpack.c.bf16 %v2891_v37, %v2890_v51  ;;  %v1381_v51 = vld [vmem:[#allocation2 + $0x20] sm:$0xff] }
 0x1c8   : > { %6104 = vmatprep.subr.msk.bf16.mxu0 %vm1548_vm2, %v6136_v10  ;;  %5434 = vmatprep.subr.bf16.mxu1 %v6978_v41  ;;  %v7006_v57 = vpack.c.bf16 %v2893_v49, %v2892_v52  ;;  %v3194_v52 = vld [vmem:[#allocation2 + $0x30] sm:$0xff] }
 0x1c9   : > { %5559 = vmatmul.mubr.msk.bf16.gmra.mrb[4].mxu0 %vm451_vm0, %v6984_v45 }
 0x1ca   : > { %5562 = vmatprep.mubr.msk.bf16.mxu0 %vm451_vm0, %v6987_v47  ;;  %5591 = vmatpush3.bf16.msra.mxu0 %v3312_v46  ;;  %v2910_v46 = vld [vmem:[#allocation2 + $0x182] sm:$0xff] }
 0x1cb   : > { %5624 = vmatprep.subr.bf16.mxu0 %v7004_v56  ;;  %v7064_v37 = vpack.c.bf16 %v2911_v44, %v2910_v46  ;;  %v3212_v44 = vld [vmem:[#allocation2 + $0x108] sm:$0xff] }
 0x1ce   : > { %5373 = vmatmul.mubr.msk.bf16.gmra.mrb[8].mxu1 %vm451_vm0, %v6826_v62 }
 0x1cf   : > { %5376 = vmatprep.mubr.msk.bf16.mxu1 %vm451_vm0, %v6850_v16 }
 0x1d1   : > { %5563 = vmatmul.mubr.msk.bf16.gmra.mrb[8].mxu0 %vm451_vm0, %v6999_v53 }
 0x1d2   : > { %5566 = vmatprep.mubr.msk.bf16.mxu0 %vm451_vm0, %v7006_v57 }
 0x1d3   : > { %v611_v62 = vpop.xlane.xlu0 %610 }
 0x1d4   : > { %v674_v16 = vadd.f32 %v6419_v58, %v611_v62  ;;  %v1380_v62 = vld [vmem:[#allocation2 + $0x18] sm:$0xff] }
 0x1d6   : > { %v4922_v0 = vmul.f32 -1.442695, %v674_v16  ;;  %5377 = vmatmul.mubr.msk.bf16.gmra.mrb[12].mxu1 %vm451_vm0, %v6858_v25  ;;  %v2901_v25 = vld [vmem:[#allocation2 + $0x112] sm:$0xff] }
 0x1d7   : > { %5380 = vmatprep.mubr.msk.bf16.mxu1 %vm451_vm0, %v6870_v43  ;;  %v614_v6 = vpop.xlane.xlu0 %613  ;;  %v2898_v43 = vld [vmem:[#allocation2 + $0xf2] sm:$0xff]  ;;  %v7031_v14 = vpack.c.bf16 %v2901_v25, %v2900_v11  ;;  %v6145_v25 = vld [vmem:[%s7982_s3 + $0x9c] ss:$0 sps:$4 sm:$0xff]  }
 0x1d8   : > { %6353 = vpow2.f32 %v4922_v0  ;;  %v675_v8 = vadd.f32 %v6419_v58, %v614_v6  ;;  %v7029_v13 = vpack.c.bf16 %v2899_v7, %v2898_v43  ;;  %v3197_v16 = vld [vmem:[#allocation2 + $0x50] sm:$0xff]  ;;  %v3196_v0 = vld [vmem:[#allocation2 + $0x48] sm:$0xff]  ;;  %v6139_v11 = vld [vmem:[%s7982_s3 + $0x38] ss:$0 sps:$4 sm:$0xff]  }
 0x1d9   : > { %5567 = vmatmul.mubr.msk.bf16.gmra.mrb[12].mxu0 %vm451_vm0, %v7017_v3  ;;  %v7081_v2 = vpack.c.bf16 %v3197_v16, %v3196_v0  ;;  %v6141_v6 = vld [vmem:[%s7982_s3 + $0x94] sm:$0xff]   ;;  %v3220_v0 = vld [vmem:[#allocation2 + $0x168] sm:$0xff] }
 0x1da   : > { %5570 = vmatprep.mubr.msk.bf16.mxu0 %vm451_vm0, %v7019_v5  ;;  %v4923_v15 = vmul.f32 -1.442695, %v675_v8  ;;  %v3202_v43 = vld [vmem:[#allocation2 + $0x90] sm:$0xff] }
 0x1dc   : > { %6355 = vpow2.f32 %v4923_v15  ;;  %v2058_v15 = vsel %vm1548_vm2, %v6139_v11, 0 }
 0x1de   : > { %5381 = vmatmul.mubr.msk.bf16.gmra.mrb[16].mxu1 %vm451_vm0, %v6878_v54  ;;  %v2903_v54 = vld [vmem:[#allocation2 + $0x12a] sm:$0xff] }
 0x1df   : > { %5384 = vmatprep.mubr.msk.bf16.mxu1 %vm451_vm0, %v6890_v9  ;;  %v2904_v9 = vld [vmem:[#allocation2 + $0x13a] sm:$0xff]  ;;  %v7041_v27 = vpack.c.bf16 %v2903_v54, %v2902_v26 }
 0x1e0   : > { %v7043_v28 = vpack.c.bf16 %v2905_v24, %v2904_v9  ;;  %v3206_v9 = vld [vmem:[#allocation2 + $0xc0] sm:$0xff]  ;;  %v3204_v24 = vld [vmem:[#allocation2 + $0xa8] sm:$0xff] }
 0x1e1   : > { %5571 = vmatmul.mubr.msk.bf16.gmra.mrb[16].mxu0 %vm451_vm0, %v7029_v13 }
 0x1e2   : > { %v6354_v17 = vpop.eup %6353  ;;  %v608_v18 = vpop.xlane.xlu1 %607  ;;  %5574 = vmatprep.mubr.msk.bf16.mxu0 %vm451_vm0, %v7031_v14 }
 0x1e3   : > { %v890_v19 = vadd.f32 1.0, %v6354_v17  ;;  %v673_v21 = vadd.f32 %v6419_v58, %v608_v18  ;;  %v7072_v58 = vpack.c.bf16 %v1381_v51, %v1380_v62  ;;  %v7105_v17 = vld [vmem:[%s7982_s3 + $0x3c] sm:$0xff]   ;;  %v3218_v51 = vld [vmem:[#allocation2 + $0x150] sm:$0xff] }
 0x1e4   : > { %v3216_v62 = vld [vmem:[#allocation2 + $0x138] sm:$0xff] }
 0x1e5   : > { %6357 = vrcp.f32 %v890_v19  ;;  %v4921_v22 = vmul.f32 -1.442695, %v673_v21  ;;  %v3203_v19 = vld [vmem:[#allocation2 + $0x98] sm:$0xff]  ;;  %v3625_v21 = vsel %vm1548_vm2, %v6145_v25, 0 }
 0x1e6   : > { %5385 = vmatmul.mubr.msk.bf16.gmra.mrb[20].mxu1 %vm451_vm0, %v6898_v20  ;;  %v6356_v36 = vpop.eup %6355  ;;  %v2906_v20 = vld [vmem:[#allocation2 + $0x152] sm:$0xff]  ;;  %v7115_v54 = vpack.c.bf16 %v3203_v19, %v3202_v43 }
 0x1e7   : > { %6359 = vpow2.f32 %v4921_v22  ;;  %5388 = vmatprep.mubr.msk.bf16.mxu1 %vm451_vm0, %v6910_v39  ;;  %v7053_v39 = vpack.c.bf16 %v2907_v31, %v2906_v20  ;;  %v891_v40 = vadd.f32 1.0, %v6356_v36  ;;  %v3205_v22 = vld [vmem:[#allocation2 + $0xb0] sm:$0xff]  ;;  %v3207_v31 = vld [vmem:[#allocation2 + $0xc8] sm:$0xff]  ;;  %v3209_v36 = vld [vmem:[#allocation2 + $0xe0] sm:$0xff] }
 0x1e8   : > { %v7126_v26 = vpack.c.bf16 %v3205_v22, %v3204_v24  ;;  %v7133_v33 = vpack.c.bf16 %v3207_v31, %v3206_v9  ;;  %v3210_v20 = vld [vmem:[#allocation2 + $0xf0] sm:$0xff]  ;;  %v3514_v22 = vld [vmem:[#allocation2 + $0x81] sm:$0xff]  ;;  %v3516_v9 = vld [vmem:[#allocation2 + $0x99] sm:$0xff] }
 0x1e9   : > { %5575 = vmatmul.mubr.msk.bf16.gmra.mrb[20].mxu0 %vm451_vm0, %v7041_v27 }
 0x1ea   : > { %5578 = vmatprep.mubr.msk.bf16.mxu0 %vm451_vm0, %v7043_v28 }
 0x1ee   : > { %5389 = vmatmul.mubr.msk.bf16.gmra.mrb[24].mxu1 %vm451_vm0, %v6918_v50  ;;  %v1379_v50 = vld [vmem:[#allocation2 + $0x8] sm:$0xff] }
 0x1ef   : > { %v6358_v38 = vpop.eup %6357  ;;  %5392 = vmatprep.mubr.msk.bf16.mxu1 %vm451_vm0, %v6929_v4  ;;  %v1410_v30 = vpack.c.bf16 %v1379_v50, %v1378_v42  ;;  %v3195_v4 = vld [vmem:[#allocation2 + $0x38] sm:$0xff]  ;;  %v3213_v50 = vld [vmem:[#allocation2 + $0x110] sm:$0xff]  ;;  %v3214_v42 = vld [vmem:[#allocation2 + $0x120] sm:$0xff] }
 0x1f0   : > { %1262 = vperm.xlu0 %6121, %v6358_v38   ;;  %v7066_v49 = vpack.c.bf16 %v3195_v4, %v3194_v52  ;;  %v3208_v38 = vld [vmem:[#allocation2 + $0xd8] sm:$0xff]  ;;  %v3215_v4 = vld [vmem:[#allocation2 + $0x128] sm:$0xff]  ;;  %v3217_v52 = vld [vmem:[#allocation2 + $0x140] sm:$0xff] }
 0x1f1   : > { %v6360_v10 = vpop.eup %6359  ;;  %5579 = vmatmul.mubr.msk.bf16.gmra.mrb[24].mxu0 %vm451_vm0, %v7053_v39  ;;  %v7158_v46 = vpack.c.bf16 %v3215_v4, %v3214_v42  ;;  %v7168_v16 = vpack.c.bf16 %v3217_v52, %v3216_v62  ;;  %v3522_v42 = vld [vmem:[#allocation2 + $0xe1] sm:$0xff]  ;;  %v3523_v4 = vld [vmem:[#allocation2 + $0xf1] sm:$0xff]  ;;  %v3525_v52 = vld [vmem:[#allocation2 + $0x109] sm:$0xff] }
 0x1f2   : > { %v889_v63 = vadd.f32 1.0, %v6360_v10  ;;  %5582 = vmatprep.mubr.msk.bf16.mxu0 %vm451_vm0, %v7055_v55  ;;  %v7144_v10 = vpack.c.bf16 %v3209_v36, %v3208_v38  ;;  %v3518_v36 = vld [vmem:[#allocation2 + $0xb1] sm:$0xff] }
 0x1f4   : > { %6361 = vrcp.f32 %v889_v63  ;;  %v3211_v63 = vld [vmem:[#allocation2 + $0xf8] sm:$0xff] }
 0x1f5   : > { %6363 = vrcp.f32 %v891_v40  ;;  %v7146_v40 = vpack.c.bf16 %v3211_v63, %v3210_v20  ;;  %v3520_v20 = vld [vmem:[#allocation2 + $0xc9] sm:$0xff] }
 0x1f6   : > { %5393 = vmatmul.mubr.msk.bf16.gmra.mrb[28].mxu1 %vm451_vm0, %v6935_v12  ;;  %v3198_v12 = vld [vmem:[#allocation2 + $0x60] sm:$0xff] }
 0x1f7   : > { %5402 = vmatprep.mubr.msk.bf16.mxu1 %vm451_vm0, %v1410_v30  ;;  %v7086_v8 = vpack.c.bf16 %v3199_v59, %v3198_v12  ;;  %v7156_v30 = vpack.c.bf16 %v3213_v50, %v3212_v44  ;;  %v3219_v12 = vld [vmem:[#allocation2 + $0x158] sm:$0xff] }
 0x1f8   : > { %v7170_v59 = vpack.c.bf16 %v3219_v12, %v3218_v51  ;;  %v3521_v50 = vld [vmem:[#allocation2 + $0xd9] sm:$0xff]  ;;  %v3526_v51 = vld [vmem:[#allocation2 + $0x111] sm:$0xff]  ;;  %v3527_v12 = vld [vmem:[#allocation2 + $0x121] sm:$0xff] }
 0x1f9   : > { %5583 = vmatmul.mubr.msk.bf16.gmra.mrb[28].mxu0 %vm451_vm0, %v7064_v37  ;;  %v3546_v44 = vpack.c.bf16 %v3522_v42, %v3521_v50  ;;  %v3548_v62 = vpack.c.bf16 %v3526_v51, %v3525_v52  ;;  %v4213_v50 = vld [vmem:[%s7986_s7 + $0x20] sm:$0xff]  ;;  %v4214_v42 = vld [vmem:[%s7986_s7 + $0x28] sm:$0xff]  ;;  %v4215_v51 = vld [vmem:[%s7986_s7 + $0x30] sm:$0xff] }
 0x1fa   : > { %5592 = vmatprep.mubr.msk.bf16.mxu0 %vm451_vm0, %v7066_v49 }
 0x1fe   : > { %v6362_v61 = vpop.eup %6361  ;;  %5403 = vmatmul.mubr.msk.bf16.vlgmr.msra.gmra.mrb[0].mxu1 %vm451_vm0, %v7072_v58 }
 0x1ff   : > { %1257 = vperm.xlu1 %6120, %v6362_v61   ;;  %5406 = vmatprep.mubr.msk.bf16.mxu1 %vm451_vm0, %v7066_v49  ;;  %v6364_v7 = vpop.eup %6363  ;;  %v3222_v61 = vld [vmem:[#allocation2 + $0x180] sm:$0xff] }
 0x200   : > { %5435 = vmatpush3.bf16.msra.mxu1 %v6978_v41  ;;  %v3201_v41 = vld [vmem:[#allocation2 + $0x80] sm:$0xff] }
 0x201   : > { %5593 = vmatmul.mubr.msk.bf16.vlgmr.msra.gmra.mrb[0].mxu0 %vm451_vm0, %v7081_v2  ;;  %5436 = vmatprep.subr.bf16.mxu1 %v6138_v60 }
 0x202   : > { %5596 = vmatprep.mubr.msk.bf16.mxu0 %vm451_vm0, %v7086_v8  ;;  %5625 = vmatpush3.bf16.msra.mxu0 %v7004_v56  ;;  %v3200_v56 = vld [vmem:[#allocation2 + $0x78] sm:$0xff] }
 0x203   : > { %1267 = vperm.xlu1 %6120, %v6364_v7   ;;  %5626 = vmatprep.subr.bf16.mxu0 %v6141_v6  ;;  %v7111_v18 = vpack.c.bf16 %v3201_v41, %v3200_v56  ;;  %v3223_v7 = vld [vmem:[#allocation2 + $0x188] sm:$0xff] }
 0x204   : > { %5437 = vmatpush3.bf16.msra.mxu1 %v6138_v60  ;;  %v3221_v60 = vld [vmem:[#allocation2 + $0x170] sm:$0xff]  ;;  %v6144_v56 = vld [vmem:[%s7982_s3 + $0x4c] ss:$0 sps:$4 sm:$0xff]  }
 0x205   : > { %6100 = vmatprep.subr.msk.bf16.mxu1 %vm1548_vm2, %v6139_v11  ;;  %v7182_v11 = vpack.c.bf16 %v3223_v7, %v3222_v61  ;;  %v1941_v41 = vld [vmem:[#allocation2 + $0xa] sm:$0xff]  ;;  %v2372_v19 = vsel %vm1548_vm2, %v6144_v56, 0  ;;  %v3530_v61 = vld [vmem:[#allocation2 + $0x141] sm:$0xff] }
 0x206   : > { %5407 = vmatmul.mubr.msk.bf16.gmra.mrb[4].mxu1 %vm451_vm0, %v7081_v2  ;;  %5627 = vmatpush3.bf16.msra.mxu0 %v6141_v6  ;;  %v7180_v6 = vpack.c.bf16 %v3221_v60, %v3220_v0  ;;  %v3529_v60 = vld [vmem:[#allocation2 + $0x139] sm:$0xff]  ;;  %v3531_v7 = vld [vmem:[#allocation2 + $0x151] sm:$0xff] }
 0x207   : > { %5410 = vmatprep.mubr.msk.bf16.mxu1 %vm451_vm0, %v7086_v8  ;;  %6105 = vmatprep.subr.msk.bf16.mxu0 %vm1548_vm2, %v6145_v25  ;;  %v1940_v25 = vld [vmem:[#allocation2 + $0x2] sm:$0xff]  ;;  %v3532_v0 = vld [vmem:[#allocation2 + $0x159] sm:$0xff] }
 0x208   : > { %5439 = vmatpush3.bf16.msra.mxu1 %v2058_v15  ;;  %v1972_v43 = vpack.c.bf16 %v1941_v41, %v1940_v25  ;;  %v6143_v15 = vld [vmem:[%s7982_s3 + $0x44] sm:$0xff]   ;;  %v3551_v25 = vpack.c.bf16 %v3532_v0, %v3531_v7  ;;  %v3534_v41 = vld [vmem:[#allocation2 + $0x171] sm:$0xff] }
 0x209   : > { %5597 = vmatmul.mubr.msk.bf16.gmra.mrb[4].mxu0 %vm451_vm0, %v7111_v18  ;;  %5472 = vmatprep.subr.bf16.mxu1 %v7105_v17  ;;  %v4217_v0 = vld [vmem:[%s7986_s7 + $0x40] sm:$0xff] }
 0x20a   : > { %5600 = vmatprep.mubr.msk.bf16.mxu0 %vm451_vm0, %v7115_v54  ;;  %5629 = vmatpush3.bf16.msra.mxu0 %v3625_v21  ;;  %v6148_v21 = vld [vmem:[%s7982_s3 + $0xb0] ss:$0 sps:$4 sm:$0xff]  }
 0x20b   : > { %5662 = vmatprep.subr.bf16.mxu0 %v7131_v32  ;;  %v3938_v31 = vsel %vm1548_vm2, %v6148_v21, 0 }
 0x20e   : > { %5411 = vmatmul.mubr.msk.bf16.gmra.mrb[8].mxu1 %vm451_vm0, %v7111_v18 }
 0x20f   : > { %5414 = vmatprep.mubr.msk.bf16.mxu1 %vm451_vm0, %v7115_v54 }
 0x211   : > { %5601 = vmatmul.mubr.msk.bf16.gmra.mrb[8].mxu0 %vm451_vm0, %v7126_v26 }
 0x212   : > { %5604 = vmatprep.mubr.msk.bf16.mxu0 %vm451_vm0, %v7133_v33 }
 0x216   : > { %5415 = vmatmul.mubr.msk.bf16.gmra.mrb[12].mxu1 %vm451_vm0, %v7126_v26 }
 0x217   : > { %5418 = vmatprep.mubr.msk.bf16.mxu1 %vm451_vm0, %v7133_v33 }
 0x219   : > { %5605 = vmatmul.mubr.msk.bf16.gmra.mrb[12].mxu0 %vm451_vm0, %v7144_v10 }
 0x21a   : > { %5608 = vmatprep.mubr.msk.bf16.mxu0 %vm451_vm0, %v7146_v40 }
 0x21e   : > { %5419 = vmatmul.mubr.msk.bf16.gmra.mrb[16].mxu1 %vm451_vm0, %v7144_v10 }
 0x21f   : > { %5422 = vmatprep.mubr.msk.bf16.mxu1 %vm451_vm0, %v7146_v40 }
 0x221   : > { %5609 = vmatmul.mubr.msk.bf16.gmra.mrb[16].mxu0 %vm451_vm0, %v7156_v30 }
 0x222   : > { %5612 = vmatprep.mubr.msk.bf16.mxu0 %vm451_vm0, %v7158_v46 }
 0x226   : > { %5423 = vmatmul.mubr.msk.bf16.gmra.mrb[20].mxu1 %vm451_vm0, %v7156_v30 }
 0x227   : > { %5426 = vmatprep.mubr.msk.bf16.mxu1 %vm451_vm0, %v7158_v46 }
 0x229   : > { %5613 = vmatmul.mubr.msk.bf16.gmra.mrb[20].mxu0 %vm451_vm0, %v7168_v16 }
 0x22a   : > { %5616 = vmatprep.mubr.msk.bf16.mxu0 %vm451_vm0, %v7170_v59 }
 0x22e   : > { %5427 = vmatmul.mubr.msk.bf16.gmra.mrb[24].mxu1 %vm451_vm0, %v7168_v16 }
 0x22f   : > { %5430 = vmatprep.mubr.msk.bf16.mxu1 %vm451_vm0, %v7170_v59 }
 0x231   : > { %5617 = vmatmul.mubr.msk.bf16.gmra.mrb[24].mxu0 %vm451_vm0, %v7180_v6 }
 0x232   : > { %5620 = vmatprep.mubr.msk.bf16.mxu0 %vm451_vm0, %v7182_v11 }
 0x236   : > { %5431 = vmatmul.mubr.msk.bf16.gmra.mrb[28].mxu1 %vm451_vm0, %v7180_v6 }
 0x237   : > { %5440 = vmatprep.mubr.msk.bf16.mxu1 %vm451_vm0, %v1972_v43  ;;  %v3536_v43 = vld [vmem:[#allocation2 + $0x189] sm:$0xff] }
 0x23e   : > { %5441 = vmatmul.mubr.msk.bf16.vlgmr.msra.gmra.mrb[0].mxu1 %vm451_vm0, %v6941_v23 }
 0x23f   : > { %5444 = vmatprep.mubr.msk.bf16.mxu1 %vm451_vm0, %v6954_v35  ;;  %5473 = vmatpush3.bf16.msra.mxu1 %v7105_v17  ;;  %v6147_v17 = vld [vmem:[%s7982_s3 + $0xa8] sm:$0xff]  }
 0x240   : > { %5474 = vmatprep.subr.bf16.mxu1 %v6143_v15 }
 0x243   : > { %5475 = vmatpush3.bf16.msra.mxu1 %v6143_v15 }
 0x244   : > { %6101 = vmatprep.subr.msk.bf16.mxu1 %vm1548_vm2, %v6144_v56  ;;  %v3535_v56 = vld [vmem:[#allocation2 + $0x181] sm:$0xff] }
 0x246   : > { %5445 = vmatmul.mubr.msk.bf16.gmra.mrb[4].mxu1 %vm451_vm0, %v6960_v1 }
 0x247   : > { %5448 = vmatprep.mubr.msk.bf16.mxu1 %vm451_vm0, %v6984_v45  ;;  %5477 = vmatpush3.bf16.msra.mxu1 %v2372_v19  ;;  %v3553_v19 = vpack.c.bf16 %v3536_v43, %v3535_v56  ;;  %v4220_v56 = vld [vmem:[%s7986_s7 + $0x58] sm:$0xff] }
 0x24e   : > { %5449 = vmatmul.mubr.msk.bf16.gmra.mrb[8].mxu1 %vm451_vm0, %v6987_v47 }
 0x24f   : > { %5452 = vmatprep.mubr.msk.bf16.mxu1 %vm451_vm0, %v6999_v53  ;;  %v3508_v53 = vld [vmem:[#allocation2 + $0x39] sm:$0xff] }
 0x256   : > { %5453 = vmatmul.mubr.msk.bf16.gmra.mrb[12].mxu1 %vm451_vm0, %v7006_v57 }
 0x257   : > { %5456 = vmatprep.mubr.msk.bf16.mxu1 %vm451_vm0, %v7017_v3 }
 0x25e   : > { %5457 = vmatmul.mubr.msk.bf16.gmra.mrb[16].mxu1 %vm451_vm0, %v7019_v5  ;;  %v3507_v5 = vld [vmem:[#allocation2 + $0x31] sm:$0xff] }
 0x25f   : > { %5460 = vmatprep.mubr.msk.bf16.mxu1 %vm451_vm0, %v7029_v13  ;;  %v3539_v13 = vpack.c.bf16 %v3508_v53, %v3507_v5  ;;  %v3825_v53 = vld [vmem:[#allocation2 + $0x6a] sm:$0xff] }
 0x266   : > { %5461 = vmatmul.mubr.msk.bf16.gmra.mrb[20].mxu1 %vm451_vm0, %v7031_v14 }
 0x267   : > { %5464 = vmatprep.mubr.msk.bf16.mxu1 %vm451_vm0, %v7041_v27 }
 0x26e   : > { %5465 = vmatmul.mubr.msk.bf16.gmra.mrb[24].mxu1 %vm451_vm0, %v7043_v28 }
 0x26f   : > { %v1263_v23 = vpop.permute.xlu0 %1262  ;;  %5468 = vmatprep.mubr.msk.bf16.mxu1 %vm451_vm0, %v7053_v39 }
 0x270   : > { %v1322_v35 = vmul.f32 %v1263_v23, %v6741_v29  ;;  %v3821_v23 = vld [vmem:[#allocation2 + $0x3a] sm:$0xff] }
 0x272   : > { %1376 = vst.msk [vmem:[#allocation2 + $0x1a0] sm:$0xff] %vm451_vm0, %v1322_v35 }
 0x276   : > { %5469 = vmatmul.mubr.msk.bf16.gmra.mrb[28].mxu1 %vm451_vm0, %v7055_v55 }
 0x277   : > { %5478 = vmatprep.mubr.msk.bf16.mxu1 %vm451_vm0, %v7072_v58  ;;  %v3509_v58 = vld [vmem:[#allocation2 + $0x49] sm:$0xff] }
 0x279   : > { %v3225_v3 = vld [vmem:[#allocation2 + $0x1a0] sm:$0xff] }
 0x27e   : > { %v1258_v1 = vpop.permute.xlu1 %1257  ;;  %5479 = vmatmul.mubr.msk.bf16.vlgmr.msra.gmra.mrb[0].mxu1 %vm451_vm0, %v7066_v49  ;;  %v3512_v49 = vld [vmem:[#allocation2 + $0x69] sm:$0xff] }
 0x27f   : > { %v1321_v45 = vmul.f32 %v1258_v1, %v6762_v48  ;;  %5482 = vmatprep.mubr.msk.bf16.mxu1 %vm451_vm0, %v7081_v2 }
 0x281   : > { %1375 = vst.msk [vmem:[#allocation2 + $0x198] sm:$0xff] %vm451_vm0, %v1321_v45  ;;  %v3820_v45 = vld [vmem:[#allocation2 + $0x32] sm:$0xff] }
 0x282   : > { %v1268_v29 = vpop.permute.xlu1 %1267 }
 0x283   : > { %v1323_v47 = vmul.f32 %v1268_v29, %v6748_v34  ;;  %v3510_v34 = vld [vmem:[#allocation2 + $0x51] sm:$0xff]  ;;  %v3852_v29 = vpack.c.bf16 %v3821_v23, %v3820_v45 }
 0x284   : > { %v3540_v2 = vpack.c.bf16 %v3510_v34, %v3509_v58  ;;  %v3827_v34 = vld [vmem:[#allocation2 + $0x82] sm:$0xff] }
 0x285   : > { %1377 = vst.msk [vmem:[#allocation2 + $0x1a8] sm:$0x3] %vm458_vm1, %v1323_v47  ;;  %v3823_v47 = vld [vmem:[#allocation2 + $0x52] sm:$0xff] }
 0x286   : > { %5483 = vmatmul.mubr.msk.bf16.gmra.mrb[4].mxu1 %vm451_vm0, %v7086_v8  ;;  %v3511_v8 = vld [vmem:[#allocation2 + $0x61] sm:$0xff] }
 0x287   : > { %5486 = vmatprep.mubr.msk.bf16.mxu1 %vm451_vm0, %v7111_v18  ;;  %v3541_v18 = vpack.c.bf16 %v3512_v49, %v3511_v8  ;;  %v3829_v49 = vld [vmem:[#allocation2 + $0x9a] sm:$0xff] }
 0x288   : > { %v3224_v57 = vld [vmem:[#allocation2 + $0x198] sm:$0xff] }
 0x289   : > { %v3241_v48 = vpack.c.bf16 %v3225_v3, %v3224_v57  ;;  %v3537_v35 = vld [vmem:[#allocation2 + $0x199] sm:$0xff]  ;;  %v3822_v57 = vld [vmem:[#allocation2 + $0x4a] sm:$0xff] }
 0x28a   : > { %v3853_v3 = vpack.c.bf16 %v3823_v47, %v3822_v57  ;;  %v4222_v47 = vld [vmem:[%s7986_s7 + $0x68] sm:$0xff] }
 0x28b   : > { %5621 = vmatmul.mubr.msk.bf16.gmra.mrb[28].mxu0 %vm451_vm0, %v3241_v48  ;;  %v3824_v48 = vld [vmem:[#allocation2 + $0x62] sm:$0xff] }
 0x28c   : > { %5630 = vmatprep.mubr.msk.bf16.mxu0 %vm451_vm0, %v3539_v13  ;;  %v3854_v5 = vpack.c.bf16 %v3825_v53, %v3824_v48  ;;  %v3826_v13 = vld [vmem:[#allocation2 + $0x7a] sm:$0xff] }
 0x28d   : > { %v3855_v58 = vpack.c.bf16 %v3827_v34, %v3826_v13  ;;  %v4224_v48 = vld [vmem:[%s7986_s7 + $0x78] sm:$0xff]  ;;  %v6431_v13 = vmov 0.0  }
 0x28e   : > { %5487 = vmatmul.mubr.msk.bf16.gmra.mrb[8].mxu1 %vm451_vm0, %v7115_v54  ;;  %v3513_v54 = vld [vmem:[#allocation2 + $0x79] sm:$0xff] }
 0x28f   : > { %5490 = vmatprep.mubr.msk.bf16.mxu1 %vm451_vm0, %v7126_v26  ;;  %v3542_v24 = vpack.c.bf16 %v3514_v22, %v3513_v54  ;;  %v3515_v26 = vld [vmem:[#allocation2 + $0x91] sm:$0xff]  ;;  %v3832_v22 = vld [vmem:[#allocation2 + $0xc2] sm:$0xff] }
 0x293   : > { %5631 = vmatmul.mubr.msk.bf16.vlgmr.msra.gmra.mrb[0].mxu0 %vm451_vm0, %v3540_v2  ;;  %v3828_v2 = vld [vmem:[#allocation2 + $0x92] sm:$0xff] }
 0x294   : > { %5663 = vmatpush3.bf16.msra.mxu0 %v7131_v32  ;;  %5634 = vmatprep.mubr.msk.bf16.mxu0 %vm451_vm0, %v3541_v18  ;;  %v3543_v32 = vpack.c.bf16 %v3516_v9, %v3515_v26  ;;  %v3856_v8 = vpack.c.bf16 %v3829_v49, %v3828_v2  ;;  %v3831_v18 = vld [vmem:[#allocation2 + $0xb2] sm:$0xff]  ;;  %v3835_v26 = vld [vmem:[#allocation2 + $0xe2] sm:$0xff] }
 0x295   : > { %5664 = vmatprep.subr.bf16.mxu0 %v6147_v17 }
 0x296   : > { %5491 = vmatmul.mubr.msk.bf16.gmra.mrb[12].mxu1 %vm451_vm0, %v7133_v33  ;;  %v3517_v33 = vld [vmem:[#allocation2 + $0xa9] sm:$0xff] }
 0x297   : > { %5494 = vmatprep.mubr.msk.bf16.mxu1 %vm451_vm0, %v7144_v10  ;;  %v3544_v38 = vpack.c.bf16 %v3518_v36, %v3517_v33  ;;  %v3519_v10 = vld [vmem:[#allocation2 + $0xc1] sm:$0xff]  ;;  %v3836_v33 = vld [vmem:[#allocation2 + $0xf2] sm:$0xff] }
 0x298   : > { %5665 = vmatpush3.bf16.msra.mxu0 %v6147_v17  ;;  %v3545_v63 = vpack.c.bf16 %v3520_v20, %v3519_v10  ;;  %v3830_v17 = vld [vmem:[#allocation2 + $0xaa] sm:$0xff]  ;;  %v3851_v20 = vld [vmem:[#allocation2 + $0x1a2] sm:$0xff] }
 0x299   : > { %6106 = vmatprep.subr.msk.bf16.mxu0 %vm1548_vm2, %v6148_v21  ;;  %v3833_v21 = vld [vmem:[#allocation2 + $0xca] sm:$0xff]  ;;  %v3857_v54 = vpack.c.bf16 %v3831_v18, %v3830_v17 }
 0x29a   : > { %v3858_v9 = vpack.c.bf16 %v3833_v21, %v3832_v22 }
 0x29b   : > { %5635 = vmatmul.mubr.msk.bf16.gmra.mrb[4].mxu0 %vm451_vm0, %v3542_v24  ;;  %v3834_v24 = vld [vmem:[#allocation2 + $0xda] sm:$0xff] }
 0x29c   : > { %5638 = vmatprep.mubr.msk.bf16.mxu0 %vm451_vm0, %v3543_v32  ;;  %5667 = vmatpush3.bf16.msra.mxu0 %v3938_v31  ;;  %v3837_v31 = vld [vmem:[#allocation2 + $0xfa] sm:$0xff]  ;;  %v3859_v32 = vpack.c.bf16 %v3835_v26, %v3834_v24 }
 0x29d   : > { %v3860_v36 = vpack.c.bf16 %v3837_v31, %v3836_v33 }
 0x29e   : > { %5495 = vmatmul.mubr.msk.bf16.gmra.mrb[16].mxu1 %vm451_vm0, %v7146_v40  ;;  %v3524_v40 = vld [vmem:[#allocation2 + $0xf9] sm:$0xff] }
 0x29f   : > { %5498 = vmatprep.mubr.msk.bf16.mxu1 %vm451_vm0, %v7156_v30  ;;  %v3547_v30 = vpack.c.bf16 %v3524_v40, %v3523_v4  ;;  %v7343_v40 = vpack.c.bf16 %v4214_v42, %v4213_v50 }
 0x2a3   : > { %5639 = vmatmul.mubr.msk.bf16.gmra.mrb[8].mxu0 %vm451_vm0, %v3544_v38  ;;  %v3850_v38 = vld [vmem:[#allocation2 + $0x19a] sm:$0xff] }
 0x2a4   : > { %5642 = vmatprep.mubr.msk.bf16.mxu0 %vm451_vm0, %v3545_v63  ;;  %v3867_v10 = vpack.c.bf16 %v3851_v20, %v3850_v38 }
 0x2a6   : > { %5499 = vmatmul.mubr.msk.bf16.gmra.mrb[20].mxu1 %vm451_vm0, %v7158_v46  ;;  %v3528_v46 = vld [vmem:[#allocation2 + $0x129] sm:$0xff] }
 0x2a7   : > { %5502 = vmatprep.mubr.msk.bf16.mxu1 %vm451_vm0, %v7168_v16  ;;  %v3549_v16 = vpack.c.bf16 %v3528_v46, %v3527_v12  ;;  %v4216_v46 = vld [vmem:[%s7986_s7 + $0x38] sm:$0xff] }
 0x2ab   : > { %5643 = vmatmul.mubr.msk.bf16.gmra.mrb[12].mxu0 %vm451_vm0, %v3546_v44 }
 0x2ac   : > { %5646 = vmatprep.mubr.msk.bf16.mxu0 %vm451_vm0, %v3547_v30 }
 0x2ae   : > { %5503 = vmatmul.mubr.msk.bf16.gmra.mrb[24].mxu1 %vm451_vm0, %v7170_v59  ;;  %v3550_v59 = vpack.c.bf16 %v3530_v61, %v3529_v60 }
 0x2af   : > { %5506 = vmatprep.mubr.msk.bf16.mxu1 %vm451_vm0, %v7180_v6  ;;  %v3533_v6 = vld [vmem:[#allocation2 + $0x169] sm:$0xff] }
 0x2b0   : > { %v3552_v15 = vpack.c.bf16 %v3534_v41, %v3533_v6 }
 0x2b3   : > { %5647 = vmatmul.mubr.msk.bf16.gmra.mrb[16].mxu0 %vm451_vm0, %v3548_v62  ;;  %v7357_v62 = vpack.c.bf16 %v4216_v46, %v4215_v51 }
 0x2b4   : > { %5650 = vmatprep.mubr.msk.bf16.mxu0 %vm451_vm0, %v3549_v16 }
 0x2b6   : > { %5507 = vmatmul.mubr.msk.bf16.gmra.mrb[28].mxu1 %vm451_vm0, %v7182_v11  ;;  %v3538_v11 = vld [vmem:[#allocation2 + $0x1a1] sm:$0xff] }
 0x2b7   : > { %v3554_v1 = vpack.c.bf16 %v3538_v11, %v3537_v35  ;;  %5732 = vmatprep.mubr.msk.f32.mxu1 %vm6430_vm3, %v6431_v13 }
 0x2bb   : > { %5651 = vmatmul.mubr.msk.bf16.gmra.mrb[20].mxu0 %vm451_vm0, %v3550_v59  ;;  %v4218_v59 = vld [vmem:[%s7986_s7 + $0x48] sm:$0xff] }
 0x2bc   : > { %5654 = vmatprep.mubr.msk.bf16.mxu0 %vm451_vm0, %v3551_v25  ;;  %v7375_v7 = vpack.c.bf16 %v4218_v59, %v4217_v0 }
 0x2c3   : > { %5655 = vmatmul.mubr.msk.bf16.gmra.mrb[24].mxu0 %vm451_vm0, %v3552_v15  ;;  %v4219_v15 = vld [vmem:[%s7986_s7 + $0x50] sm:$0xff] }
 0x2c4   : > { %5658 = vmatprep.mubr.msk.bf16.mxu0 %vm451_vm0, %v3553_v19  ;;  %v7393_v19 = vpack.c.bf16 %v4220_v56, %v4219_v15 }
 0x2cb   : > { %5659 = vmatmul.mubr.msk.bf16.gmra.mrb[28].mxu0 %vm451_vm0, %v3554_v1 }
 0x2cc   : > { %5668 = vmatprep.mubr.msk.bf16.mxu0 %vm451_vm0, %v3852_v29  ;;  %v4221_v29 = vld [vmem:[%s7986_s7 + $0x60] sm:$0xff] }
 0x2cd   : > { %v7415_v57 = vpack.c.bf16 %v4222_v47, %v4221_v29 }
 0x2d3   : > { %5669 = vmatmul.mubr.msk.bf16.vlgmr.msra.gmra.mrb[0].mxu0 %vm451_vm0, %v3853_v3  ;;  %v4223_v3 = vld [vmem:[%s7986_s7 + $0x70] sm:$0xff] }
 0x2d4   : > { %5672 = vmatprep.mubr.msk.bf16.mxu0 %vm451_vm0, %v3854_v5  ;;  %v7430_v49 = vpack.c.bf16 %v4224_v48, %v4223_v3 }
 0x2db   : > { %5673 = vmatmul.mubr.msk.bf16.gmra.mrb[4].mxu0 %vm451_vm0, %v3855_v58 }
 0x2dc   : > { %5676 = vmatprep.mubr.msk.bf16.mxu0 %vm451_vm0, %v3856_v8 }
 0x2e3   : > { %5677 = vmatmul.mubr.msk.bf16.gmra.mrb[8].mxu0 %vm451_vm0, %v3857_v54 }
 0x2e4   : > { %5680 = vmatprep.mubr.msk.bf16.mxu0 %vm451_vm0, %v3858_v9 }
 0x2eb   : > { %5681 = vmatmul.mubr.msk.bf16.gmra.mrb[12].mxu0 %vm451_vm0, %v3859_v32 }
 0x2ec   : > { %5684 = vmatprep.mubr.msk.bf16.mxu0 %vm451_vm0, %v3860_v36 }
 0x2f3   : > { %5685 = vmatmul.mubr.msk.bf16.gmra.mrb[16].mxu0 %vm451_vm0, %v7031_v14  ;;  %v4209_v14 = vld [vmem:[%s7986_s7] sm:$0xff] }
 0x2f4   : > { %5688 = vmatprep.mubr.msk.bf16.mxu0 %vm451_vm0, %v7041_v27  ;;  %v4210_v27 = vld [vmem:[%s7986_s7 + $0x8] sm:$0xff] }
 0x2fb   : > { %5689 = vmatmul.mubr.msk.bf16.gmra.mrb[20].mxu0 %vm451_vm0, %v7043_v28  ;;  %v6429_v28 = vmov 0.0|0.0  }
 0x2fc   : > { %5692 = vmatprep.mubr.msk.bf16.mxu0 %vm451_vm0, %v7053_v39  ;;  %5788 = vmatprep.subr.bf16.mxu1 %v6429_v28  ;;  %v7323_v39 = vpack.c.bf16 %v4210_v27, %v4209_v14 }
 0x2fe   : > { %5790 = vmatpush3.bf16.msra.mxu1 %v7323_v39 }
 0x2ff   : > { %5791 = vmatprep.subr.bf16.mxu1 %v6429_v28 }
 0x303   : > { %5693 = vmatmul.mubr.msk.bf16.gmra.mrb[24].mxu0 %vm451_vm0, %v7055_v55  ;;  %v4211_v55 = vld [vmem:[%s7986_s7 + $0x10] sm:$0xff] }
 0x304   : > { %5696 = vmatprep.mubr.msk.bf16.mxu0 %vm451_vm0, %v7064_v37  ;;  %v4212_v37 = vld [vmem:[%s7986_s7 + $0x18] sm:$0xff] }
 0x305   : > { %v7333_v63 = vpack.c.bf16 %v4212_v37, %v4211_v55 }
 0x307   : > { %5793 = vmatpush3.bf16.msra.mxu1 %v7333_v63 }
 0x308   : > { %5794 = vmatprep.subr.bf16.mxu1 %v6429_v28 }
 0x30b   : > { %5697 = vmatmul.mubr.msk.bf16.gmra.mrb[28].mxu0 %vm451_vm0, %v3867_v10  ;;  %5796 = vmatpush3.bf16.msra.mxu1 %v7343_v40  ;;  %v7462_v10 = vld [vmem:[%s7983_s4] ss:$0 sm:$0xff] }
 0x30c   : > { %5797 = vmatprep.subr.bf16.mxu1 %v6429_v28 }
 0x30f   : > { %5799 = vmatpush3.bf16.msra.mxu1 %v7357_v62 }
 0x310   : > { %5800 = vmatprep.subr.bf16.mxu1 %v6429_v28 }
 0x313   : > { %5802 = vmatpush3.bf16.msra.mxu1 %v7375_v7 }
 0x314   : > { %5803 = vmatprep.subr.bf16.mxu1 %v6429_v28 }
 0x317   : > { %5805 = vmatpush3.bf16.msra.mxu1 %v7393_v19 }
 0x318   : > { %5806 = vmatprep.subr.bf16.mxu1 %v6429_v28 }
 0x31b   : > { %5808 = vmatpush3.bf16.msra.mxu1 %v7415_v57 }
 0x31c   : > { %5809 = vmatprep.subr.bf16.mxu1 %v6429_v28 }
 0x31f   : > { %5811 = vmatpush3.bf16.msra.mxu1 %v7430_v49 }
 0x320   : > { %5812 = vmatprep.subr.bf16.mxu1 %v6429_v28 }
 0x351   : > { %v5480_v44 = vpop.f32.mrb[0].mxu1 }
 0x352   : > { %v2408_v4 = vpop.f32.mrb[1].mxu1 }
 0x353   : > { %v7347_v30 = vpop.f32.mrb[2].mxu1 }
 0x354   : > { %v7349_v52 = vpop.f32.mrb[3].mxu1 }
 0x359   : > { %v7361_v12 = vpop.f32.mrb[4].mxu1 }
 0x35a   : > { %v7363_v16 = vpop.f32.mrb[5].mxu1 }
 0x35b   : > { %v7365_v60 = vpop.f32.mrb[6].mxu1 }
 0x35c   : > { %v7367_v61 = vpop.f32.mrb[7].mxu1 }
 0x361   : > { %v7379_v25 = vpop.f32.mrb[8].mxu1 }
 0x362   : > { %v7381_v6 = vpop.f32.mrb[9].mxu1 }
 0x363   : > { %v7383_v41 = vpop.f32.mrb[10].mxu1 }
 0x364   : > { %v7385_v43 = vpop.f32.mrb[11].mxu1 }
 0x369   : > { %v7397_v11 = vpop.f32.mrb[12].mxu1 }
 0x36a   : > { %v7399_v23 = vpop.f32.mrb[13].mxu1 }
 0x36b   : > { %v7401_v35 = vpop.f32.mrb[14].mxu1 }
 0x36c   : > { %v7403_v1 = vpop.f32.mrb[15].mxu1 }
 0x371   : > { %v7405_v45 = vpop.f32.mrb[16].mxu1 }
 0x372   : > { %v7413_v53 = vpop.f32.mrb[17].mxu1 }
 0x373   : > { %v7423_v5 = vpop.f32.mrb[18].mxu1 }
 0x374   : > { %v7427_v34 = vpop.f32.mrb[19].mxu1 }
 0x379   : > { %v7434_v58 = vpop.f32.mrb[20].mxu1 }
 0x37a   : > { %v7437_v2 = vpop.f32.mrb[21].mxu1 }
 0x37b   : > { %v7439_v8 = vpop.f32.mrb[22].mxu1 }
 0x37c   : > { %v7441_v17 = vpop.f32.mrb[23].mxu1 }
 0x381   : > { %v7443_v18 = vpop.f32.mrb[24].mxu1 }
 0x382   : > { %v7445_v21 = vpop.f32.mrb[25].mxu1 }
 0x383   : > { %v7447_v54 = vpop.f32.mrb[26].mxu1 }
 0x384   : > { %v7449_v22 = vpop.f32.mrb[27].mxu1 }
 0x389   : > { %v7451_v9 = vpop.f32.mrb[28].mxu1 }
 0x38a   : > { %v7453_v24 = vpop.f32.mrb[29].mxu1 }
 0x38b   : > { %v7455_v26 = vpop.f32.mrb[30].mxu1 }
 0x38c   : > { %v7457_v31 = vpop.f32.mrb[31].mxu1 }
 0x3a6   : > { %v5670_v32 = vpop.f32.mrb[0].mxu0 }
 0x3a7   : > { %v5842_v33 = vadd.f32 %v5670_v32, %v5480_v44  ;;  %v3974_v36 = vpop.f32.mrb[1].mxu0 }
 0x3a8   : > { %v5843_v20 = vadd.f32 %v3974_v36, %v2408_v4  ;;  %v5671_v38 = vpop.f32.mrb[2].mxu0 }
 0x3a9   : > { %v5844_v14 = vadd.f32 %v5671_v38, %v7347_v30  ;;  %v3977_v27 = vpop.f32.mrb[3].mxu0  ;;  %v7473_v42 = vadd.f32 %v5842_v33, %v7462_v10 }
 0x3aa   : > { %v5845_v55 = vadd.f32 %v3977_v27, %v7349_v52  ;;  %v7467_v37 = vadd.f32 %v5843_v20, %v7462_v10 }
 0x3ab   : > { %v7479_v30 = vadd.f32 %v5844_v14, %v7462_v10 }
 0x3ac   : > { %v7470_v50 = vadd.f32 %v5845_v55, %v7462_v10 }
 0x3ae   : > { %v4172_v44 = vadd.f32 %v7470_v50, %v7467_v37  ;;  %v5674_v4 = vpop.f32.mrb[4].mxu0 }
 0x3af   : > { %v5846_v51 = vadd.f32 %v5674_v4, %v7361_v12  ;;  %v3990_v46 = vpop.f32.mrb[5].mxu0 }
 0x3b0   : > { %v4173_v52 = vadd.f32 %v4172_v44, %v7473_v42  ;;  %v5847_v0 = vadd.f32 %v3990_v46, %v7363_v16  ;;  %v5675_v59 = vpop.f32.mrb[6].mxu0 }
 0x3b1   : > { %v5848_v15 = vadd.f32 %v5675_v59, %v7365_v60  ;;  %v3993_v56 = vpop.f32.mrb[7].mxu0  ;;  %v7494_v32 = vadd.f32 %v5846_v51, %v7462_v10 }
 0x3b2   : > { %v7485_v29 = vadd.f32 %v5847_v0, %v7462_v10  ;;  %v4174_v47 = vadd.f32 %v4173_v52, %v7479_v30  ;;  %v5849_v3 = vadd.f32 %v3993_v56, %v7367_v61 }
 0x3b3   : > { %v7499_v20 = vadd.f32 %v5848_v15, %v7462_v10 }
 0x3b4   : > { %v4175_v12 = vadd.f32 %v4174_v47, %v7485_v29  ;;  %v7491_v48 = vadd.f32 %v5849_v3, %v7462_v10 }
 0x3b6   : > { %v4176_v16 = vadd.f32 %v4175_v12, %v7491_v48  ;;  %v5678_v33 = vpop.f32.mrb[8].mxu0 }
 0x3b7   : > { %v5850_v60 = vadd.f32 %v5678_v33, %v7379_v25  ;;  %v4006_v36 = vpop.f32.mrb[9].mxu0 }
 0x3b8   : > { %v4177_v38 = vadd.f32 %v4176_v16, %v7494_v32  ;;  %v5851_v61 = vadd.f32 %v4006_v36, %v7381_v6  ;;  %v5679_v14 = vpop.f32.mrb[10].mxu0 }
 0x3b9   : > { %v5852_v27 = vadd.f32 %v5679_v14, %v7383_v41  ;;  %v4009_v55 = vpop.f32.mrb[11].mxu0  ;;  %v7514_v52 = vadd.f32 %v5850_v60, %v7462_v10 }
 0x3ba   : > { %v7505_v44 = vadd.f32 %v5851_v61, %v7462_v10  ;;  %v4178_v4 = vadd.f32 %v4177_v38, %v7499_v20  ;;  %v5853_v51 = vadd.f32 %v4009_v55, %v7385_v43 }
 0x3bb   : > { %v7519_v15 = vadd.f32 %v5852_v27, %v7462_v10 }
 0x3bc   : > { %v4179_v25 = vadd.f32 %v4178_v4, %v7505_v44  ;;  %v7511_v46 = vadd.f32 %v5853_v51, %v7462_v10 }
 0x3be   : > { %v4180_v6 = vadd.f32 %v4179_v25, %v7511_v46  ;;  %v5682_v0 = vpop.f32.mrb[12].mxu0 }
 0x3bf   : > { %v5854_v41 = vadd.f32 %v5682_v0, %v7397_v11  ;;  %v4022_v59 = vpop.f32.mrb[13].mxu0 }
 0x3c0   : > { %v4181_v56 = vadd.f32 %v4180_v6, %v7514_v52  ;;  %v5855_v43 = vadd.f32 %v4022_v59, %v7399_v23  ;;  %v5683_v47 = vpop.f32.mrb[14].mxu0 }
 0x3c1   : > { %v5856_v3 = vadd.f32 %v5683_v47, %v7401_v35  ;;  %v4025_v12 = vpop.f32.mrb[15].mxu0  ;;  %v7534_v38 = vadd.f32 %v5854_v41, %v7462_v10 }
 0x3c2   : > { %v7525_v16 = vadd.f32 %v5855_v43, %v7462_v10  ;;  %v4182_v33 = vadd.f32 %v4181_v56, %v7519_v15  ;;  %v5857_v60 = vadd.f32 %v4025_v12, %v7403_v1 }
 0x3c3   : > { %v7539_v27 = vadd.f32 %v5856_v3, %v7462_v10 }
 0x3c4   : > { %v4183_v11 = vadd.f32 %v4182_v33, %v7525_v16  ;;  %v7531_v36 = vadd.f32 %v5857_v60, %v7462_v10 }
 0x3c6   : > { %v4184_v23 = vadd.f32 %v4183_v11, %v7531_v36  ;;  %v5686_v61 = vpop.f32.mrb[16].mxu0 }
 0x3c7   : > { %v5858_v35 = vadd.f32 %v5686_v61, %v7405_v45  ;;  %v4038_v14 = vpop.f32.mrb[17].mxu0 }
 0x3c8   : > { %v4185_v55 = vadd.f32 %v4184_v23, %v7534_v38  ;;  %v5859_v1 = vadd.f32 %v4038_v14, %v7413_v53  ;;  %v5687_v4 = vpop.f32.mrb[18].mxu0 }
 0x3c9   : > { %v5860_v51 = vadd.f32 %v5687_v4, %v7423_v5  ;;  %v4041_v25 = vpop.f32.mrb[19].mxu0  ;;  %v7554_v56 = vadd.f32 %v5858_v35, %v7462_v10 }
 0x3ca   : > { %v7545_v6 = vadd.f32 %v5859_v1, %v7462_v10  ;;  %v4186_v0 = vadd.f32 %v4185_v55, %v7539_v27  ;;  %v5861_v41 = vadd.f32 %v4041_v25, %v7427_v34 }
 0x3cb   : > { %v7559_v3 = vadd.f32 %v5860_v51, %v7462_v10 }
 0x3cc   : > { %v4187_v45 = vadd.f32 %v4186_v0, %v7545_v6  ;;  %v7551_v59 = vadd.f32 %v5861_v41, %v7462_v10 }
 0x3ce   : > { %v4188_v53 = vadd.f32 %v4187_v45, %v7551_v59  ;;  %v5690_v43 = vpop.f32.mrb[20].mxu0 }
 0x3cf   : > { %v5862_v5 = vadd.f32 %v5690_v43, %v7434_v58  ;;  %v4054_v47 = vpop.f32.mrb[21].mxu0 }
 0x3d0   : > { %v4189_v12 = vadd.f32 %v4188_v53, %v7554_v56  ;;  %v5863_v34 = vadd.f32 %v4054_v47, %v7437_v2  ;;  %v5691_v33 = vpop.f32.mrb[22].mxu0 }
 0x3d1   : > { %v5864_v60 = vadd.f32 %v5691_v33, %v7439_v8  ;;  %v4057_v11 = vpop.f32.mrb[23].mxu0  ;;  %v7574_v55 = vadd.f32 %v5862_v5, %v7462_v10 }
 0x3d2   : > { %v7565_v23 = vadd.f32 %v5863_v34, %v7462_v10  ;;  %v4190_v61 = vadd.f32 %v4189_v12, %v7559_v3  ;;  %v5865_v35 = vadd.f32 %v4057_v11, %v7441_v17 }
 0x3d3   : > { %v7579_v51 = vadd.f32 %v5864_v60, %v7462_v10 }
 0x3d4   : > { %v4191_v58 = vadd.f32 %v4190_v61, %v7565_v23  ;;  %v7571_v14 = vadd.f32 %v5865_v35, %v7462_v10 }
 0x3d6   : > { %v4192_v2 = vadd.f32 %v4191_v58, %v7571_v14  ;;  %v5694_v1 = vpop.f32.mrb[24].mxu0 }
 0x3d7   : > { %v5866_v8 = vadd.f32 %v5694_v1, %v7443_v18  ;;  %v4070_v4 = vpop.f32.mrb[25].mxu0 }
 0x3d8   : > { %v4193_v25 = vadd.f32 %v4192_v2, %v7574_v55  ;;  %v5867_v17 = vadd.f32 %v4070_v4, %v7445_v21  ;;  %v5695_v0 = vpop.f32.mrb[26].mxu0 }
 0x3d9   : > { %v5868_v41 = vadd.f32 %v5695_v0, %v7447_v54  ;;  %v4073_v45 = vpop.f32.mrb[27].mxu0  ;;  %v7594_v12 = vadd.f32 %v5866_v8, %v7462_v10 }
 0x3da   : > { %v7585_v53 = vadd.f32 %v5867_v17, %v7462_v10  ;;  %v4194_v43 = vadd.f32 %v4193_v25, %v7579_v51  ;;  %v5869_v5 = vadd.f32 %v4073_v45, %v7449_v22 }
 0x3db   : > { %v7599_v60 = vadd.f32 %v5868_v41, %v7462_v10 }
 0x3dc   : > { %v4195_v18 = vadd.f32 %v4194_v43, %v7585_v53  ;;  %v7591_v47 = vadd.f32 %v5869_v5, %v7462_v10  ;;  %v4296_v5 = vld [vmem:[%s7987_s8] sm:$0xff] }
 0x3de   : > { %v4196_v21 = vadd.f32 %v4195_v18, %v7591_v47  ;;  %v5698_v34 = vpop.f32.mrb[28].mxu0  ;;  %v4297_v18 = vld [vmem:[%s7987_s8 + $0x8] sm:$0xff] }
 0x3df   : > { %v5870_v54 = vadd.f32 %v5698_v34, %v7451_v9  ;;  %v4086_v33 = vpop.f32.mrb[29].mxu0  ;;  %v7628_v34 = vpack.c.bf16 %v4297_v18, %v4296_v5 }
 0x3e0   : > { %v4197_v11 = vadd.f32 %v4196_v21, %v7594_v12  ;;  %v5871_v22 = vadd.f32 %v4086_v33, %v7453_v24  ;;  %v5699_v61 = vpop.f32.mrb[30].mxu0 }
 0x3e1   : > { %v5872_v35 = vadd.f32 %v5699_v61, %v7455_v26  ;;  %v4089_v58 = vpop.f32.mrb[31].mxu0  ;;  %v7614_v25 = vadd.f32 %v5870_v54, %v7462_v10  ;;  %v7637_v54 = vld [vmem:[%s7987_s8 + $0x10] sm:$0xf] }
 0x3e2   : > { %v7605_v2 = vadd.f32 %v5871_v22, %v7462_v10  ;;  %v4198_v1 = vadd.f32 %v4197_v11, %v7599_v60  ;;  %v5873_v8 = vadd.f32 %v4089_v58, %v7457_v31 }
 0x3e3   : > { %v7618_v26 = vadd.f32 %v5872_v35, %v7462_v10 }
 0x3e4   : > { %v4199_v9 = vadd.f32 %v4198_v1, %v7605_v2  ;;  %v7611_v4 = vadd.f32 %v5873_v8, %v7462_v10 }
 0x3e6   : > { %v4200_v24 = vadd.f32 %v4199_v9, %v7611_v4 }
 0x3e8   : > { %v4201_v17 = vadd.f32 %v4200_v24, %v7614_v25 }
 0x3ea   : > { %v4202_v0 = vadd.f32 %v4201_v17, %v7618_v26 }
 0x3ec   : > { %v4203_v41 = vrot.slane %v4202_v0, 4 }
 0x3ee   : > { %v4204_v45 = vadd.f32 %v4203_v41, %v4202_v0 }
 0x3f0   : > { %v4205_v31 = vrot.slane %v4204_v45, 2 }
 0x3f2   : > { %v4206_v43 = vadd.f32 %v4205_v31, %v4204_v45 }
 0x3f4   : > { %v4207_v21 = vrot.slane %v4206_v43, 1 }
 0x3f6   : > { %v4208_v10 = vadd.f32 %v4207_v21, %v4206_v43 }
 0x3f8   : > { %5733 = vmatmul.mubr.f32.vlgmr.msra.gmra.mrb[32].mxu1 %v4208_v10 }
 0x3f9   : > { %5814 = vmatpush3.bf16.msra.mxu1 %v7628_v34  ;;  %5741 = vmatprep.mubr.msk.f32.mxu1 %vm6430_vm3, %v6431_v13 }
 0x3fa   : > { %5739 = vmatprep.subr.mxu1 %v6431_v13 }
 0x3fd   : > { %5740 = vmatpush3.msk.msra.mxu1 %vm1548_vm2, %v7637_v54 }
 0x3fe   : > { %5815 = vmatprep.subr.bf16.mxu1 %v6429_v28 }
 0x4cb   : > { %v4291_v33 = vpop.f32.mrb[32].mxu1 }
 0x4cc   : > { %v4295_v11 = vmul.f32 0.001953125, %v4291_v33  ;;  %v5734_v22 = vpop.f32.mrb[33].mxu1 }
 0x4ce   : > { %5742 = vmatmul.mubr.msk.f32.vlgmr.msra.gmra.mrb[34].mxu1 %vm4299_vm4, %v4295_v11 }
 0x4cf   : > { %5817 = vmatpush3.bf16.msra.mxu1 %v7323_v39  ;;  %5776 = vmatprep.mubr.msk.f32.mxu1 %vm6430_vm3, %v6431_v13  ;;  %v4376_v39 = vlaneseq }
 0x4d0   : > { %5818 = vmatprep.subr.bf16.mxu1 %v6429_v28 }
 0x4d3   : > { %5820 = vmatpush3.bf16.msra.mxu1 %v7333_v63  ;;  %v7661_v63 = vshrl.u32 %v4376_v39, 7 }
 0x4d4   : > { %5821 = vmatprep.subr.bf16.mxu1 %v6429_v28 }
 0x4d7   : > { %5823 = vmatpush3.bf16.msra.mxu1 %v7343_v40 }
 0x4d8   : > { %5824 = vmatprep.subr.bf16.mxu1 %v6429_v28 }
 0x4db   : > { %5826 = vmatpush3.bf16.msra.mxu1 %v7357_v62 }
 0x4dc   : > { %5827 = vmatprep.subr.bf16.mxu1 %v6429_v28 }
 0x4df   : > { %5829 = vmatpush3.bf16.msra.mxu1 %v7375_v7  ;;  %v4378_v7 = vsub.s32 0, %v7661_v63 }
 0x4e0   : > { %5830 = vmatprep.subr.bf16.mxu1 %v6429_v28 }
 0x4e3   : > { %5832 = vmatpush3.bf16.msra.mxu1 %v7393_v19 }
 0x4e4   : > { %5833 = vmatprep.subr.bf16.mxu1 %v6429_v28 }
 0x4e7   : > { %5835 = vmatpush3.bf16.msra.mxu1 %v7415_v57 }
 0x4e8   : > { %5836 = vmatprep.subr.bf16.mxu1 %v6429_v28 }
 0x4eb   : > { %5838 = vmatpush3.bf16.msra.mxu1 %v7430_v49 }
 0x4ec   : > { %5839 = vmatprep.subr.bf16.mxu1 %v6429_v28 }
 0x5a1   : > { %v4372_v40 = vpop.f32.mrb[34].mxu1 }
 0x5a2   : > { %v5743_v62 = vpop.f32.mrb[35].mxu1  ;;  %v7666_v19 = vrot.slane %v4372_v40, %v4378_v7 }
 0x5a4   : > { %v7670_v57 = vsub.f32 %v7467_v37, %v7666_v19  ;;  %v7674_v49 = vsub.f32 %v7470_v50, %v7666_v19  ;;  %v7678_v28 = vsub.f32 %v7473_v42, %v7666_v19  ;;  %v7686_v58 = vsub.f32 %v7479_v30, %v7666_v19 }
 0x5a5   : > { %v7690_v37 = vsub.f32 %v7485_v29, %v7666_v19  ;;  %v7696_v42 = vsub.f32 %v7491_v48, %v7666_v19  ;;  %v7702_v30 = vsub.f32 %v7494_v32, %v7666_v19  ;;  %v7708_v17 = vsub.f32 %v7499_v20, %v7666_v19 }
 0x5a6   : > { %v4412_v61 = vmul.f32 %v7670_v57, %v7670_v57  ;;  %v4413_v35 = vmul.f32 %v7674_v49, %v7674_v49  ;;  %v4414_v50 = vmul.f32 %v7678_v28, %v7678_v28  ;;  %v4415_v8 = vmul.f32 %v7686_v58, %v7686_v58 }
 0x5a7   : > { %v4416_v29 = vmul.f32 %v7690_v37, %v7690_v37  ;;  %v4417_v48 = vmul.f32 %v7696_v42, %v7696_v42  ;;  %v7714_v41 = vsub.f32 %v7505_v44, %v7666_v19  ;;  %v4418_v32 = vmul.f32 %v7702_v30, %v7702_v30 }
 0x5a8   : > { %v4444_v1 = vadd.f32 %v4413_v35, %v4412_v61  ;;  %v7720_v31 = vsub.f32 %v7511_v46, %v7666_v19  ;;  %v4419_v20 = vmul.f32 %v7708_v17, %v7708_v17  ;;  %v7726_v5 = vsub.f32 %v7514_v52, %v7666_v19 }
 0x5a9   : > { %v4420_v44 = vmul.f32 %v7714_v41, %v7714_v41  ;;  %v7732_v21 = vsub.f32 %v7519_v15, %v7666_v19  ;;  %v7738_v33 = vsub.f32 %v7525_v16, %v7666_v19  ;;  %v7744_v22 = vsub.f32 %v7531_v36, %v7666_v19 }
 0x5aa   : > { %v4445_v9 = vadd.f32 %v4444_v1, %v4414_v50  ;;  %v4421_v46 = vmul.f32 %v7720_v31, %v7720_v31  ;;  %v4422_v52 = vmul.f32 %v7726_v5, %v7726_v5  ;;  %v7750_v40 = vsub.f32 %v7534_v38, %v7666_v19 }
 0x5ab   : > { %v4423_v15 = vmul.f32 %v7732_v21, %v7732_v21  ;;  %v4424_v16 = vmul.f32 %v7738_v33, %v7738_v33  ;;  %v7756_v61 = vsub.f32 %v7539_v27, %v7666_v19  ;;  %v4425_v36 = vmul.f32 %v7744_v22, %v7744_v22 }
 0x5ac   : > { %v4446_v24 = vadd.f32 %v4445_v9, %v4415_v8  ;;  %v7762_v50 = vsub.f32 %v7545_v6, %v7666_v19  ;;  %v4426_v38 = vmul.f32 %v7750_v40, %v7750_v40  ;;  %v7768_v8 = vsub.f32 %v7551_v59, %v7666_v19 }
 0x5ad   : > { %v4427_v27 = vmul.f32 %v7756_v61, %v7756_v61 }
 0x5ae   : > { %v4447_v0 = vadd.f32 %v4446_v24, %v4416_v29  ;;  %v7774_v29 = vsub.f32 %v7554_v56, %v7666_v19  ;;  %v4428_v6 = vmul.f32 %v7762_v50, %v7762_v50  ;;  %v4429_v59 = vmul.f32 %v7768_v8, %v7768_v8 }
 0x5b0   : > { %v4448_v45 = vadd.f32 %v4447_v0, %v4417_v48  ;;  %v7780_v48 = vsub.f32 %v7559_v3, %v7666_v19  ;;  %v4430_v56 = vmul.f32 %v7774_v29, %v7774_v29 }
 0x5b2   : > { %v4449_v43 = vadd.f32 %v4448_v45, %v4418_v32  ;;  %v7786_v32 = vsub.f32 %v7565_v23, %v7666_v19  ;;  %v4431_v3 = vmul.f32 %v7780_v48, %v7780_v48 }
 0x5b4   : > { %v4450_v18 = vadd.f32 %v4449_v43, %v4419_v20  ;;  %v7792_v20 = vsub.f32 %v7571_v14, %v7666_v19  ;;  %v4432_v23 = vmul.f32 %v7786_v32, %v7786_v32 }
 0x5b6   : > { %v4451_v10 = vadd.f32 %v4450_v18, %v4420_v44  ;;  %v7798_v44 = vsub.f32 %v7574_v55, %v7666_v19  ;;  %v4433_v14 = vmul.f32 %v7792_v20, %v7792_v20 }
 0x5b8   : > { %v4452_v11 = vadd.f32 %v4451_v10, %v4421_v46  ;;  %v7804_v46 = vsub.f32 %v7579_v51, %v7666_v19  ;;  %v4434_v55 = vmul.f32 %v7798_v44, %v7798_v44 }
 0x5ba   : > { %v4453_v39 = vadd.f32 %v4452_v11, %v4422_v52  ;;  %v7810_v52 = vsub.f32 %v7585_v53, %v7666_v19  ;;  %v4435_v51 = vmul.f32 %v7804_v46, %v7804_v46 }
 0x5bc   : > { %v4454_v62 = vadd.f32 %v4453_v39, %v4423_v15  ;;  %v7816_v15 = vsub.f32 %v7591_v47, %v7666_v19  ;;  %v4436_v53 = vmul.f32 %v7810_v52, %v7810_v52 }
 0x5be   : > { %v4455_v35 = vadd.f32 %v4454_v62, %v4424_v16  ;;  %v7822_v16 = vsub.f32 %v7594_v12, %v7666_v19  ;;  %v4437_v47 = vmul.f32 %v7816_v15, %v7816_v15 }
 0x5c0   : > { %v4456_v1 = vadd.f32 %v4455_v35, %v4425_v36  ;;  %v7828_v36 = vsub.f32 %v7599_v60, %v7666_v19  ;;  %v4438_v12 = vmul.f32 %v7822_v16, %v7822_v16 }
 0x5c2   : > { %v4457_v9 = vadd.f32 %v4456_v1, %v4426_v38  ;;  %v7834_v38 = vsub.f32 %v7605_v2, %v7666_v19  ;;  %v4439_v60 = vmul.f32 %v7828_v36, %v7828_v36 }
 0x5c4   : > { %v4458_v24 = vadd.f32 %v4457_v9, %v4427_v27  ;;  %v7840_v27 = vsub.f32 %v7611_v4, %v7666_v19  ;;  %v4440_v2 = vmul.f32 %v7834_v38, %v7834_v38 }
 0x5c6   : > { %v4459_v0 = vadd.f32 %v4458_v24, %v4428_v6  ;;  %v7846_v6 = vsub.f32 %v7614_v25, %v7666_v19 }
 0x5c8   : > { %v4460_v45 = vadd.f32 %v4459_v0, %v4429_v59  ;;  %v4411_v59 = vsub.f32 %v7618_v26, %v7666_v19  ;;  %v4441_v0 = vmul.f32 %v7840_v27, %v7840_v27 }
 0x5ca   : > { %v4461_v43 = vadd.f32 %v4460_v45, %v4430_v56  ;;  %v4442_v56 = vmul.f32 %v7846_v6, %v7846_v6 }
 0x5cc   : > { %v4462_v18 = vadd.f32 %v4461_v43, %v4431_v3  ;;  %v4443_v3 = vmul.f32 %v4411_v59, %v4411_v59 }
 0x5ce   : > { %v4463_v10 = vadd.f32 %v4462_v18, %v4432_v23 }
 0x5d0   : > { %v4464_v11 = vadd.f32 %v4463_v10, %v4433_v14 }
 0x5d2   : > { %v4465_v39 = vadd.f32 %v4464_v11, %v4434_v55 }
 0x5d4   : > { %v4466_v62 = vadd.f32 %v4465_v39, %v4435_v51 }
 0x5d6   : > { %v4467_v35 = vadd.f32 %v4466_v62, %v4436_v53 }
 0x5d8   : > { %v4468_v1 = vadd.f32 %v4467_v35, %v4437_v47 }
 0x5da   : > { %v4469_v9 = vadd.f32 %v4468_v1, %v4438_v12 }
 0x5dc   : > { %v4470_v24 = vadd.f32 %v4469_v9, %v4439_v60 }
 0x5de   : > { %v4471_v4 = vadd.f32 %v4470_v24, %v4440_v2 }
 0x5e0   : > { %v4472_v45 = vadd.f32 %v4471_v4, %v4441_v0 }
 0x5e2   : > { %v4473_v43 = vadd.f32 %v4472_v45, %v4442_v56 }
 0x5e4   : > { %v4474_v23 = vadd.f32 %v4473_v43, %v4443_v3 }
 0x5e6   : > { %v4475_v25 = vrot.slane %v4474_v23, 4 }
 0x5e8   : > { %v4476_v18 = vadd.f32 %v4475_v25, %v4474_v23 }
 0x5ea   : > { %v4477_v14 = vrot.slane %v4476_v18, 2 }
 0x5ec   : > { %v4478_v10 = vadd.f32 %v4477_v14, %v4476_v18 }
 0x5ee   : > { %v4479_v55 = vrot.slane %v4478_v10, 1 }
 0x5f0   : > { %v4480_v11 = vadd.f32 %v4479_v55, %v4478_v10 }
 0x5f2   : > { %5777 = vmatmul.mubr.f32.vlgmr.msra.gmra.mrb[36].mxu1 %v4480_v11 }
 0x5f3   : > { %5841 = vmatpush3.bf16.msra.mxu1 %v7628_v34  ;;  %5785 = vmatprep.mubr.msk.f32.mxu1 %vm6430_vm3, %v6431_v13 }
 0x5f4   : > { %5783 = vmatprep.subr.mxu1 %v6431_v13 }
 0x5f7   : > { %5784 = vmatpush3.msk.msra.mxu1 %vm1548_vm2, %v7637_v54 }
 0x6c5   : > { %v4547_v26 = vpop.f32.mrb[36].mxu1 }
 0x6c6   : > { %v4551_v19 = vmul.f32 0.001953125, %v4547_v26  ;;  %v5778_v51 = vpop.f32.mrb[37].mxu1 }
 0x6c8   : > { %v4552_v39 = vadd.f32 1e-05, %v4551_v19  ;;  %v5141_v19 = vld [vmem:[%s7985_s6] ss:$0 sm:$0xff] }
 0x6ca   : > { %6365 = vrsqrt.f32 %v4552_v39 }
 0x6d4   : > { %v6366_v53 = vpop.eup %6365 }
 0x6d5   : > { %5786 = vmatmul.mubr.msk.f32.vlgmr.msra.gmra.mrb[38].mxu1 %vm4299_vm4, %v6366_v53 }
 0x7a8   : > { %v4623_v62 = vpop.f32.mrb[38].mxu1 }
 0x7a9   : > { %v4630_v34 = vrot.slane %v4623_v62, %v4378_v7  ;;  %v5787_v47 = vpop.f32.mrb[39].mxu1 }
 0x7ab   : > { %v4631_v35 = vmul.f32 %v4630_v34, %v7670_v57  ;;  %v4632_v13 = vmul.f32 %v4630_v34, %v7674_v49  ;;  %v4633_v12 = vmul.f32 %v4630_v34, %v7678_v28  ;;  %v4634_v54 = vmul.f32 %v4630_v34, %v7686_v58 }
 0x7ac   : > { %v4635_v1 = vmul.f32 %v4630_v34, %v7690_v37  ;;  %v4636_v60 = vmul.f32 %v4630_v34, %v7696_v42  ;;  %v4637_v9 = vmul.f32 %v4630_v34, %v7702_v30  ;;  %v4638_v2 = vmul.f32 %v4630_v34, %v7708_v17 }
 0x7ad   : > { %v4639_v63 = vmul.f32 %v4630_v34, %v7714_v41  ;;  %v4640_v7 = vmul.f32 %v4630_v34, %v7720_v31  ;;  %v4641_v57 = vmul.f32 %v4630_v34, %v7726_v5  ;;  %v4642_v49 = vmul.f32 %v4630_v34, %v7732_v21 }
 0x7ae   : > { %v4643_v28 = vmul.f32 %v4630_v34, %v7738_v33  ;;  %v4644_v58 = vmul.f32 %v4630_v34, %v7744_v22  ;;  %v4645_v37 = vmul.f32 %v4630_v34, %v7750_v40  ;;  %v4646_v42 = vmul.f32 %v4630_v34, %v7756_v61  ;;  %v5140_v40 = vld [vmem:[%s7984_s5] ss:$0 sm:$0xff] }
 0x7af   : > { %v4647_v30 = vmul.f32 %v4630_v34, %v7762_v50  ;;  %v4648_v17 = vmul.f32 %v4630_v34, %v7768_v8  ;;  %v4649_v41 = vmul.f32 %v4630_v34, %v7774_v29  ;;  %v4650_v31 = vmul.f32 %v4630_v34, %v7780_v48 }
 0x7b0   : > { %v4651_v5 = vmul.f32 %v4630_v34, %v7786_v32  ;;  %v4652_v21 = vmul.f32 %v4630_v34, %v7792_v20  ;;  %v4653_v33 = vmul.f32 %v4630_v34, %v7798_v44  ;;  %v4654_v22 = vmul.f32 %v4630_v34, %v7804_v46 }
 0x7b1   : > { %v4655_v61 = vmul.f32 %v4630_v34, %v7810_v52  ;;  %v4656_v50 = vmul.f32 %v4630_v34, %v7816_v15  ;;  %v4657_v8 = vmul.f32 %v4630_v34, %v7822_v16  ;;  %v4658_v29 = vmul.f32 %v4630_v34, %v7828_v36 }
 0x7b2   : > { %v4659_v48 = vmul.f32 %v4630_v34, %v7834_v38  ;;  %v4660_v32 = vmul.f32 %v4630_v34, %v7840_v27  ;;  %v4661_v20 = vmul.f32 %v4630_v34, %v7846_v6  ;;  %v4662_v44 = vmul.f32 %v4630_v34, %v4411_v59 }
 0x7b3   : > { %v4670_v46 = vmul.f32 %v5140_v40, %v4631_v35  ;;  %v4671_v24 = vmul.f32 %v5140_v40, %v4632_v13  ;;  %v4672_v0 = vmul.f32 %v5140_v40, %v4633_v12  ;;  %v4673_v4 = vmul.f32 %v5140_v40, %v4634_v54 }
 0x7b4   : > { %v4674_v56 = vmul.f32 %v5140_v40, %v4635_v1  ;;  %v4675_v45 = vmul.f32 %v5140_v40, %v4636_v60  ;;  %v4676_v52 = vmul.f32 %v5140_v40, %v4637_v9  ;;  %v4677_v3 = vmul.f32 %v5140_v40, %v4638_v2 }
 0x7b5   : > { %v4678_v15 = vmul.f32 %v5140_v40, %v4639_v63  ;;  %v4679_v43 = vmul.f32 %v5140_v40, %v4640_v7  ;;  %v4680_v16 = vmul.f32 %v5140_v40, %v4641_v57  ;;  %v4681_v23 = vmul.f32 %v5140_v40, %v4642_v49 }
 0x7b6   : > { %v4682_v36 = vmul.f32 %v5140_v40, %v4643_v28  ;;  %v4683_v25 = vmul.f32 %v5140_v40, %v4644_v58  ;;  %v4684_v38 = vmul.f32 %v5140_v40, %v4645_v37  ;;  %v4685_v18 = vmul.f32 %v5140_v40, %v4646_v42 }
 0x7b7   : > { %v4686_v27 = vmul.f32 %v5140_v40, %v4647_v30  ;;  %v4687_v14 = vmul.f32 %v5140_v40, %v4648_v17  ;;  %v4688_v6 = vmul.f32 %v5140_v40, %v4649_v41  ;;  %v4689_v59 = vmul.f32 %v5140_v40, %v4650_v31 }
 0x7b8   : > { %v4690_v10 = vmul.f32 %v5140_v40, %v4651_v5  ;;  %v4691_v55 = vmul.f32 %v5140_v40, %v4652_v21  ;;  %v4692_v11 = vmul.f32 %v5140_v40, %v4653_v33  ;;  %v4693_v26 = vmul.f32 %v5140_v40, %v4654_v22 }
 0x7b9   : > { %v4694_v51 = vmul.f32 %v5140_v40, %v4655_v61  ;;  %v4695_v39 = vmul.f32 %v5140_v40, %v4656_v50  ;;  %v4696_v53 = vmul.f32 %v5140_v40, %v4657_v8  ;;  %v4697_v62 = vmul.f32 %v5140_v40, %v4658_v29 }
 0x7ba   : > { %v4698_v34 = vmul.f32 %v5140_v40, %v4659_v48  ;;  %v4699_v47 = vmul.f32 %v5140_v40, %v4660_v32  ;;  %v4700_v35 = vmul.f32 %v5140_v40, %v4661_v20  ;;  %v4701_v13 = vmul.f32 %v5140_v40, %v4662_v44 }
 0x7bb   : > { %v4709_v12 = vadd.f32 %v5141_v19, %v4670_v46  ;;  %v4710_v54 = vadd.f32 %v5141_v19, %v4671_v24  ;;  %v4711_v1 = vadd.f32 %v5141_v19, %v4672_v0  ;;  %v4712_v60 = vadd.f32 %v5141_v19, %v4673_v4 }
 0x7bc   : > { %v4713_v9 = vadd.f32 %v5141_v19, %v4674_v56  ;;  %v4714_v2 = vadd.f32 %v5141_v19, %v4675_v45  ;;  %v4715_v63 = vadd.f32 %v5141_v19, %v4676_v52  ;;  %v4716_v7 = vadd.f32 %v5141_v19, %v4677_v3 }
 0x7bd   : > { %v4717_v57 = vadd.f32 %v5141_v19, %v4678_v15  ;;  %v4718_v49 = vadd.f32 %v5141_v19, %v4679_v43  ;;  %v4719_v28 = vadd.f32 %v5141_v19, %v4680_v16  ;;  %v4720_v58 = vadd.f32 %v5141_v19, %v4681_v23 }
 0x7be   : > { %v4721_v37 = vadd.f32 %v5141_v19, %v4682_v36  ;;  %v4722_v42 = vadd.f32 %v5141_v19, %v4683_v25  ;;  %v4723_v30 = vadd.f32 %v5141_v19, %v4684_v38  ;;  %v4724_v17 = vadd.f32 %v5141_v19, %v4685_v18 }
 0x7bf   : > { %v4725_v41 = vadd.f32 %v5141_v19, %v4686_v27  ;;  %v4726_v31 = vadd.f32 %v5141_v19, %v4687_v14  ;;  %v4727_v5 = vadd.f32 %v5141_v19, %v4688_v6  ;;  %v4728_v21 = vadd.f32 %v5141_v19, %v4689_v59 }
 0x7c0   : > { %v7903_v33 = vadd.f32 %v5141_v19, %v4690_v10  ;;  %v7905_v22 = vadd.f32 %v5141_v19, %v4691_v55  ;;  %v7907_v40 = vadd.f32 %v5141_v19, %v4692_v11  ;;  %v7909_v61 = vadd.f32 %v5141_v19, %v4693_v26 }
 0x7c1   : > { %v7911_v50 = vadd.f32 %v5141_v19, %v4694_v51  ;;  %v7913_v8 = vadd.f32 %v5141_v19, %v4695_v39  ;;  %v7915_v29 = vadd.f32 %v5141_v19, %v4696_v53  ;;  %v7917_v48 = vadd.f32 %v5141_v19, %v4697_v62 }
 0x7c2   : > { %v7924_v32 = vadd.f32 %v5141_v19, %v4698_v34  ;;  %v7926_v20 = vadd.f32 %v5141_v19, %v4699_v47  ;;  %v7928_v44 = vadd.f32 %v5141_v19, %v4700_v35  ;;  %v7930_v46 = vadd.f32 %v5141_v19, %v4701_v13 }
 0x7c3   : > { %v4741_v24 = vmax.f32 %v4709_v12, 0.0  ;;  %v4742_v0 = vmax.f32 %v4710_v54, 0.0  ;;  %v4743_v4 = vmax.f32 %v4711_v1, 0.0  ;;  %v4744_v56 = vmax.f32 %v4712_v60, 0.0 }
 0x7c4   : > { %v4745_v45 = vmax.f32 %v4713_v9, 0.0  ;;  %v4746_v52 = vmax.f32 %v4714_v2, 0.0  ;;  %v4747_v3 = vmax.f32 %v4715_v63, 0.0  ;;  %v4748_v15 = vmax.f32 %v4716_v7, 0.0 }
 0x7c5   : > { %v4749_v43 = vmax.f32 %v4717_v57, 0.0  ;;  %v4750_v16 = vmax.f32 %v4718_v49, 0.0  ;;  %v4751_v23 = vmax.f32 %v4719_v28, 0.0  ;;  %v4752_v36 = vmax.f32 %v4720_v58, 0.0  ;;  %4773 = vst [vmem:[%s7922_s21] sm:$0xff] %v4741_v24  ;;  %4774 = vst [vmem:[%s7922_s21 + $0x8] sm:$0xff] %v4742_v0 }
 0x7c6   : > { %4775 = vst [vmem:[%s7922_s21 + $0x10] sm:$0xff] %v4743_v4  ;;  %4776 = vst [vmem:[%s7922_s21 + $0x18] sm:$0xff] %v4744_v56  ;;  %v4753_v25 = vmax.f32 %v4721_v37, 0.0  ;;  %v4754_v38 = vmax.f32 %v4722_v42, 0.0  ;;  %v4755_v18 = vmax.f32 %v4723_v30, 0.0  ;;  %v4756_v27 = vmax.f32 %v4724_v17, 0.0 }
 0x7c7   : > { %4777 = vst [vmem:[%s7922_s21 + $0x20] sm:$0xff] %v4745_v45  ;;  %4778 = vst [vmem:[%s7922_s21 + $0x28] sm:$0xff] %v4746_v52  ;;  %v4757_v14 = vmax.f32 %v4725_v41, 0.0  ;;  %v4758_v6 = vmax.f32 %v4726_v31, 0.0  ;;  %v4759_v59 = vmax.f32 %v4727_v5, 0.0  ;;  %v4760_v10 = vmax.f32 %v4728_v21, 0.0 }
 0x7c8   : > { %4779 = vst [vmem:[%s7922_s21 + $0x30] sm:$0xff] %v4747_v3  ;;  %4780 = vst [vmem:[%s7922_s21 + $0x38] sm:$0xff] %v4748_v15  ;;  %v4761_v55 = vmax.f32 %v7903_v33, 0.0  ;;  %v4762_v11 = vmax.f32 %v7905_v22, 0.0  ;;  %v4763_v26 = vmax.f32 %v7907_v40, 0.0  ;;  %v4764_v19 = vmax.f32 %v7909_v61, 0.0 }
 0x7c9   : > { %4781 = vst [vmem:[%s7922_s21 + $0x40] sm:$0xff] %v4749_v43  ;;  %4782 = vst [vmem:[%s7922_s21 + $0x48] sm:$0xff] %v4750_v16  ;;  %v4765_v51 = vmax.f32 %v7911_v50, 0.0  ;;  %v4766_v39 = vmax.f32 %v7913_v8, 0.0  ;;  %v4767_v53 = vmax.f32 %v7915_v29, 0.0  ;;  %v4768_v62 = vmax.f32 %v7917_v48, 0.0 }
 0x7ca   : > { %4783 = vst [vmem:[%s7922_s21 + $0x50] sm:$0xff] %v4751_v23  ;;  %4784 = vst [vmem:[%s7922_s21 + $0x58] sm:$0xff] %v4752_v36  ;;  %v4769_v34 = vmax.f32 %v7924_v32, 0.0  ;;  %v4770_v47 = vmax.f32 %v7926_v20, 0.0  ;;  %v4771_v35 = vmax.f32 %v7928_v44, 0.0  ;;  %v4772_v13 = vmax.f32 %v7930_v46, 0.0 }
 0x7cb   : > { %4785 = vst [vmem:[%s7922_s21 + $0x60] sm:$0xff] %v4753_v25  ;;  %4786 = vst [vmem:[%s7922_s21 + $0x68] sm:$0xff] %v4754_v38 }
 0x7cc   : > { %4787 = vst [vmem:[%s7922_s21 + $0x70] sm:$0xff] %v4755_v18  ;;  %4788 = vst [vmem:[%s7922_s21 + $0x78] sm:$0xff] %v4756_v27 }
 0x7cd   : > { %4789 = vst [vmem:[%s7922_s21 + $0x80] sm:$0xff] %v4757_v14  ;;  %4790 = vst [vmem:[%s7922_s21 + $0x88] sm:$0xff] %v4758_v6 }
 0x7ce   : > { %4791 = vst [vmem:[%s7922_s21 + $0x90] sm:$0xff] %v4759_v59  ;;  %4792 = vst [vmem:[%s7922_s21 + $0x98] sm:$0xff] %v4760_v10 }
 0x7cf   : > { %4793 = vst [vmem:[%s7922_s21 + $0xa0] sm:$0xff] %v4761_v55  ;;  %4794 = vst [vmem:[%s7922_s21 + $0xa8] sm:$0xff] %v4762_v11 }
 0x7d0   : > { %4795 = vst [vmem:[%s7922_s21 + $0xb0] sm:$0xff] %v4763_v26  ;;  %4796 = vst [vmem:[%s7922_s21 + $0xb8] sm:$0xff] %v4764_v19 }
 0x7d1   : > { %4797 = vst [vmem:[%s7922_s21 + $0xc0] sm:$0xff] %v4765_v51  ;;  %4798 = vst [vmem:[%s7922_s21 + $0xc8] sm:$0xff] %v4766_v39 }
 0x7d2   : > { %4799 = vst [vmem:[%s7922_s21 + $0xd0] sm:$0xff] %v4767_v53  ;;  %4800 = vst [vmem:[%s7922_s21 + $0xd8] sm:$0xff] %v4768_v62 }
 0x7d3   : > { %4801 = vst [vmem:[%s7922_s21 + $0xe0] sm:$0xff] %v4769_v34  ;;  %4802 = vst [vmem:[%s7922_s21 + $0xe8] sm:$0xff] %v4770_v47 }
 0x7d4   : > { %4803 = vst [vmem:[%s7922_s21 + $0xf0] sm:$0xff] %v4771_v35  ;;  %4804 = vst [vmem:[%s7922_s21 + $0xf8] sm:$0xff] %v4772_v13 }
 0x7d5 PF: > { %s21_s11 = sadd.s32 1, %s6426_s11  }
 0x7d6   : > { %p18_p4 = scmp.ge.s32.totalorder %s21_s11, 4  }
 0x7d8   :  { %20 = sbr.rel (!%p18_p4) target bundleno = 3 (0x3), region = 96 }

</bundles_post_ra>
